<compile_context>
chip_gen: v6e
topology: v6e:2x2x1
jax: 0.10.0
libtpu: 0.0.40
codegen_flags: <defaults>
</compile_context>

<pallas_src>
import jax
import jax.numpy as jnp
from jax import lax
from jax.experimental import pallas as pl
from jax.experimental.pallas import tpu as pltpu


_TAPS = tuple((dy, dx) for dy in (-1, 0, 1) for dx in (-1, 0, 1))
_NONCENTER = tuple(t for t in _TAPS if t != (0, 0))


def _make_kernel(W, N, compute_dtype):
    def kernel(xin_ref, mask_ref, w1_ref, b1_ref, w2_ref, b2_ref,
               w3_ref, b3_ref, alpha_ref, out_ref):
        xin_f32 = xin_ref[0].astype(jnp.float32)      # (8, N): [u(5), Ax, y, 0]
        masks = mask_ref[...]                         # (8, N) in compute_dtype

        def shift(x, dy, dx):
            # out[:, p] = x[:, p + dy*W + dx], zeroed where the neighbour falls
            # outside its own image.  Masks are periodic with period H*W, so the
            # roll over the fused batch*H*W lane axis never mixes images at
            # unmasked positions.
            d = dy * W + dx
            if d == 0:
                return x
            rolled = pltpu.roll(x, shift=(-d) % N, axis=1)
            idx = _NONCENTER.index((dy, dx))
            return rolled * masks[idx:idx + 1]

        def im2col(x):
            # x: (cin, N) -> (9*cin, N): the 9 taps become MXU K-dim rows.
            return jnp.concatenate([shift(x, dy, dx) for dy, dx in _TAPS],
                                   axis=0)

        def prelu(v, a):
            return jnp.where(v >= 0.0, v, a * v)

        # layer 0: in_conv(concat([u, Ax, y])) -- concat folded into the channel
        # rows of xin; all 9 taps + 8 channels in one (nf, 72) x (72, N) matmul.
        x = jnp.dot(w1_ref[...], im2col(xin_f32.astype(compute_dtype)),
                    preferred_element_type=jnp.float32) + b1_ref[...]
        x = prelu(x, alpha_ref[0])

        # layer 1: conv_list[0] + PReLU: one (nf, 288) x (288, N) matmul.
        x = jnp.dot(w2_ref[...], im2col(x.astype(compute_dtype)),
                    preferred_element_type=jnp.float32) + b2_ref[...]
        x = prelu(x, alpha_ref[1])

        # layer 2: out_conv + residual.  cout is padded to 8; rows >= 5 are
        # sliced off in the wrapper, so adding the full 8-row xin is harmless
        # (rows 0..4 get the exact +u residual).
        out = jnp.dot(w3_ref[...], im2col(x.astype(compute_dtype)),
                      preferred_element_type=jnp.float32)
        out = out + b3_ref[...] + xin_f32
        out_ref[0] = out.astype(out_ref.dtype)

    return kernel


def _pick_bt(B):
    """Largest batch tile that still leaves >= 2 grid steps (v7x: 2 TCs)."""
    if B <= 1:
        return 1
    best = 1
    for bt in range(1, B):
        if B % bt == 0 and B // bt >= 2:
            best = bt
    return best


def _flatten_conv_w(w, cin_pad=None, cout_pad=None):
    """(3,3,cout,cin) -> (cout', 9*cin'), tap-major / channel-minor columns."""
    kh, kw, cout, cin = w.shape
    if cin_pad is not None and cin_pad > cin:
        w = jnp.pad(w, ((0, 0), (0, 0), (0, 0), (0, cin_pad - cin)))
        cin = cin_pad
    if cout_pad is not None and cout_pad > cout:
        w = jnp.pad(w, ((0, 0), (0, 0), (0, cout_pad - cout), (0, 0)))
        cout = cout_pad
    return jnp.transpose(w, (2, 0, 1, 3)).reshape(cout, kh * kw * cin)


def _border_masks(H, W, Bt, dtype):
    """(8, Bt*H*W) 0/1 masks for the 8 non-center taps, built on the host."""
    HW = H * W
    pos = jnp.arange(HW, dtype=jnp.int32)
    yy = pos // W
    xx = pos % W
    rows = []
    for dy, dx in _NONCENTER:
        m = jnp.ones((HW,), jnp.bool_)
        if dy != 0:
            m = m & (yy + dy >= 0) & (yy + dy < H)
        if dx != 0:
            m = m & (xx + dx >= 0) & (xx + dx < W)
        rows.append(m)
    m = jnp.stack(rows, axis=0).astype(dtype)          # (8, HW)
    return jnp.tile(m, (1, Bt))                        # (8, Bt*HW)


def _default_compute_dtype():
    # bf16 MXU (with f32 accumulation) on v6e / v7x; f32 elsewhere (v5e has no
    # bf16 VALU/EUP, keep the full f32 path there).
    try:
        kind = jax.devices()[0].device_kind.lower()
    except Exception:
        return jnp.float32
    if "v6" in kind or "v7" in kind:
        return jnp.bfloat16
    return jnp.float32


def pdnet_dual_block(u, Ax_cur, y, params, compute_dtype=None, batch_tile=None):
    """NCHW inputs: u (B,5,H,W), Ax_cur (B,1,H,W), y (B,1,H,W). Returns NCHW."""
    w1, b1, w2, b2, w3, b3, alpha = params
    if compute_dtype is None:
        compute_dtype = _default_compute_dtype()

    B, c_u, H, W = u.shape
    HW = H * W
    nf = w1.shape[2]
    cin = w1.shape[3]
    cout = w3.shape[2]
    assert cin == c_u + Ax_cur.shape[1] + y.shape[1]

    # Batch folding: process Bt images per grid step as one (C, Bt*HW) slab.
    Bt = _pick_bt(B) if batch_tile is None else batch_tile
    assert B % Bt == 0
    G = B // Bt
    N = Bt * HW

    cin_pad = 8        # u|Ax|y (7ch) + 1 zero channel: aligned 8-sublane pieces
    cout_pad = 8       # full 8-sublane output tile; sliced back to 5 below

    # One tiny XLA concat + transpose into the channels-major fused-batch layout.
    xin = jnp.concatenate(
        [u, Ax_cur, y, jnp.zeros((B, cin_pad - cin, H, W), u.dtype)], axis=1)
    xin = (xin.reshape(G, Bt, cin_pad, HW)
              .transpose(0, 2, 1, 3)
              .reshape(G, cin_pad, N))

    masks = _border_masks(H, W, Bt, compute_dtype)

    w1f = _flatten_conv_w(w1, cin_pad=cin_pad).astype(compute_dtype)    # (nf, 72)
    w2f = _flatten_conv_w(w2).astype(compute_dtype)                     # (nf, 288)
    w3f = _flatten_conv_w(w3, cout_pad=cout_pad).astype(compute_dtype)  # (8, 288)
    b3p = jnp.pad(b3, ((0, cout_pad - cout), (0, 0)))                   # (8, 1)

    out = pl.pallas_call(
        _make_kernel(W, N, compute_dtype),
        out_shape=jax.ShapeDtypeStruct((G, cout_pad, N), u.dtype),
        grid_spec=pltpu.PrefetchScalarGridSpec(
            num_scalar_prefetch=0,
            grid=(G,),
            in_specs=[
                pl.BlockSpec((1, cin_pad, N), lambda g: (g, 0, 0)),
                pl.BlockSpec(masks.shape, lambda g: (0, 0)),
                pl.BlockSpec(w1f.shape, lambda g: (0, 0)),
                pl.BlockSpec(b1.shape, lambda g: (0, 0)),
                pl.BlockSpec(w2f.shape, lambda g: (0, 0)),
                pl.BlockSpec(b2.shape, lambda g: (0, 0)),
                pl.BlockSpec(w3f.shape, lambda g: (0, 0)),
                pl.BlockSpec(b3p.shape, lambda g: (0, 0)),
                pl.BlockSpec(memory_space=pltpu.MemorySpace.SMEM),  # PReLU alphas
            ],
            out_specs=pl.BlockSpec((1, cout_pad, N), lambda g: (g, 0, 0)),
        ),
        compiler_params=pltpu.CompilerParams(
            dimension_semantics=("parallel",)),
    )(xin, masks, w1f, b1, w2f, b2, w3f, b3p, alpha)

    out = out.reshape(G, cout_pad, Bt, HW).transpose(0, 2, 1, 3)
    return out.reshape(B, cout_pad, H, W)[:, :cout]


def init_params(key, in_channels=7, out_channels=5, nf=32):
    """Deterministic init. Conv weights stored (kh, kw, cout, cin); bias (cout, 1)."""
    def xavier(k, cout, cin):
        bound = (6.0 / (9 * cin + 9 * cout)) ** 0.5
        return jax.random.uniform(k, (3, 3, cout, cin), jnp.float32, -bound, bound)

    k1, k2, k3, k4, k5, k6 = jax.random.split(key, 6)
    w1 = xavier(k1, nf, in_channels)
    b1 = 0.01 * jax.random.normal(k4, (nf, 1), jnp.float32)
    w2 = xavier(k2, nf, nf)
    b2 = 0.01 * jax.random.normal(k5, (nf, 1), jnp.float32)
    w3 = xavier(k3, out_channels, nf)
    b3 = 0.01 * jax.random.normal(k6, (out_channels, 1), jnp.float32)
    alpha = jnp.array([0.25, 0.25], jnp.float32)  # nn.PReLU defaults
    return (w1, b1, w2, b2, w3, b3, alpha)


def reference_forward(u, Ax_cur, y, params):
    """Pure-JAX (XLA) reference of the PyTorch forward, for validation."""
    w1, b1, w2, b2, w3, b3, alpha = params

    def conv(x, w, b):
        w_hwio = jnp.transpose(w, (0, 1, 3, 2))   # (kh,kw,cout,cin) -> HWIO
        out = lax.conv_general_dilated(
            x, w_hwio, window_strides=(1, 1), padding="SAME",
            dimension_numbers=("NCHW", "HWIO", "NCHW"))
        return out + b[:, 0][None, :, None, None]

    x = jnp.concatenate([u, Ax_cur, y], axis=1)
    x = conv(x, w1, b1)
    x = jnp.where(x >= 0, x, alpha[0] * x)
    x = conv(x, w2, b2)
    x = jnp.where(x >= 0, x, alpha[1] * x)
    return conv(x, w3, b3) + u


if __name__ == "__main__":
    B, H, W = 4, 16, 16
    in_channels, out_channels, nf = 7, 5, 32   # u:5ch + Ax:1ch + y:1ch -> 7

    key = jax.random.PRNGKey(0)
    ku, ka, ky, kp = jax.random.split(key, 4)
    u = jax.random.normal(ku, (B, out_channels, H, W), jnp.float32)
    Ax_cur = jax.random.normal(ka, (B, 1, H, W), jnp.float32)
    y = jax.random.normal(ky, (B, 1, H, W), jnp.float32)
    params = init_params(kp, in_channels, out_channels, nf)

    ref = jax.block_until_ready(reference_forward(u, Ax_cur, y, params))

    # f32 MXU path: exact check against the XLA reference.
    out = jax.block_until_ready(
        pdnet_dual_block(u, Ax_cur, y, params, compute_dtype=jnp.float32))
    assert out.shape == (B, out_channels, H, W)
    err = float(jnp.max(jnp.abs(out - ref)))
    assert jnp.allclose(out, ref, atol=1e-4, rtol=1e-4), err

    # bf16 MXU path (v6e / v7x rate), f32 accumulation: tightened relative check.
    out_bf16 = jax.block_until_ready(
        pdnet_dual_block(u, Ax_cur, y, params, compute_dtype=jnp.bfloat16))
    rel = float(jnp.max(jnp.abs(out_bf16 - ref)) / jnp.max(jnp.abs(ref)))
    assert rel < 5e-2, rel

    # chip-default dtype path (bf16 on v6e/v7x, f32 elsewhere) must run clean.
    out_auto = jax.block_until_ready(pdnet_dual_block(u, Ax_cur, y, params))
    assert out_auto.shape == (B, out_channels, H, W)
    assert bool(jnp.all(jnp.isfinite(out_auto)))

    print("KERNEL_OK")
</pallas_src>

<mosaic_0001>
module attributes {stable_mosaic.version = 11 : i64} {
  func.func @kernel(%arg0: i32, %arg1: memref<1x8x512xf32, #tpu.memory_space<vmem>>, %arg2: memref<8x512xf32, #tpu.memory_space<vmem>>, %arg3: memref<32x72xf32, #tpu.memory_space<vmem>>, %arg4: memref<32x1xf32, #tpu.memory_space<vmem>>, %arg5: memref<32x288xf32, #tpu.memory_space<vmem>>, %arg6: memref<32x1xf32, #tpu.memory_space<vmem>>, %arg7: memref<8x288xf32, #tpu.memory_space<vmem>>, %arg8: memref<8x1xf32, #tpu.memory_space<vmem>>, %arg9: memref<2xf32, #tpu.memory_space<smem>>, %arg10: memref<1x8x512xf32, #tpu.memory_space<vmem>>) attributes {dimension_semantics = [#tpu.dimension_semantics<parallel>], iteration_bounds = array<i64: 2>, scalar_prefetch = 0 : i64, scratch_operands = 0 : i64, tpu.core_type = #tpu.core_type<tc>, window_params = [{transform_indices = @transform_0, window_bounds = array<i64: 1, 8, 512>}, {pipeline_mode = #tpu.pipeline_mode<synchronous>, transform_indices = @transform_1, window_bounds = array<i64: 8, 512>}, {pipeline_mode = #tpu.pipeline_mode<synchronous>, transform_indices = @transform_2, window_bounds = array<i64: 32, 72>}, {pipeline_mode = #tpu.pipeline_mode<synchronous>, transform_indices = @transform_3, window_bounds = array<i64: 32, 1>}, {pipeline_mode = #tpu.pipeline_mode<synchronous>, transform_indices = @transform_4, window_bounds = array<i64: 32, 288>}, {pipeline_mode = #tpu.pipeline_mode<synchronous>, transform_indices = @transform_5, window_bounds = array<i64: 32, 1>}, {pipeline_mode = #tpu.pipeline_mode<synchronous>, transform_indices = @transform_6, window_bounds = array<i64: 8, 288>}, {pipeline_mode = #tpu.pipeline_mode<synchronous>, transform_indices = @transform_7, window_bounds = array<i64: 8, 1>}, {transform_indices = @transform_8, window_bounds = array<i64: 2>}, {transform_indices = @transform_9, window_bounds = array<i64: 1, 8, 512>}]} {
    %c0 = arith.constant 0 : index
    %c0_0 = arith.constant 0 : index
    %c0_1 = arith.constant 0 : index
    %0 = vector.load %arg1[%c0, %c0_0, %c0_1] : memref<1x8x512xf32, #tpu.memory_space<vmem>>, vector<1x8x512xf32>
    %1 = vector.shape_cast %0 : vector<1x8x512xf32> to vector<8x512xf32>
    %c0_2 = arith.constant 0 : index
    %c0_3 = arith.constant 0 : index
    %2 = vector.load %arg2[%c0_2, %c0_3] : memref<8x512xf32, #tpu.memory_space<vmem>>, vector<8x512xf32>
    %c0_4 = arith.constant 0 : index
    %c0_5 = arith.constant 0 : index
    %3 = vector.load %arg3[%c0_4, %c0_5] : memref<32x72xf32, #tpu.memory_space<vmem>>, vector<32x72xf32>
    %c17_i32 = arith.constant 17 : i32
    %4 = tpu.dynamic_rotate %1 by %c17_i32 dim 1 : vector<8x512xf32>, i32 -> vector<8x512xf32>
    %5 = vector.extract_strided_slice %2 {offsets = [0, 0], sizes = [1, 512], strides = [1, 1]} : vector<8x512xf32> to vector<1x512xf32>
    %6 = vector.broadcast %5 : vector<1x512xf32> to vector<8x512xf32>
    %7 = arith.mulf %4, %6 : vector<8x512xf32>
    %c16_i32 = arith.constant 16 : i32
    %8 = tpu.dynamic_rotate %1 by %c16_i32 dim 1 : vector<8x512xf32>, i32 -> vector<8x512xf32>
    %9 = vector.extract_strided_slice %2 {offsets = [1, 0], sizes = [1, 512], strides = [1, 1]} : vector<8x512xf32> to vector<1x512xf32>
    %10 = vector.broadcast %9 : vector<1x512xf32> to vector<8x512xf32>
    %11 = arith.mulf %8, %10 : vector<8x512xf32>
    %c15_i32 = arith.constant 15 : i32
    %12 = tpu.dynamic_rotate %1 by %c15_i32 dim 1 : vector<8x512xf32>, i32 -> vector<8x512xf32>
    %13 = vector.extract_strided_slice %2 {offsets = [2, 0], sizes = [1, 512], strides = [1, 1]} : vector<8x512xf32> to vector<1x512xf32>
    %14 = vector.broadcast %13 : vector<1x512xf32> to vector<8x512xf32>
    %15 = arith.mulf %12, %14 : vector<8x512xf32>
    %c1_i32 = arith.constant 1 : i32
    %16 = tpu.dynamic_rotate %1 by %c1_i32 dim 1 : vector<8x512xf32>, i32 -> vector<8x512xf32>
    %17 = vector.extract_strided_slice %2 {offsets = [3, 0], sizes = [1, 512], strides = [1, 1]} : vector<8x512xf32> to vector<1x512xf32>
    %18 = vector.broadcast %17 : vector<1x512xf32> to vector<8x512xf32>
    %19 = arith.mulf %16, %18 : vector<8x512xf32>
    %c511_i32 = arith.constant 511 : i32
    %20 = tpu.dynamic_rotate %1 by %c511_i32 dim 1 : vector<8x512xf32>, i32 -> vector<8x512xf32>
    %21 = vector.extract_strided_slice %2 {offsets = [4, 0], sizes = [1, 512], strides = [1, 1]} : vector<8x512xf32> to vector<1x512xf32>
    %22 = vector.broadcast %21 : vector<1x512xf32> to vector<8x512xf32>
    %23 = arith.mulf %20, %22 : vector<8x512xf32>
    %c497_i32 = arith.constant 497 : i32
    %24 = tpu.dynamic_rotate %1 by %c497_i32 dim 1 : vector<8x512xf32>, i32 -> vector<8x512xf32>
    %25 = vector.extract_strided_slice %2 {offsets = [5, 0], sizes = [1, 512], strides = [1, 1]} : vector<8x512xf32> to vector<1x512xf32>
    %26 = vector.broadcast %25 : vector<1x512xf32> to vector<8x512xf32>
    %27 = arith.mulf %24, %26 : vector<8x512xf32>
    %c496_i32 = arith.constant 496 : i32
    %28 = tpu.dynamic_rotate %1 by %c496_i32 dim 1 : vector<8x512xf32>, i32 -> vector<8x512xf32>
    %29 = vector.extract_strided_slice %2 {offsets = [6, 0], sizes = [1, 512], strides = [1, 1]} : vector<8x512xf32> to vector<1x512xf32>
    %30 = vector.broadcast %29 : vector<1x512xf32> to vector<8x512xf32>
    %31 = arith.mulf %28, %30 : vector<8x512xf32>
    %c495_i32 = arith.constant 495 : i32
    %32 = tpu.dynamic_rotate %1 by %c495_i32 dim 1 : vector<8x512xf32>, i32 -> vector<8x512xf32>
    %33 = vector.extract_strided_slice %2 {offsets = [7, 0], sizes = [1, 512], strides = [1, 1]} : vector<8x512xf32> to vector<1x512xf32>
    %34 = vector.broadcast %33 : vector<1x512xf32> to vector<8x512xf32>
    %35 = arith.mulf %32, %34 : vector<8x512xf32>
    %36 = tpu.concatenate %7, %11, %15, %19, %1, %23, %27, %31, %35 in 0 : vector<8x512xf32>, vector<8x512xf32>, vector<8x512xf32>, vector<8x512xf32>, vector<8x512xf32>, vector<8x512xf32>, vector<8x512xf32>, vector<8x512xf32>, vector<8x512xf32> -> vector<72x512xf32>
    %cst = arith.constant dense<0.000000e+00> : vector<32x512xf32>
    %37 = tpu.matmul %3, %36, %cst {dimension_numbers = #tpu.dot_dimension_numbers<[1], [0], [0], [1], [0, 0, 1, 1], [], []>} : vector<32x72xf32>, vector<72x512xf32>, vector<32x512xf32> -> vector<32x512xf32>
    %c0_6 = arith.constant 0 : index
    %c0_7 = arith.constant 0 : index
    %38 = vector.load %arg4[%c0_6, %c0_7] : memref<32x1xf32, #tpu.memory_space<vmem>>, vector<32x1xf32>
    %39 = vector.broadcast %38 : vector<32x1xf32> to vector<32x512xf32>
    %40 = arith.addf %37, %39 : vector<32x512xf32>
    %c0_8 = arith.constant 0 : index
    %41 = memref.load %arg9[%c0_8] : memref<2xf32, #tpu.memory_space<smem>>
    %cst_9 = arith.constant 0.000000e+00 : f32
    %42 = vector.broadcast %cst_9 : f32 to vector<32x512xf32>
    %43 = arith.cmpf oge, %40, %42 : vector<32x512xf32>
    %44 = vector.broadcast %41 : f32 to vector<32x512xf32>
    %45 = arith.mulf %44, %40 : vector<32x512xf32>
    %46 = arith.select %43, %40, %45 : vector<32x512xi1>, vector<32x512xf32>
    %c0_10 = arith.constant 0 : index
    %c0_11 = arith.constant 0 : index
    %47 = vector.load %arg5[%c0_10, %c0_11] : memref<32x288xf32, #tpu.memory_space<vmem>>, vector<32x288xf32>
    %c17_i32_12 = arith.constant 17 : i32
    %48 = tpu.dynamic_rotate %46 by %c17_i32_12 dim 1 : vector<32x512xf32>, i32 -> vector<32x512xf32>
    %49 = vector.extract_strided_slice %2 {offsets = [0, 0], sizes = [1, 512], strides = [1, 1]} : vector<8x512xf32> to vector<1x512xf32>
    %50 = vector.broadcast %49 : vector<1x512xf32> to vector<32x512xf32>
    %51 = arith.mulf %48, %50 : vector<32x512xf32>
    %c16_i32_13 = arith.constant 16 : i32
    %52 = tpu.dynamic_rotate %46 by %c16_i32_13 dim 1 : vector<32x512xf32>, i32 -> vector<32x512xf32>
    %53 = vector.extract_strided_slice %2 {offsets = [1, 0], sizes = [1, 512], strides = [1, 1]} : vector<8x512xf32> to vector<1x512xf32>
    %54 = vector.broadcast %53 : vector<1x512xf32> to vector<32x512xf32>
    %55 = arith.mulf %52, %54 : vector<32x512xf32>
    %c15_i32_14 = arith.constant 15 : i32
    %56 = tpu.dynamic_rotate %46 by %c15_i32_14 dim 1 : vector<32x512xf32>, i32 -> vector<32x512xf32>
    %57 = vector.extract_strided_slice %2 {offsets = [2, 0], sizes = [1, 512], strides = [1, 1]} : vector<8x512xf32> to vector<1x512xf32>
    %58 = vector.broadcast %57 : vector<1x512xf32> to vector<32x512xf32>
    %59 = arith.mulf %56, %58 : vector<32x512xf32>
    %c1_i32_15 = arith.constant 1 : i32
    %60 = tpu.dynamic_rotate %46 by %c1_i32_15 dim 1 : vector<32x512xf32>, i32 -> vector<32x512xf32>
    %61 = vector.extract_strided_slice %2 {offsets = [3, 0], sizes = [1, 512], strides = [1, 1]} : vector<8x512xf32> to vector<1x512xf32>
    %62 = vector.broadcast %61 : vector<1x512xf32> to vector<32x512xf32>
    %63 = arith.mulf %60, %62 : vector<32x512xf32>
    %c511_i32_16 = arith.constant 511 : i32
    %64 = tpu.dynamic_rotate %46 by %c511_i32_16 dim 1 : vector<32x512xf32>, i32 -> vector<32x512xf32>
    %65 = vector.extract_strided_slice %2 {offsets = [4, 0], sizes = [1, 512], strides = [1, 1]} : vector<8x512xf32> to vector<1x512xf32>
    %66 = vector.broadcast %65 : vector<1x512xf32> to vector<32x512xf32>
    %67 = arith.mulf %64, %66 : vector<32x512xf32>
    %c497_i32_17 = arith.constant 497 : i32
    %68 = tpu.dynamic_rotate %46 by %c497_i32_17 dim 1 : vector<32x512xf32>, i32 -> vector<32x512xf32>
    %69 = vector.extract_strided_slice %2 {offsets = [5, 0], sizes = [1, 512], strides = [1, 1]} : vector<8x512xf32> to vector<1x512xf32>
    %70 = vector.broadcast %69 : vector<1x512xf32> to vector<32x512xf32>
    %71 = arith.mulf %68, %70 : vector<32x512xf32>
    %c496_i32_18 = arith.constant 496 : i32
    %72 = tpu.dynamic_rotate %46 by %c496_i32_18 dim 1 : vector<32x512xf32>, i32 -> vector<32x512xf32>
    %73 = vector.extract_strided_slice %2 {offsets = [6, 0], sizes = [1, 512], strides = [1, 1]} : vector<8x512xf32> to vector<1x512xf32>
    %74 = vector.broadcast %73 : vector<1x512xf32> to vector<32x512xf32>
    %75 = arith.mulf %72, %74 : vector<32x512xf32>
    %c495_i32_19 = arith.constant 495 : i32
    %76 = tpu.dynamic_rotate %46 by %c495_i32_19 dim 1 : vector<32x512xf32>, i32 -> vector<32x512xf32>
    %77 = vector.extract_strided_slice %2 {offsets = [7, 0], sizes = [1, 512], strides = [1, 1]} : vector<8x512xf32> to vector<1x512xf32>
    %78 = vector.broadcast %77 : vector<1x512xf32> to vector<32x512xf32>
    %79 = arith.mulf %76, %78 : vector<32x512xf32>
    %80 = tpu.concatenate %51, %55, %59, %63, %46, %67, %71, %75, %79 in 0 : vector<32x512xf32>, vector<32x512xf32>, vector<32x512xf32>, vector<32x512xf32>, vector<32x512xf32>, vector<32x512xf32>, vector<32x512xf32>, vector<32x512xf32>, vector<32x512xf32> -> vector<288x512xf32>
    %cst_20 = arith.constant dense<0.000000e+00> : vector<32x512xf32>
    %81 = tpu.matmul %47, %80, %cst_20 {dimension_numbers = #tpu.dot_dimension_numbers<[1], [0], [0], [1], [0, 0, 1, 1], [], []>} : vector<32x288xf32>, vector<288x512xf32>, vector<32x512xf32> -> vector<32x512xf32>
    %c0_21 = arith.constant 0 : index
    %c0_22 = arith.constant 0 : index
    %82 = vector.load %arg6[%c0_21, %c0_22] : memref<32x1xf32, #tpu.memory_space<vmem>>, vector<32x1xf32>
    %83 = vector.broadcast %82 : vector<32x1xf32> to vector<32x512xf32>
    %84 = arith.addf %81, %83 : vector<32x512xf32>
    %c1 = arith.constant 1 : index
    %85 = memref.load %arg9[%c1] : memref<2xf32, #tpu.memory_space<smem>>
    %cst_23 = arith.constant 0.000000e+00 : f32
    %86 = vector.broadcast %cst_23 : f32 to vector<32x512xf32>
    %87 = arith.cmpf oge, %84, %86 : vector<32x512xf32>
    %88 = vector.broadcast %85 : f32 to vector<32x512xf32>
    %89 = arith.mulf %88, %84 : vector<32x512xf32>
    %90 = arith.select %87, %84, %89 : vector<32x512xi1>, vector<32x512xf32>
    %c0_24 = arith.constant 0 : index
    %c0_25 = arith.constant 0 : index
    %91 = vector.load %arg7[%c0_24, %c0_25] : memref<8x288xf32, #tpu.memory_space<vmem>>, vector<8x288xf32>
    %c17_i32_26 = arith.constant 17 : i32
    %92 = tpu.dynamic_rotate %90 by %c17_i32_26 dim 1 : vector<32x512xf32>, i32 -> vector<32x512xf32>
    %93 = vector.extract_strided_slice %2 {offsets = [0, 0], sizes = [1, 512], strides = [1, 1]} : vector<8x512xf32> to vector<1x512xf32>
    %94 = vector.broadcast %93 : vector<1x512xf32> to vector<32x512xf32>
    %95 = arith.mulf %92, %94 : vector<32x512xf32>
    %c16_i32_27 = arith.constant 16 : i32
    %96 = tpu.dynamic_rotate %90 by %c16_i32_27 dim 1 : vector<32x512xf32>, i32 -> vector<32x512xf32>
    %97 = vector.extract_strided_slice %2 {offsets = [1, 0], sizes = [1, 512], strides = [1, 1]} : vector<8x512xf32> to vector<1x512xf32>
    %98 = vector.broadcast %97 : vector<1x512xf32> to vector<32x512xf32>
    %99 = arith.mulf %96, %98 : vector<32x512xf32>
    %c15_i32_28 = arith.constant 15 : i32
    %100 = tpu.dynamic_rotate %90 by %c15_i32_28 dim 1 : vector<32x512xf32>, i32 -> vector<32x512xf32>
    %101 = vector.extract_strided_slice %2 {offsets = [2, 0], sizes = [1, 512], strides = [1, 1]} : vector<8x512xf32> to vector<1x512xf32>
    %102 = vector.broadcast %101 : vector<1x512xf32> to vector<32x512xf32>
    %103 = arith.mulf %100, %102 : vector<32x512xf32>
    %c1_i32_29 = arith.constant 1 : i32
    %104 = tpu.dynamic_rotate %90 by %c1_i32_29 dim 1 : vector<32x512xf32>, i32 -> vector<32x512xf32>
    %105 = vector.extract_strided_slice %2 {offsets = [3, 0], sizes = [1, 512], strides = [1, 1]} : vector<8x512xf32> to vector<1x512xf32>
    %106 = vector.broadcast %105 : vector<1x512xf32> to vector<32x512xf32>
    %107 = arith.mulf %104, %106 : vector<32x512xf32>
    %c511_i32_30 = arith.constant 511 : i32
    %108 = tpu.dynamic_rotate %90 by %c511_i32_30 dim 1 : vector<32x512xf32>, i32 -> vector<32x512xf32>
    %109 = vector.extract_strided_slice %2 {offsets = [4, 0], sizes = [1, 512], strides = [1, 1]} : vector<8x512xf32> to vector<1x512xf32>
    %110 = vector.broadcast %109 : vector<1x512xf32> to vector<32x512xf32>
    %111 = arith.mulf %108, %110 : vector<32x512xf32>
    %c497_i32_31 = arith.constant 497 : i32
    %112 = tpu.dynamic_rotate %90 by %c497_i32_31 dim 1 : vector<32x512xf32>, i32 -> vector<32x512xf32>
    %113 = vector.extract_strided_slice %2 {offsets = [5, 0], sizes = [1, 512], strides = [1, 1]} : vector<8x512xf32> to vector<1x512xf32>
    %114 = vector.broadcast %113 : vector<1x512xf32> to vector<32x512xf32>
    %115 = arith.mulf %112, %114 : vector<32x512xf32>
    %c496_i32_32 = arith.constant 496 : i32
    %116 = tpu.dynamic_rotate %90 by %c496_i32_32 dim 1 : vector<32x512xf32>, i32 -> vector<32x512xf32>
    %117 = vector.extract_strided_slice %2 {offsets = [6, 0], sizes = [1, 512], strides = [1, 1]} : vector<8x512xf32> to vector<1x512xf32>
    %118 = vector.broadcast %117 : vector<1x512xf32> to vector<32x512xf32>
    %119 = arith.mulf %116, %118 : vector<32x512xf32>
    %c495_i32_33 = arith.constant 495 : i32
    %120 = tpu.dynamic_rotate %90 by %c495_i32_33 dim 1 : vector<32x512xf32>, i32 -> vector<32x512xf32>
    %121 = vector.extract_strided_slice %2 {offsets = [7, 0], sizes = [1, 512], strides = [1, 1]} : vector<8x512xf32> to vector<1x512xf32>
    %122 = vector.broadcast %121 : vector<1x512xf32> to vector<32x512xf32>
    %123 = arith.mulf %120, %122 : vector<32x512xf32>
    %124 = tpu.concatenate %95, %99, %103, %107, %90, %111, %115, %119, %123 in 0 : vector<32x512xf32>, vector<32x512xf32>, vector<32x512xf32>, vector<32x512xf32>, vector<32x512xf32>, vector<32x512xf32>, vector<32x512xf32>, vector<32x512xf32>, vector<32x512xf32> -> vector<288x512xf32>
    %cst_34 = arith.constant dense<0.000000e+00> : vector<8x512xf32>
    %125 = tpu.matmul %91, %124, %cst_34 {dimension_numbers = #tpu.dot_dimension_numbers<[1], [0], [0], [1], [0, 0, 1, 1], [], []>} : vector<8x288xf32>, vector<288x512xf32>, vector<8x512xf32> -> vector<8x512xf32>
    %c0_35 = arith.constant 0 : index
    %c0_36 = arith.constant 0 : index
    %126 = vector.load %arg8[%c0_35, %c0_36] : memref<8x1xf32, #tpu.memory_space<vmem>>, vector<8x1xf32>
    %127 = vector.broadcast %126 : vector<8x1xf32> to vector<8x512xf32>
    %128 = arith.addf %125, %127 : vector<8x512xf32>
    %129 = arith.addf %128, %1 : vector<8x512xf32>
    %c0_37 = arith.constant 0 : index
    %c0_38 = arith.constant 0 : index
    %c0_39 = arith.constant 0 : index
    %130 = vector.load %arg10[%c0_37, %c0_38, %c0_39] : memref<1x8x512xf32, #tpu.memory_space<vmem>>, vector<1x8x512xf32>
    %131 = vector.shape_cast %130 : vector<1x8x512xf32> to vector<8x512xf32>
    %132 = vector.shape_cast %129 : vector<8x512xf32> to vector<1x8x512xf32>
    tpu.vector_store %arg10[%c0_37, %c0_38, %c0_39], %132 {strides = array<i32>} : memref<1x8x512xf32, #tpu.memory_space<vmem>>, vector<1x8x512xf32>,
    return
  }
  func.func @transform_0(%arg0: i32) -> (i32, i32, i32) {
    %c0_i32 = arith.constant 0 : i32
    %c0_i32_0 = arith.constant 0 : i32
    %c0_i32_1 = arith.constant 0 : i32
    return %arg0, %c0_i32, %c0_i32_0 : i32, i32, i32
  }
  func.func @transform_1(%arg0: i32) -> (i32, i32) {
    %c0_i32 = arith.constant 0 : i32
    %c0_i32_0 = arith.constant 0 : i32
    %c0_i32_1 = arith.constant 0 : i32
    return %c0_i32, %c0_i32_0 : i32, i32
  }
  func.func @transform_2(%arg0: i32) -> (i32, i32) {
    %c0_i32 = arith.constant 0 : i32
    %c0_i32_0 = arith.constant 0 : i32
    %c0_i32_1 = arith.constant 0 : i32
    return %c0_i32, %c0_i32_0 : i32, i32
  }
  func.func @transform_3(%arg0: i32) -> (i32, i32) {
    %c0_i32 = arith.constant 0 : i32
    %c0_i32_0 = arith.constant 0 : i32
    %c0_i32_1 = arith.constant 0 : i32
    return %c0_i32, %c0_i32_0 : i32, i32
  }
  func.func @transform_4(%arg0: i32) -> (i32, i32) {
    %c0_i32 = arith.constant 0 : i32
    %c0_i32_0 = arith.constant 0 : i32
    %c0_i32_1 = arith.constant 0 : i32
    return %c0_i32, %c0_i32_0 : i32, i32
  }
  func.func @transform_5(%arg0: i32) -> (i32, i32) {
    %c0_i32 = arith.constant 0 : i32
    %c0_i32_0 = arith.constant 0 : i32
    %c0_i32_1 = arith.constant 0 : i32
    return %c0_i32, %c0_i32_0 : i32, i32
  }
  func.func @transform_6(%arg0: i32) -> (i32, i32) {
    %c0_i32 = arith.constant 0 : i32
    %c0_i32_0 = arith.constant 0 : i32
    %c0_i32_1 = arith.constant 0 : i32
    return %c0_i32, %c0_i32_0 : i32, i32
  }
  func.func @transform_7(%arg0: i32) -> (i32, i32) {
    %c0_i32 = arith.constant 0 : i32
    %c0_i32_0 = arith.constant 0 : i32
    %c0_i32_1 = arith.constant 0 : i32
    return %c0_i32, %c0_i32_0 : i32, i32
  }
  func.func @transform_8(%arg0: i32) -> i32 {
    %c0_i32 = arith.constant 0 : i32
    %c0_i32_0 = arith.constant 0 : i32
    return %c0_i32 : i32
  }
  func.func @transform_9(%arg0: i32) -> (i32, i32, i32) {
    %c0_i32 = arith.constant 0 : i32
    %c0_i32_0 = arith.constant 0 : i32
    %c0_i32_1 = arith.constant 0 : i32
    return %arg0, %c0_i32, %c0_i32_0 : i32, i32, i32
  }
}

</mosaic_0001>

<bundles_post_ra>
// kernel: tpu_custom_call.1
= control target key start
LH: loop header
LB: loop body
LE: loop exit
PB: predicated region body
PF: predicated region fallthrough
CT: control target
= control target key end

     0   :  { %s6307_s0 = inlined_call_operand.vmem [shape: f32[2,8,512], index: 0, kind: input, shape index: {}]   ;;  %s6308_s1 = inlined_call_operand.hbm [shape: f32[8,512], index: 1, kind: input, shape index: {}]   ;;  %s6309_s2 = inlined_call_operand.hbm [shape: f32[32,72], index: 2, kind: input, shape index: {}]   ;;  %s6310_s3 = inlined_call_operand.vmem [shape: f32[32,1], index: 3, kind: input, shape index: {}]   ;;  %s6311_s4 = inlined_call_operand.hbm [shape: f32[32,288], index: 4, kind: input, shape index: {}]   ;;  %s6312_s5 = inlined_call_operand.vmem [shape: f32[32,1], index: 5, kind: input, shape index: {}]   ;;  %s6313_s6 = inlined_call_operand.hbm [shape: f32[8,288], index: 6, kind: input, shape index: {}]   ;;  %s6314_s7 = inlined_call_operand.vmem [shape: f32[8,1], index: 7, kind: input, shape index: {}]   ;;  %s6315_s8 = inlined_call_operand.vmem [shape: f32[2], index: 8, kind: input, shape index: {}]   ;;  %s6316_s9 = inlined_call_operand.hbm [shape: f32[2,8,512], index: 9, kind: output, shape index: {}]  }
   0x1   :  { %6558 = sst [smem:[#allocation130_spill]] %s6308_s1 }
   0x2   :  { %14 = vsyncpa [#allocation3], 0 }
   0x3   :  { %15 = vsyncpa [#allocation7], 0 }
   0x4   :  { %16 = vsyncpa [#allocation10], 0 }
   0x5   :  { %17 = vsyncpa [#allocation5], 0 }
   0x6   :  { %18 = vsyncpa [#allocation4], 0 }
   0x7   :  { %20 = vsyncpa [#allocation4 + $0x1], 0  ;;  %s3273_s30 = smov 0   ;;  %s3275_s10 = smov 0  }
   0x8   :  { %s3277_s11 = smov 0   ;;  %s3279_s12 = smov 0  }
   0x9 LB: > { %s3294_s13 = sadd.s32 4294967295, %s3201_s12   ;;  %s2853_s14 = sadd.s32 4294967294, %s3201_s12   ;;  %s3201_s12 = sphi %s3279_s12, %s7001_s12   ;;  %s3197_s11 = sphi %s3277_s11, %s7000_s11   ;;  %s3193_s10 = sphi %s3275_s10, %s6999_s10   ;;  %s3189_s30 = sphi %s3273_s30, %s6998_s30  }
   0xa   : > { %s3298_s15 = sadd.s32 1, %s3201_s12   ;;  %s227_s16 = sadd.s32 1, %s3197_s11 }
   0xb   : > { %s224_s17 = ssub.s32 %s3201_s12, %s3298_s15  ;;  %p237_p0 = scmp.ne.s32.totalorder %s3197_s11, %s3193_s10 }
   0xc   : > { %p225_p1 = scmp.eq.s32.totalorder %s224_s17, 0  ;;  %p238_p2 = scmp.eq.s32.totalorder %s3294_s13, 1 }
   0xd   : > { %p243_p3 = scmp.ne.s32.totalorder %s3193_s10, %s3189_s30  ;;  %p244_p4 = scmp.eq.s32.totalorder %s2853_s14, 1 }
   0xe   : > { %s3309_s18 = scalar_select %p225_p1, %s3197_s11, %s227_s16  }
   0xf   : > { %p3311_p5 = por %p238_p2, %p237_p0  ;;  %p3315_p6 = por %p244_p4, %p243_p3 }
  0x10   : > { %6559 = sst [smem:[#allocation18_spill]] %s3309_s18  ;;  %p2854_p7 = scmp.ge.s32.totalorder %s3201_s12, 1 }
  0x11   : > { %s6560_s19 = scalar_select %p3311_p5, 1, 0 }
  0x12   : > { %s6561_s20 = scalar_select %p3315_p6, 1, 0 }
  0x13   : > { %p251_p8 = scmp.lt.s32.totalorder %s3201_s12, 3  ;;  %p6317_p9 = scmp.eq.s32.totalorder %s3294_s13, 0 }
  0x14   : > { %s3203_s22 = smov [#allocation6]   ;;  %s3204_s25 = smov [#allocation2]  }
  0x15   : > { %p3322_p10 = pnand %p2854_p7, %p251_p8  ;;  %s274_s23 = sshll.u32 %s3203_s22, 4  ;;  %s275_s23 = int_to_ptr.vmem [resolvable:$true] %s274_s23 }
  0x16   : > { %s264_s26 = sshll.u32 %s3204_s25, 4  ;;  %s3205_s27 = smov [#allocation8]   ;;  %s265_s26 = int_to_ptr.vmem [resolvable:$true] %s264_s26 }
  0x17   : > { %s6562_s21 = scalar_select %p3322_p10, 1, 0 }
  0x18   : > { %p2918_p11 = pneg %p3322_p10  ;;  %s290_s28 = sshll.u32 %s3205_s27, 4  ;;  %s291_s28 = int_to_ptr.vmem [resolvable:$true] %s290_s28 }
  0x19   : > { %s3017_s14 = scalar_lea.vmem %s275_s23, 512  ;;  %p3025_p3 = scmp.lt.s32.totalorder %s275_s23, %s275_s23 }
  0x1a   : > { %p3330_p12 = pnand %p6317_p9, %p2918_p11  ;;  %p3018_p0 = scmp.ne.s32.totalorder %s275_s23, %s3017_s14 }
  0x1b   : > { %p3026_p4 = scmp.lt.s32.totalorder %s3017_s14, %s3017_s14 }
  0x1c   : > { %p3336_p13 = pneg %p3330_p12 }
  0x1d   : > { %p3027_p7 = por %p3026_p4, %p3025_p3 }
  0x1e   : > { %p3020_p1 = pnand %p3018_p0, %p3336_p13 }
  0x20   : > { %p3021_p2 = pneg %p3020_p1 }
  0x22   : > { %p3028_p8 = pnand %p3027_p7, %p3021_p2 }
  0x24   : > { %3031 = shalt.err (!%p3028_p8)
}
  0x25   : > { %s3206_s16 = smov 128   ;;  %s3207_s17 = smov 8  }
  0x26   : > { %2924 = dma.hbm_to_vmem [thread:$0]  (!%p3330_p12), %s6309_s2, 512, %s275_s23, [#allocation7], %s3206_s16, %s3206_s16, %s3207_s17  }
  0x27   : > { %s3043_s27 = scalar_lea.vmem %s265_s26, 512  ;;  %p3051_p1 = scmp.lt.s32.totalorder %s265_s26, %s265_s26 }
  0x28   : > { %p3044_p11 = scmp.ne.s32.totalorder %s265_s26, %s3043_s27  ;;  %p3052_p6 = scmp.lt.s32.totalorder %s3043_s27, %s3043_s27 }
  0x2a   : > { %p3046_p9 = pnand %p3044_p11, %p3336_p13  ;;  %p3053_p5 = por %p3052_p6, %p3051_p1 }
  0x2c   : > { %p3047_p0 = pneg %p3046_p9 }
  0x2e   : > { %p3054_p3 = pnand %p3053_p5, %p3047_p0 }
  0x30   : > { %3057 = shalt.err (!%p3054_p3)
}
  0x31   : > { %s6565_s1 = sld [smem:[#allocation130_spill]]  ;;  %s3069_s22 = scalar_lea.vmem %s291_s28, 1536 }
  0x32   : > { %p3070_p2 = scmp.ne.s32.totalorder %s291_s28, %s3069_s22  ;;  %p3077_p8 = scmp.lt.s32.totalorder %s291_s28, %s291_s28 }
  0x33   : > { %p3078_p9 = scmp.lt.s32.totalorder %s3069_s22, %s3069_s22 }
  0x34   : > { %p3072_p4 = pnand %p3070_p2, %p3336_p13 }
  0x35   : > { %p3079_p11 = por %p3078_p9, %p3077_p8 }
  0x36   : > { %p3073_p7 = pneg %p3072_p4 }
  0x37   : > { %2921 = dma.hbm_to_vmem [thread:$0]  (!%p3330_p12), %s6565_s1, 512, %s265_s26, [#allocation3]  }
  0x38   : > { %p3080_p10 = pnand %p3079_p11, %p3073_p7 }
  0x3a   : > { %3083 = shalt.err (!%p3080_p10)
}
  0x3b   : > { %s3208_s23 = smov 384   ;;  %s3209_s16 = smov 24  }
  0x3c   : > { %2927 = dma.hbm_to_vmem [thread:$0]  (!%p3330_p12), %s6311_s4, 1536, %s291_s28, [#allocation7], %s3208_s23, %s3208_s23, %s3209_s16  }
  0x3d   : > { %s3210_s26 = smov [#allocation9]   ;;  %s321_s1 = sshll.u32 %s6315_s8, 4  ;;  %s322_s1 = int_to_ptr.vmem [resolvable:$true] %s321_s1 }
  0x3e   : > { %s307_s25 = sshll.u32 %s3210_s26, 4  ;;  %s308_s25 = int_to_ptr.vmem [resolvable:$true] %s307_s25 }
  0x3f   : > { %s3095_s22 = scalar_lea.vmem %s308_s25, 384  ;;  %p3103_p0 = scmp.lt.s32.totalorder %s308_s25, %s308_s25 }
  0x40   : > { %p3096_p5 = scmp.ne.s32.totalorder %s308_s25, %s3095_s22  ;;  %p3104_p1 = scmp.lt.s32.totalorder %s3095_s22, %s3095_s22 }
  0x42   : > { %p3098_p6 = pnand %p3096_p5, %p3336_p13  ;;  %p3105_p3 = por %p3104_p1, %p3103_p0 }
  0x44   : > { %p3099_p10 = pneg %p3098_p6 }
  0x46   : > { %p3106_p2 = pnand %p3105_p3, %p3099_p10 }
  0x48   : > { %3109 = shalt.err (!%p3106_p2)
}
  0x49   : > { %2930 = dma.hbm_to_vmem [thread:$0]  (!%p3330_p12), %s6313_s6, 384, %s308_s25, [#allocation10]  }
  0x4a   : > { %s3110_s16 = scalar_lea.vmem %s322_s1, 16  ;;  %p3118_p9 = scmp.lt.s32.totalorder %s322_s1, %s322_s1 }
  0x4b   : > { %p3111_p4 = scmp.ne.s32.totalorder %s322_s1, %s3110_s16  ;;  %p3119_p11 = scmp.lt.s32.totalorder %s3110_s16, %s3110_s16 }
  0x4d   : > { %p3113_p7 = pnand %p3111_p4, %p3336_p13  ;;  %p3120_p5 = por %p3119_p11, %p3118_p9 }
  0x4f   : > { %p3114_p8 = pneg %p3113_p7 }
  0x51   : > { %p3121_p6 = pnand %p3120_p5, %p3114_p8 }
  0x53   : > { %3124 = shalt.err (!%p3121_p6)
}
  0x54   : > { %s3211_s17 = smov [#allocation11]   ;;  %p6566_p10 = scmp.ne.s32.totalorder %s6562_s21, 0 }
  0x55   : > { %2933 = dma.vmem_to_smem (!%p3330_p12), %s322_s1, 16, %s3211_s17, [#allocation5]  }
  0x56   : > { %342 = sbr.rel (%p6566_p10) target bundleno = 1638 (0x666), region = 56 }
  0x5b   : > { %p6567_p0 = scmp.eq.s32.totalorder %s3294_s13, 0 }
  0x5d   : > { %3168 = dma.done.wait (%p6567_p0), [#allocation3], 512   ;;  %p6568_p1 = pmov %p6567_p0 }
  0x5e   : > { %p6569_p13 = pmov %p6567_p0 }
  0x5f   : > { %3170 = vsyncadd (%p6568_p1), [#allocation3], 4294966784 }
  0x60   : > { %3172 = dma.done.wait (%p6569_p13), [#allocation7], 2048   ;;  %p6570_p3 = pmov %p6567_p0 }
  0x61   : > { %p6571_p2 = pmov %p6567_p0 }
  0x62   : > { %3174 = vsyncadd (%p6570_p3), [#allocation7], 4294965248 }
  0x63   : > { %3176 = dma.done.wait (%p6571_p2), [#allocation10], 384   ;;  %p6572_p12 = pmov %p6567_p0 }
  0x64   : > { %p6573_p4 = pmov %p6567_p0 }
  0x65   : > { %3178 = vsyncadd (%p6572_p12), [#allocation10], 4294966912 }
  0x66   : > { %3180 = dma.done.wait (%p6573_p4), [#allocation5], 16   ;;  %p6574_p7 = pmov %p6567_p0 }
  0x68   : > { %3182 = vsyncadd (%p6574_p7), [#allocation5], 4294967280 }
  0x69   : > { %364 = sfence }
  0x6a   : > { %p395_p8 = scmp.lt.s32.totalorder %s3294_s13, 1  ;;  %s3212_s26 = smov 111   ;;  %v6326_v4 = vmov 0.0   ;;  %v681_v5 = vld [vmem:[%s6310_s3 + $0x18] sm:$0xff]  ;;  %v680_v6 = vld [vmem:[%s6310_s3 + $0x10] sm:$0xff]  ;;  %v3221_v7 = vmov 0   ;;  %v420_v10 = vlaneseq }
  0x6b   : > { %s6408_s25 = smov 112   ;;  %s6322_s27 = smov 113   ;;  %779 = vmatprep.mubr.f32.mxu0 %v6326_v4  ;;  %868 = vmatprep.mubr.f32.mxu1 %v6326_v4  ;;  %v678_v8 = vld [vmem:[%s6310_s3] sm:$0xff]  ;;  %v679_v9 = vld [vmem:[%s6310_s3 + $0x8] sm:$0xff]  ;;  %v3497_v15 = vld [vmem:[#allocation2 + $0x18] sm:$0xff]  ;;  %vm702_vm8 = vcmask 588800  }
  0x6c   : > { %s396_s1 = scalar_select %p395_p8, %s3294_s13, 1  ;;  %3000 = vset.pattern.permute.xlu0 %v3221_v7  ;;  %3001 = vset.pattern.permute.xlu1 %v3221_v7  ;;  %v3490_v11 = vshrl.u32 %v420_v10, 7  ;;  %v3492_v12 = vand.u32 127, %v420_v10  ;;  %v3494_v13 = vld [vmem:[#allocation2 + $0x8] sm:$0xff]  ;;  %v3499_v16 = vld [vmem:[#allocation2 + $0x10] sm:$0xff]  ;;  %v3501_v19 = vld [vmem:[#allocation2] sm:$0xff] }
  0x6d   : > { %s6320_s14 = smov 127   ;;  %s3216_s22 = smov 1  }
  0x6e   : > { %s2894_s21 = sshll.u32 %s396_s1, 5  ;;  %s6410_s28 = smov 15   ;;  %v660_v14 = vsub.s32 7, %v3490_v11  ;;  %vm653_vm0 = vcmp.lt.s32.totalorder %v3492_v12, 111  ;;  %v627_v23 = vsub.s32 6, %v3490_v11  ;;  %vm620_vm1 = vcmp.lt.s32.totalorder %v3492_v12, 112 }
  0x6f   : > { %s3398_s18 = scalar_lea.vmem %s6307_s0, %s2894_s21  ;;  %s6324_s23 = smov 16   ;;  %v594_v39 = vsub.s32 5, %v3490_v11  ;;  %vm587_vm2 = vcmp.lt.s32.totalorder %v3492_v12, 113  ;;  %v561_v60 = vsub.s32 4, %v3490_v11  ;;  %vm554_vm3 = vcmp.lt.s32.totalorder %v3492_v12, 127 }
  0x70   : > { %v3401_v0 = vld [vmem:[%s3398_s18 + $0x8] sm:$0xff]  ;;  %v3404_v1 = vld [vmem:[%s3398_s18] sm:$0xff]  ;;  %v3411_v2 = vld [vmem:[%s3398_s18 + $0x10] sm:$0xff]  ;;  %s6404_s16 = smov 17   ;;  %v3505_v20 = vrot.slane %v3494_v13, %v660_v14  ;;  %v3508_v21 = vrot.slane %v3497_v15, %v660_v14  ;;  %v3511_v22 = vrot.slane %v3499_v16, %v660_v14  ;;  %v3515_v24 = vrot.slane %v3501_v19, %v660_v14  ;;  %s6634_s17 = smov 127  }
  0x71   : > { %647 = vrot.lane.b32.xlu0 %v3401_v0, %s3212_s26  ;;  %645 = vrot.lane.b32.xlu1 %v3404_v1, %s3212_s26  ;;  %v3414_v3 = vld [vmem:[%s3398_s18 + $0x18] sm:$0xff]  ;;  %v3530_v34 = vrot.slane %v3494_v13, %v627_v23  ;;  %v3538_v41 = vrot.slane %v3501_v19, %v627_v23  ;;  %v3541_v42 = vrot.slane %v3497_v15, %v627_v23  ;;  %vm521_vm4 = vcmp.lt.s32.totalorder %v3492_v12, 1  ;;  %s6799_s1 = smov 17   ;;  %s2895_s21 = sshll.u32 %s3294_s13, 9 }
  0x72   : > { %6575 = vst [vmem:[#allocation19_spill] sm:$0xff] %v3505_v20  ;;  %6576 = vst [vmem:[#allocation20_spill] sm:$0xff] %v3508_v21  ;;  %v3544_v43 = vrot.slane %v3499_v16, %v627_v23  ;;  %v3557_v52 = vrot.slane %v3494_v13, %v594_v39  ;;  %v3562_v56 = vrot.slane %v3501_v19, %v594_v39  ;;  %vm488_vm5 = vcmp.lt.s32.totalorder %v3492_v12, 15  ;;  %p6995_p11 = scmp.ne.s32.totalorder %s6560_s19, 0  ;;  %s3222_s13 = smov [#allocation12]  }
  0x73   : > { %6577 = vst [vmem:[#allocation21_spill] sm:$0xff] %v3511_v22  ;;  %6578 = vst [vmem:[#allocation22_spill] sm:$0xff] %v3515_v24  ;;  %v3566_v58 = vrot.slane %v3497_v15, %v594_v39  ;;  %v3569_v59 = vrot.slane %v3499_v16, %v594_v39  ;;  %v3583_v10 = vrot.slane %v3494_v13, %v561_v60  ;;  %vm455_vm6 = vcmp.lt.s32.totalorder %v3492_v12, 16 }
  0x74   : > { %6579 = vst [vmem:[#allocation23_spill] sm:$0xff] %v3530_v34  ;;  %6580 = vst [vmem:[#allocation24_spill] sm:$0xff] %v3538_v41  ;;  %v3588_v23 = vrot.slane %v3501_v19, %v561_v60  ;;  %vm422_vm7 = vcmp.lt.s32.totalorder %v3492_v12, 17 }
  0x75   : > { %649 = vrot.lane.b32.xlu0 %v3411_v2, %s3212_s26  ;;  %651 = vrot.lane.b32.xlu1 %v3414_v3, %s3212_s26  ;;  %6581 = vst [vmem:[#allocation25_spill] sm:$0xff] %v3541_v42  ;;  %6582 = vst [vmem:[#allocation26_spill] sm:$0xff] %v3544_v43 }
  0x76   : > { %6583 = vst [vmem:[#allocation27_spill] sm:$0xff] %v3557_v52  ;;  %6584 = vst [vmem:[#allocation28_spill] sm:$0xff] %v3562_v56 }
  0x77   : > { %6585 = vst [vmem:[#allocation29_spill] sm:$0xff] %v3566_v58  ;;  %6586 = vst [vmem:[#allocation30_spill] sm:$0xff] %v3569_v59 }
  0x78   : > { %6587 = vst [vmem:[#allocation31_spill] sm:$0xff] %v3583_v10  ;;  %6588 = vst [vmem:[#allocation32_spill] sm:$0xff] %v3588_v23 }
  0x79   : > { %614 = vrot.lane.b32.xlu0 %v3401_v0, %s6408_s25  ;;  %616 = vrot.lane.b32.xlu1 %v3411_v2, %s6408_s25 }
  0x7d   : > { %612 = vrot.lane.b32.xlu0 %v3404_v1, %s6408_s25  ;;  %618 = vrot.lane.b32.xlu1 %v3414_v3, %s6408_s25 }
  0x81   : > { %581 = vrot.lane.b32.xlu0 %v3401_v0, %s6322_s27  ;;  %583 = vrot.lane.b32.xlu1 %v3411_v2, %s6322_s27 }
  0x85   : > { %579 = vrot.lane.b32.xlu0 %v3404_v1, %s6322_s27  ;;  %585 = vrot.lane.b32.xlu1 %v3414_v3, %s6322_s27  ;;  %s893_s27 = sld [smem:[#allocation11]] }
  0x89   : > { %548 = vrot.lane.b32.xlu0 %v3401_v0, %s6320_s14  ;;  %550 = vrot.lane.b32.xlu1 %v3411_v2, %s6320_s14 }
  0x8d   : > { %546 = vrot.lane.b32.xlu0 %v3404_v1, %s6320_s14  ;;  %552 = vrot.lane.b32.xlu1 %v3414_v3, %s6320_s14  ;;  %s6608_s14 = smov 16  }
  0x91   : > { %513 = vrot.lane.b32.xlu0 %v3404_v1, %s3216_s22  ;;  %515 = vrot.lane.b32.xlu1 %v3401_v0, %s3216_s22 }
  0x95   : > { %517 = vrot.lane.b32.xlu0 %v3411_v2, %s3216_s22  ;;  %519 = vrot.lane.b32.xlu1 %v3414_v3, %s3216_s22 }
  0x99   : > { %480 = vrot.lane.b32.xlu0 %v3404_v1, %s6410_s28  ;;  %482 = vrot.lane.b32.xlu1 %v3401_v0, %s6410_s28 }
  0x9d   : > { %484 = vrot.lane.b32.xlu0 %v3411_v2, %s6410_s28  ;;  %486 = vrot.lane.b32.xlu1 %v3414_v3, %s6410_s28 }
  0xa1   : > { %447 = vrot.lane.b32.xlu0 %v3404_v1, %s6324_s23  ;;  %449 = vrot.lane.b32.xlu1 %v3401_v0, %s6324_s23 }
  0xa5   : > { %451 = vrot.lane.b32.xlu0 %v3411_v2, %s6324_s23  ;;  %453 = vrot.lane.b32.xlu1 %v3414_v3, %s6324_s23  ;;  %s6615_s23 = smov 113  }
  0xa9   : > { %412 = vrot.lane.b32.xlu0 %v3404_v1, %s6404_s16  ;;  %414 = vrot.lane.b32.xlu1 %v3401_v0, %s6404_s16 }
  0xad   : > { %416 = vrot.lane.b32.xlu0 %v3411_v2, %s6404_s16  ;;  %418 = vrot.lane.b32.xlu1 %v3414_v3, %s6404_s16 }
  0xb1   : > { %699 = vperm.xlu0 %3000, %v681_v5   ;;  %694 = vperm.xlu1 %3001, %v680_v6  }
  0xb5   : > { %684 = vperm.xlu0 %3000, %v678_v8   ;;  %689 = vperm.xlu1 %3001, %v679_v9  }
  0xe3   : > { %v648_v17 = vpop.permute.xlu0 %647  ;;  %v646_v18 = vpop.permute.xlu1 %645 }
  0xe4   : > { %v656_v27 = vsel %vm653_vm0, %v646_v18, %v648_v17 }
  0xe5   : > { %v674_v35 = vmul.f32 %v3515_v24, %v656_v27  ;;  %v3595_v27 = vrot.slane %v3499_v16, %v561_v60 }
  0xe7   : > { %v650_v25 = vpop.permute.xlu0 %649  ;;  %v652_v26 = vpop.permute.xlu1 %651  ;;  %6590 = vst [vmem:[#allocation34_spill] sm:$0xff] %v3595_v27 }
  0xe8   : > { %v655_v28 = vsel %vm653_vm0, %v648_v17, %v650_v25  ;;  %v657_v29 = vsel %vm653_vm0, %v652_v26, %v646_v18  ;;  %v654_v30 = vsel %vm653_vm0, %v650_v25, %v652_v26  ;;  %v3592_v26 = vrot.slane %v3497_v15, %v561_v60 }
  0xe9   : > { %v675_v31 = vmul.f32 %v3505_v20, %v655_v28  ;;  %v677_v32 = vmul.f32 %v3508_v21, %v657_v29  ;;  %v676_v33 = vmul.f32 %v3511_v22, %v654_v30  ;;  %v528_v28 = vsub.s32 3, %v3490_v11 }
  0xea   : > { %6589 = vst [vmem:[#allocation33_spill] sm:$0xff] %v3592_v26 }
  0xeb   : > { %729 = vmatprep.subr.mxu0 %v675_v31  ;;  %v615_v36 = vpop.permute.xlu0 %614  ;;  %818 = vmatprep.subr.mxu1 %v677_v32  ;;  %v617_v37 = vpop.permute.xlu1 %616 }
  0xec   : > { %v622_v38 = vsel %vm620_vm1, %v615_v36, %v617_v37  ;;  %730 = vmatpush1.msra.mxu0 %v674_v35  ;;  %819 = vmatpush1.msra.mxu1 %v676_v33 }
  0xed   : > { %v642_v40 = vmul.f32 %v3530_v34, %v622_v38  ;;  %v3609_v38 = vrot.slane %v3494_v13, %v528_v28 }
  0xef   : > { %v613_v44 = vpop.permute.xlu0 %612  ;;  %731 = vmatprep.subr.mxu0 %v642_v40  ;;  %v619_v45 = vpop.permute.xlu1 %618  ;;  %6591 = vst [vmem:[#allocation35_spill] sm:$0xff] %v3609_v38 }
  0xf0   : > { %v623_v46 = vsel %vm620_vm1, %v613_v44, %v615_v36  ;;  %v621_v47 = vsel %vm620_vm1, %v617_v37, %v619_v45  ;;  %v624_v48 = vsel %vm620_vm1, %v619_v45, %v613_v44  ;;  %v3615_v45 = vrot.slane %v3501_v19, %v528_v28 }
  0xf1   : > { %v641_v49 = vmul.f32 %v3538_v41, %v623_v46  ;;  %v644_v50 = vmul.f32 %v3541_v42, %v624_v48  ;;  %v643_v51 = vmul.f32 %v3544_v43, %v621_v47  ;;  %v3621_v47 = vrot.slane %v3497_v15, %v528_v28 }
  0xf2   : > { %6592 = vst [vmem:[#allocation36_spill] sm:$0xff] %v3615_v45  ;;  %v3624_v48 = vrot.slane %v3499_v16, %v528_v28 }
  0xf3   : > { %v582_v53 = vpop.permute.xlu0 %581  ;;  %732 = vmatpush1.msra.mxu0 %v641_v49  ;;  %820 = vmatprep.subr.mxu1 %v644_v50  ;;  %v584_v54 = vpop.permute.xlu1 %583  ;;  %6593 = vst [vmem:[#allocation37_spill] sm:$0xff] %v3621_v47  ;;  %v495_v49 = vsub.s32 2, %v3490_v11 }
  0xf4   : > { %v589_v55 = vsel %vm587_vm2, %v582_v53, %v584_v54  ;;  %821 = vmatpush1.msra.mxu1 %v643_v51  ;;  %6594 = vst [vmem:[#allocation38_spill] sm:$0xff] %v3624_v48 }
  0xf5   : > { %v609_v57 = vmul.f32 %v3557_v52, %v589_v55  ;;  %v3639_v55 = vrot.slane %v3494_v13, %v495_v49 }
  0xf7   : > { %v580_v61 = vpop.permute.xlu0 %579  ;;  %733 = vmatprep.subr.mxu0 %v609_v57  ;;  %v586_v62 = vpop.permute.xlu1 %585 }
  0xf8   : > { %v590_v63 = vsel %vm587_vm2, %v580_v61, %v582_v53  ;;  %v588_v5 = vsel %vm587_vm2, %v584_v54, %v586_v62  ;;  %v591_v6 = vsel %vm587_vm2, %v586_v62, %v580_v61  ;;  %v3644_v62 = vrot.slane %v3501_v19, %v495_v49 }
  0xf9   : > { %v608_v7 = vmul.f32 %v3562_v56, %v590_v63  ;;  %v611_v8 = vmul.f32 %v3566_v58, %v591_v6  ;;  %v610_v9 = vmul.f32 %v3569_v59, %v588_v5  ;;  %v3648_v5 = vrot.slane %v3497_v15, %v495_v49 }
  0xfa   : > { %6595 = vst [vmem:[#allocation39_spill] sm:$0xff] %v3644_v62  ;;  %v3651_v6 = vrot.slane %v3499_v16, %v495_v49 }
  0xfb   : > { %v549_v14 = vpop.permute.xlu0 %548  ;;  %734 = vmatpush1.msra.mxu0 %v608_v7  ;;  %822 = vmatprep.subr.mxu1 %v611_v8  ;;  %v551_v17 = vpop.permute.xlu1 %550  ;;  %6596 = vst [vmem:[#allocation40_spill] sm:$0xff] %v3648_v5  ;;  %v462_v7 = vsub.s32 1, %v3490_v11 }
  0xfc   : > { %v556_v18 = vsel %vm554_vm3, %v549_v14, %v551_v17  ;;  %823 = vmatpush1.msra.mxu1 %v610_v9  ;;  %6597 = vst [vmem:[#allocation41_spill] sm:$0xff] %v3651_v6 }
  0xfd   : > { %v576_v25 = vmul.f32 %v3583_v10, %v556_v18 }
  0xff   : > { %v547_v29 = vpop.permute.xlu0 %546  ;;  %735 = vmatprep.subr.mxu0 %v576_v25  ;;  %v553_v30 = vpop.permute.xlu1 %552 }
 0x100   : > { %v557_v31 = vsel %vm554_vm3, %v547_v29, %v549_v14  ;;  %v555_v32 = vsel %vm554_vm3, %v551_v17, %v553_v30  ;;  %v558_v33 = vsel %vm554_vm3, %v553_v30, %v547_v29  ;;  %v3665_v30 = vrot.slane %v3494_v13, %v462_v7 }
 0x101   : > { %v575_v35 = vmul.f32 %v3588_v23, %v557_v31  ;;  %v578_v36 = vmul.f32 %v3592_v26, %v558_v33  ;;  %v577_v37 = vmul.f32 %v3595_v27, %v555_v32 }
 0x103   : > { %v514_v39 = vpop.permute.xlu0 %513  ;;  %736 = vmatpush1.msra.mxu0 %v575_v35  ;;  %824 = vmatprep.subr.mxu1 %v578_v36  ;;  %v516_v40 = vpop.permute.xlu1 %515  ;;  %v3670_v35 = vrot.slane %v3501_v19, %v462_v7 }
 0x104   : > { %v524_v44 = vsel %vm521_vm4, %v514_v39, %v516_v40  ;;  %825 = vmatpush1.msra.mxu1 %v577_v37  ;;  %737 = vmatprep.subr.mxu0 %v3401_v0  ;;  %v3674_v37 = vrot.slane %v3497_v15, %v462_v7 }
 0x105   : > { %738 = vmatpush1.msra.mxu0 %v3404_v1  ;;  %v543_v46 = vmul.f32 %v3609_v38, %v524_v44  ;;  %826 = vmatprep.subr.mxu1 %v3414_v3  ;;  %6598 = vst [vmem:[#allocation42_spill] sm:$0xff] %v3670_v35 }
 0x106   : > { %827 = vmatpush1.msra.mxu1 %v3411_v2  ;;  %6599 = vst [vmem:[#allocation43_spill] sm:$0xff] %v3674_v37 }
 0x107   : > { %v518_v0 = vpop.permute.xlu0 %517  ;;  %739 = vmatprep.subr.mxu0 %v543_v46  ;;  %v520_v50 = vpop.permute.xlu1 %519 }
 0x108   : > { %v523_v1 = vsel %vm521_vm4, %v516_v40, %v518_v0  ;;  %v522_v3 = vsel %vm521_vm4, %v518_v0, %v520_v50  ;;  %v525_v51 = vsel %vm521_vm4, %v520_v50, %v514_v39  ;;  %v3677_v39 = vrot.slane %v3499_v16, %v462_v7 }
 0x109   : > { %v542_v53 = vmul.f32 %v3615_v45, %v525_v51  ;;  %v545_v54 = vmul.f32 %v3621_v47, %v522_v3  ;;  %v544_v2 = vmul.f32 %v3624_v48, %v523_v1  ;;  %v429_v40 = vsub.s32 0, %v3490_v11 }
 0x10a   : > { %6600 = vst [vmem:[#allocation44_spill] sm:$0xff] %v3677_v39 }
 0x10b   : > { %v481_v57 = vpop.permute.xlu0 %480  ;;  %740 = vmatpush1.msra.mxu0 %v542_v53  ;;  %828 = vmatprep.subr.mxu1 %v545_v54  ;;  %v483_v60 = vpop.permute.xlu1 %482  ;;  %v3691_v51 = vrot.slane %v3494_v13, %v429_v40 }
 0x10c   : > { %v491_v61 = vsel %vm488_vm5, %v481_v57, %v483_v60  ;;  %829 = vmatpush1.msra.mxu1 %v544_v2 }
 0x10d   : > { %v510_v63 = vmul.f32 %v3639_v55, %v491_v61  ;;  %6601 = vst [vmem:[#allocation45_spill] sm:$0xff] %v3691_v51  ;;  %v3700_v61 = vrot.slane %v3497_v15, %v429_v40 }
 0x10f   : > { %v485_v8 = vpop.permute.xlu0 %484  ;;  %741 = vmatprep.subr.mxu0 %v510_v63  ;;  %v487_v9 = vpop.permute.xlu1 %486  ;;  %6603 = vst [vmem:[#allocation47_spill] sm:$0xff] %v3700_v61  ;;  %v3703_v63 = vrot.slane %v3499_v16, %v429_v40 }
 0x110   : > { %v490_v14 = vsel %vm488_vm5, %v483_v60, %v485_v8  ;;  %v489_v17 = vsel %vm488_vm5, %v485_v8, %v487_v9  ;;  %v492_v18 = vsel %vm488_vm5, %v487_v9, %v481_v57  ;;  %v3697_v60 = vrot.slane %v3501_v19, %v429_v40 }
 0x111   : > { %v509_v25 = vmul.f32 %v3644_v62, %v492_v18  ;;  %v512_v28 = vmul.f32 %v3648_v5, %v489_v17  ;;  %v511_v29 = vmul.f32 %v3651_v6, %v490_v14  ;;  %6604 = vst [vmem:[#allocation48_spill] sm:$0xff] %v3703_v63  ;;  %v408_v17 = vld [vmem:[#allocation6] sm:$0xff]  ;;  %v409_v18 = vld [vmem:[#allocation6 + $0x8] sm:$0xff] }
 0x112   : > { %6602 = vst [vmem:[#allocation46_spill] sm:$0xff] %v3697_v60 }
 0x113   : > { %v448_v31 = vpop.permute.xlu0 %447  ;;  %742 = vmatpush1.msra.mxu0 %v509_v25  ;;  %830 = vmatprep.subr.mxu1 %v512_v28  ;;  %v450_v32 = vpop.permute.xlu1 %449  ;;  %v410_v25 = vld [vmem:[#allocation6 + $0x10] sm:$0xff]  ;;  %v411_v28 = vld [vmem:[#allocation6 + $0x18] sm:$0xff] }
 0x114   : > { %v458_v33 = vsel %vm455_vm6, %v448_v31, %v450_v32  ;;  %831 = vmatpush1.msra.mxu1 %v511_v29 }
 0x115   : > { %v477_v36 = vmul.f32 %v3665_v30, %v458_v33  ;;  %v3731_v33 = vstv %s893_s27 }
 0x117   : > { %v452_v44 = vpop.permute.xlu0 %451  ;;  %743 = vmatprep.subr.mxu0 %v477_v36  ;;  %v454_v46 = vpop.permute.xlu1 %453 }
 0x118   : > { %v457_v49 = vsel %vm455_vm6, %v450_v32, %v452_v44  ;;  %v456_v0 = vsel %vm455_vm6, %v452_v44, %v454_v46  ;;  %v459_v50 = vsel %vm455_vm6, %v454_v46, %v448_v31 }
 0x119   : > { %v476_v1 = vmul.f32 %v3670_v35, %v459_v50  ;;  %v479_v3 = vmul.f32 %v3674_v37, %v456_v0  ;;  %v478_v11 = vmul.f32 %v3677_v39, %v457_v49 }
 0x11b   : > { %v413_v53 = vpop.permute.xlu0 %412  ;;  %744 = vmatpush1.msra.mxu0 %v476_v1  ;;  %832 = vmatprep.subr.mxu1 %v479_v3  ;;  %v415_v54 = vpop.permute.xlu1 %414 }
 0x11c   : > { %v425_v2 = vsel %vm422_vm7, %v413_v53, %v415_v54  ;;  %833 = vmatpush1.msra.mxu1 %v478_v11 }
 0x11d   : > { %v444_v57 = vmul.f32 %v3691_v51, %v425_v2 }
 0x11f   : > { %v417_v13 = vpop.permute.xlu0 %416  ;;  %745 = vmatprep.subr.mxu0 %v444_v57  ;;  %v419_v7 = vpop.permute.xlu1 %418 }
 0x120   : > { %v424_v8 = vsel %vm422_vm7, %v415_v54, %v417_v13  ;;  %v423_v9 = vsel %vm422_vm7, %v417_v13, %v419_v7  ;;  %v426_v14 = vsel %vm422_vm7, %v419_v7, %v413_v53 }
 0x121   : > { %v443_v19 = vmul.f32 %v3697_v60, %v426_v14  ;;  %v446_v15 = vmul.f32 %v3700_v61, %v423_v9  ;;  %v445_v16 = vmul.f32 %v3703_v63, %v424_v8 }
 0x123   : > { %746 = vmatpush1.msra.mxu0 %v443_v19  ;;  %834 = vmatprep.subr.mxu1 %v446_v15 }
 0x124   : > { %2870 = vmatmul.mubr.msk.f32.vlgmr.msra.gmra.mxu0 %vm702_vm8, %v408_v17  ;;  %835 = vmatpush1.msra.mxu1 %v445_v16 }
 0x125   : > { %2874 = vmatmul.mubr.msk.f32.vlgmr.msra.gmra.mxu1 %vm702_vm8, %v408_v17  ;;  %785 = vmatprep.mubr.f32.mxu0 %v6326_v4 }
 0x126   : > { %874 = vmatprep.mubr.f32.mxu1 %v6326_v4 }
 0x128   : > { %2871 = vmatmul.mubr.msk.f32.gmra.mxu0 %vm702_vm8, %v409_v18 }
 0x129   : > { %2875 = vmatmul.mubr.msk.f32.gmra.mxu1 %vm702_vm8, %v409_v18  ;;  %791 = vmatprep.mubr.f32.mxu0 %v6326_v4 }
 0x12a   : > { %880 = vmatprep.mubr.f32.mxu1 %v6326_v4 }
 0x12c   : > { %2872 = vmatmul.mubr.msk.f32.gmra.mxu0 %vm702_vm8, %v410_v25  ;;  %v3729_v29 = vpop.permute.xlu0 %699  ;;  %v3773_v7 = vpop.permute.xlu1 %694 }
 0x12d   : > { %2876 = vmatmul.mubr.msk.f32.gmra.mxu1 %vm702_vm8, %v410_v25  ;;  %797 = vmatprep.mubr.f32.mxu0 %v6326_v4 }
 0x12e   : > { %886 = vmatprep.mubr.f32.mxu1 %v6326_v4 }
 0x130   : > { %2873 = vmatmul.mubr.msk.f32.gmra.mxu0 %vm702_vm8, %v411_v28  ;;  %v685_v31 = vpop.permute.xlu0 %684  ;;  %v690_v8 = vpop.permute.xlu1 %689 }
 0x131   : > { %2877 = vmatmul.mubr.msk.f32.gmra.mxu1 %vm702_vm8, %v411_v28 }
 0x132   : > { %1657 = vmatprep.mubr.f32.mxu1 %v6326_v4 }
 0x1e4   : > { %v781_v32 = vpop.f32.mrf.mxu0 }
 0x1e5   : > { %v782_v36 = vadd.f32 %v781_v32, %v685_v31  ;;  %v870_v40 = vpop.f32.mrf.mxu1 }
 0x1e6   : > { %v871_v44 = vadd.f32 %v870_v40, %v685_v31  ;;  %v783_v1 = vpop.f32.mrf.mxu0 }
 0x1e7   : > { %vm894_vm9 = vcmp.ge.f32.partialorder %v782_v36, 0.0  ;;  %v911_v46 = vmul.f32 %v3731_v33, %v782_v36  ;;  %v784_v3 = vadd.f32 %v783_v1, %v685_v31  ;;  %v872_v53 = vpop.f32.mrf.mxu1 }
 0x1e8   : > { %vm896_vm10 = vcmp.ge.f32.partialorder %v871_v44, 0.0  ;;  %v913_v49 = vmul.f32 %v3731_v33, %v871_v44  ;;  %v873_v2 = vadd.f32 %v872_v53, %v685_v31  ;;  %v787_v9 = vpop.f32.mrf.mxu0 }
 0x1e9   : > { %v3735_v0 = vsel %vm894_vm9, %v782_v36, %v911_v46  ;;  %v912_v11 = vmul.f32 %v3731_v33, %v784_v3  ;;  %vm895_vm11 = vcmp.ge.f32.partialorder %v784_v3, 0.0  ;;  %v788_v14 = vadd.f32 %v787_v9, %v690_v8  ;;  %v876_v19 = vpop.f32.mrf.mxu1 }
 0x1ea   : > { %6605 = vst [vmem:[#allocation49_spill] sm:$0xff] %v3735_v0  ;;  %v3737_v50 = vsel %vm896_vm10, %v871_v44, %v913_v49  ;;  %1147 = vrot.lane.b32.xlu0 %v3735_v0, %s3216_s22  ;;  %v914_v57 = vmul.f32 %v3731_v33, %v873_v2  ;;  %vm897_vm12 = vcmp.ge.f32.partialorder %v873_v2, 0.0  ;;  %v877_v15 = vadd.f32 %v876_v19, %v690_v8  ;;  %v789_v32 = vpop.f32.mrf.mxu0 }
 0x1eb   : > { %6606 = vst [vmem:[#allocation50_spill] sm:$0xff] %v3737_v50  ;;  %1419 = vrot.lane.b32.xlu1 %v3737_v50, %s3212_s26  ;;  %v3752_v54 = vsel %vm895_vm11, %v784_v3, %v912_v11  ;;  %v915_v17 = vmul.f32 %v3731_v33, %v788_v14  ;;  %vm898_vm13 = vcmp.ge.f32.partialorder %v788_v14, 0.0  ;;  %v878_v28 = vpop.f32.mrf.mxu1  ;;  %v790_v36 = vadd.f32 %v789_v32, %v690_v8 }
 0x1ec   : > { %6607 = vst [vmem:[#allocation51_spill] sm:$0xff] %v3752_v54  ;;  %v3763_v13 = vsel %vm897_vm12, %v873_v2, %v914_v57  ;;  %v917_v16 = vmul.f32 %v3731_v33, %v877_v15  ;;  %vm900_vm14 = vcmp.ge.f32.partialorder %v877_v15, 0.0  ;;  %v879_v31 = vadd.f32 %v878_v28, %v690_v8  ;;  %v793_v1 = vpop.f32.mrf.mxu0 }
 0x1ed   : > { %6609 = vst [vmem:[#allocation52_spill] sm:$0xff] %v3763_v13  ;;  %v3793_v18 = vsel %vm898_vm13, %v788_v14, %v915_v17  ;;  %v916_v44 = vmul.f32 %v3731_v33, %v790_v36  ;;  %vm899_vm8 = vcmp.ge.f32.partialorder %v790_v36, 0.0  ;;  %v794_v3 = vadd.f32 %v793_v1, %v3773_v7  ;;  %v882_v11 = vpop.f32.mrf.mxu1 }
 0x1ee   : > { %1083 = vrot.lane.b32.xlu0 %v3735_v0, %s6410_s28  ;;  %6610 = vst [vmem:[#allocation53_spill] sm:$0xff] %v3793_v18  ;;  %v3799_v25 = vsel %vm900_vm14, %v877_v15, %v917_v16  ;;  %v918_v40 = vmul.f32 %v3731_v33, %v879_v31  ;;  %vm901_vm15 = vcmp.ge.f32.partialorder %v879_v31, 0.0  ;;  %v883_v2 = vadd.f32 %v882_v11, %v3773_v7  ;;  %v795_v14 = vpop.f32.mrf.mxu0 }
 0x1ef   : > { %1403 = vrot.lane.b32.xlu1 %v3735_v0, %s3212_s26  ;;  %6611 = vst [vmem:[#allocation54_spill] sm:$0xff] %v3799_v25  ;;  %v3821_v49 = vsel %vm899_vm8, %v790_v36, %v916_v44  ;;  %v919_v53 = vmul.f32 %v3731_v33, %v794_v3  ;;  %vm902_vm9 = vcmp.ge.f32.partialorder %v794_v3, 0.0  ;;  %v796_v19 = vadd.f32 %v795_v14, %v3773_v7  ;;  %v884_v16 = vpop.f32.mrf.mxu1 }
 0x1f0   : > { %v3815_v46 = vsel %vm901_vm15, %v879_v31, %v918_v40  ;;  %6613 = vst [vmem:[#allocation56_spill] sm:$0xff] %v3821_v49  ;;  %v921_v8 = vmul.f32 %v3731_v33, %v883_v2  ;;  %vm904_vm10 = vcmp.ge.f32.partialorder %v883_v2, 0.0  ;;  %v885_v28 = vadd.f32 %v884_v16, %v3773_v7 }
 0x1f1   : > { %6612 = vst [vmem:[#allocation55_spill] sm:$0xff] %v3815_v46  ;;  %v3850_v57 = vsel %vm902_vm9, %v794_v3, %v919_v53  ;;  %v920_v15 = vmul.f32 %v3731_v33, %v796_v19  ;;  %vm903_vm11 = vcmp.ge.f32.partialorder %v796_v19, 0.0  ;;  %vm1491_vm9 = vcmask 261120  }
 0x1f2   : > { %1163 = vrot.lane.b32.xlu0 %v3737_v50, %s3216_s22  ;;  %6614 = vst [vmem:[#allocation57_spill] sm:$0xff] %v3850_v57  ;;  %v3857_v9 = vsel %vm904_vm10, %v883_v2, %v921_v8  ;;  %v922_v36 = vmul.f32 %v3731_v33, %v885_v28  ;;  %vm905_vm12 = vcmp.ge.f32.partialorder %v885_v28, 0.0  ;;  %v799_v2 = vpop.f32.mrf.mxu0 }
 0x1f3   : > { %1339 = vrot.lane.b32.xlu1 %v3735_v0, %s6408_s25  ;;  %6616 = vst [vmem:[#allocation58_spill] sm:$0xff] %v3857_v9  ;;  %v3877_v17 = vsel %vm903_vm11, %v796_v19, %v920_v15  ;;  %v800_v14 = vadd.f32 %v799_v2, %v3729_v29  ;;  %v888_v15 = vpop.f32.mrf.mxu1 }
 0x1f4   : > { %6617 = vst [vmem:[#allocation59_spill] sm:$0xff] %v3877_v17  ;;  %v3901_v44 = vsel %vm905_vm12, %v885_v28, %v922_v36  ;;  %v889_v36 = vadd.f32 %v888_v15, %v3729_v29  ;;  %v801_v10 = vpop.f32.mrf.mxu0 }
 0x1f5   : > { %6620 = vst [vmem:[#allocation62_spill] sm:$0xff] %v3901_v44  ;;  %v923_v28 = vmul.f32 %v3731_v33, %v800_v14  ;;  %vm906_vm13 = vcmp.ge.f32.partialorder %v800_v14, 0.0  ;;  %v890_v59 = vpop.f32.mrf.mxu1  ;;  %v802_v52 = vadd.f32 %v801_v10, %v3729_v29 }
 0x1f6   : > { %1019 = vrot.lane.b32.xlu0 %v3735_v0, %s6608_s14  ;;  %v925_v22 = vmul.f32 %v3731_v33, %v889_v36  ;;  %vm908_vm14 = vcmp.ge.f32.partialorder %v889_v36, 0.0  ;;  %v891_v23 = vadd.f32 %v890_v59, %v3729_v29 }
 0x1f7   : > { %1155 = vrot.lane.b32.xlu1 %v3752_v54, %s3216_s22  ;;  %v3944_v21 = vsel %vm906_vm13, %v800_v14, %v923_v28  ;;  %v924_v20 = vmul.f32 %v3731_v33, %v802_v52  ;;  %vm907_vm8 = vcmp.ge.f32.partialorder %v802_v52, 0.0 }
 0x1f8   : > { %6622 = vst [vmem:[#allocation64_spill] sm:$0xff] %v3944_v21  ;;  %v3955_v27 = vsel %vm908_vm14, %v889_v36, %v925_v22  ;;  %v926_v56 = vmul.f32 %v3731_v33, %v891_v23  ;;  %vm909_vm15 = vcmp.ge.f32.partialorder %v891_v23, 0.0 }
 0x1f9   : > { %6624 = vst [vmem:[#allocation66_spill] sm:$0xff] %v3955_v27  ;;  %v4005_v24 = vsel %vm907_vm8, %v802_v52, %v924_v20 }
 0x1fa   : > { %1099 = vrot.lane.b32.xlu0 %v3737_v50, %s6410_s28  ;;  %v3995_v41 = vsel %vm909_vm15, %v891_v23, %v926_v56  ;;  %6628 = vst [vmem:[#allocation70_spill] sm:$0xff] %v4005_v24 }
 0x1fb   : > { %1091 = vrot.lane.b32.xlu1 %v3752_v54, %s6410_s28  ;;  %6626 = vst [vmem:[#allocation68_spill] sm:$0xff] %v3995_v41 }
 0x1fe   : > { %955 = vrot.lane.b32.xlu0 %v3735_v0, %s6404_s16 }
 0x1ff   : > { %1107 = vrot.lane.b32.xlu1 %v3763_v13, %s6410_s28 }
 0x202   : > { %1035 = vrot.lane.b32.xlu0 %v3737_v50, %s6608_s14 }
 0x203   : > { %1027 = vrot.lane.b32.xlu1 %v3752_v54, %s6608_s14 }
 0x206   : > { %1355 = vrot.lane.b32.xlu0 %v3737_v50, %s6408_s25 }
 0x207   : > { %1043 = vrot.lane.b32.xlu1 %v3763_v13, %s6608_s14 }
 0x20a   : > { %971 = vrot.lane.b32.xlu0 %v3737_v50, %s6404_s16 }
 0x20b   : > { %963 = vrot.lane.b32.xlu1 %v3752_v54, %s6404_s16 }
 0x20e   : > { %1171 = vrot.lane.b32.xlu0 %v3763_v13, %s3216_s22 }
 0x20f   : > { %979 = vrot.lane.b32.xlu1 %v3763_v13, %s6404_s16 }
 0x212   : > { %1411 = vrot.lane.b32.xlu0 %v3752_v54, %s3212_s26 }
 0x213   : > { %1347 = vrot.lane.b32.xlu1 %v3752_v54, %s6408_s25 }
 0x216   : > { %1085 = vrot.lane.b32.xlu0 %v3793_v18, %s6410_s28 }
 0x217   : > { %1149 = vrot.lane.b32.xlu1 %v3793_v18, %s3216_s22 }
 0x21a   : > { %1165 = vrot.lane.b32.xlu0 %v3799_v25, %s3216_s22 }
 0x21b   : > { %1421 = vrot.lane.b32.xlu1 %v3799_v25, %s3212_s26 }
 0x21e   : > { %1021 = vrot.lane.b32.xlu0 %v3793_v18, %s6608_s14 }
 0x21f   : > { %1405 = vrot.lane.b32.xlu1 %v3793_v18, %s3212_s26 }
 0x222   : > { %1101 = vrot.lane.b32.xlu0 %v3799_v25, %s6410_s28 }
 0x223   : > { %1341 = vrot.lane.b32.xlu1 %v3793_v18, %s6408_s25 }
 0x226   : > { %957 = vrot.lane.b32.xlu0 %v3793_v18, %s6404_s16 }
 0x227   : > { %1173 = vrot.lane.b32.xlu1 %v3815_v46, %s3216_s22 }
 0x22a   : > { %1037 = vrot.lane.b32.xlu0 %v3799_v25, %s6608_s14 }
 0x22b   : > { %1093 = vrot.lane.b32.xlu1 %v3821_v49, %s6410_s28 }
 0x22e   : > { %1357 = vrot.lane.b32.xlu0 %v3799_v25, %s6408_s25 }
 0x22f   : > { %1029 = vrot.lane.b32.xlu1 %v3821_v49, %s6608_s14 }
 0x232   : > { %973 = vrot.lane.b32.xlu0 %v3799_v25, %s6404_s16 }
 0x233   : > { %1045 = vrot.lane.b32.xlu1 %v3815_v46, %s6608_s14 }
 0x236   : > { %1157 = vrot.lane.b32.xlu0 %v3821_v49, %s3216_s22 }
 0x237   : > { %965 = vrot.lane.b32.xlu1 %v3821_v49, %s6404_s16 }
 0x23a   : > { %1413 = vrot.lane.b32.xlu0 %v3821_v49, %s3212_s26 }
 0x23b   : > { %981 = vrot.lane.b32.xlu1 %v3815_v46, %s6404_s16 }
 0x23e   : > { %1109 = vrot.lane.b32.xlu0 %v3815_v46, %s6410_s28 }
 0x23f   : > { %1349 = vrot.lane.b32.xlu1 %v3821_v49, %s6408_s25 }
 0x242   : > { %1151 = vrot.lane.b32.xlu0 %v3850_v57, %s3216_s22 }
 0x243   : > { %1285 = vrot.lane.b32.xlu1 %v3821_v49, %s6615_s23 }
 0x246   : > { %1087 = vrot.lane.b32.xlu0 %v3850_v57, %s6410_s28 }
 0x247   : > { %1423 = vrot.lane.b32.xlu1 %v3857_v9, %s3212_s26 }
 0x24a   : > { %1167 = vrot.lane.b32.xlu0 %v3857_v9, %s3216_s22 }
 0x24b   : > { %1407 = vrot.lane.b32.xlu1 %v3850_v57, %s3212_s26 }
 0x24e   : > { %1023 = vrot.lane.b32.xlu0 %v3850_v57, %s6608_s14 }
 0x24f   : > { %1343 = vrot.lane.b32.xlu1 %v3850_v57, %s6408_s25 }
 0x252   : > { %1103 = vrot.lane.b32.xlu0 %v3857_v9, %s6410_s28 }
 0x253   : > { %1279 = vrot.lane.b32.xlu1 %v3850_v57, %s6615_s23 }
 0x256   : > { %959 = vrot.lane.b32.xlu0 %v3850_v57, %s6404_s16 }
 0x257   : > { %1159 = vrot.lane.b32.xlu1 %v3877_v17, %s3216_s22 }
 0x25a   : > { %1039 = vrot.lane.b32.xlu0 %v3857_v9, %s6608_s14 }
 0x25b   : > { %1095 = vrot.lane.b32.xlu1 %v3877_v17, %s6410_s28 }
 0x25c   : > { %v3888_v31 = vpop.permute.xlu0 %1147 }
 0x25d   : > { %v3890_v32 = vpop.permute.xlu1 %1419 }
 0x25e   : > { %6618 = vst [vmem:[#allocation60_spill] sm:$0xff] %v3890_v32  ;;  %1359 = vrot.lane.b32.xlu0 %v3857_v9, %s6408_s25 }
 0x25f   : > { %1031 = vrot.lane.b32.xlu1 %v3877_v17, %s6608_s14 }
 0x260   : > { %v3897_v7 = vpop.permute.xlu0 %1083 }
 0x261   : > { %v3899_v40 = vpop.permute.xlu1 %1403 }
 0x262   : > { %6619 = vst [vmem:[#allocation61_spill] sm:$0xff] %v3899_v40  ;;  %975 = vrot.lane.b32.xlu0 %v3857_v9, %s6404_s16 }
 0x263   : > { %1047 = vrot.lane.b32.xlu1 %v3901_v44, %s6608_s14 }
 0x264   : > { %v3907_v1 = vpop.permute.xlu0 %1163 }
 0x265   : > { %v3909_v3 = vpop.permute.xlu1 %1339 }
 0x266   : > { %6621 = vst [vmem:[#allocation63_spill] sm:$0xff] %v3909_v3  ;;  %1295 = vrot.lane.b32.xlu0 %v3857_v9, %s6615_s23 }
 0x267   : > { %967 = vrot.lane.b32.xlu1 %v3877_v17, %s6404_s16 }
 0x268   : > { %v3915_v11 = vpop.permute.xlu0 %1019 }
 0x269   : > { %v3917_v53 = vpop.permute.xlu1 %1155 }
 0x26a   : > { %1175 = vrot.lane.b32.xlu0 %v3901_v44, %s3216_s22 }
 0x26b   : > { %983 = vrot.lane.b32.xlu1 %v3901_v44, %s6404_s16 }
 0x26c   : > { %v3923_v8 = vpop.permute.xlu0 %1099 }
 0x26d   : > { %v3926_v19 = vpop.permute.xlu1 %1091 }
 0x26e   : > { %1415 = vrot.lane.b32.xlu0 %v3877_v17, %s3212_s26 }
 0x26f   : > { %1351 = vrot.lane.b32.xlu1 %v3877_v17, %s6408_s25 }
 0x270   : > { %v3932_v16 = vpop.permute.xlu0 %955 }
 0x271   : > { %v3936_v4 = vpop.permute.xlu1 %1107 }
 0x272   : > { %1111 = vrot.lane.b32.xlu0 %v3901_v44, %s6410_s28 }
 0x273   : > { %1287 = vrot.lane.b32.xlu1 %v3877_v17, %s6615_s23 }
 0x274   : > { %v3942_v2 = vpop.permute.xlu0 %1035 }
 0x275   : > { %v3947_v26 = vpop.permute.xlu1 %1027 }
 0x276   : > { %1089 = vrot.lane.b32.xlu0 %v3944_v21, %s6410_s28 }
 0x277   : > { %1153 = vrot.lane.b32.xlu1 %v3944_v21, %s3216_s22 }
 0x278   : > { %v3953_v15 = vpop.permute.xlu0 %1355 }
 0x279   : > { %6623 = vst [vmem:[#allocation65_spill] sm:$0xff] %v3953_v15  ;;  %v3957_v58 = vpop.permute.xlu1 %1043 }
 0x27a   : > { %1169 = vrot.lane.b32.xlu0 %v3955_v27, %s3216_s22 }
 0x27b   : > { %1425 = vrot.lane.b32.xlu1 %v3955_v27, %s3212_s26 }
 0x27c   : > { %v3963_v14 = vpop.permute.xlu0 %971 }
 0x27d   : > { %v3965_v28 = vpop.permute.xlu1 %963 }
 0x27e   : > { %1025 = vrot.lane.b32.xlu0 %v3944_v21, %s6608_s14 }
 0x27f   : > { %1409 = vrot.lane.b32.xlu1 %v3944_v21, %s3212_s26 }
 0x280   : > { %v3971_v22 = vpop.permute.xlu0 %1171 }
 0x281   : > { %v3973_v36 = vpop.permute.xlu1 %979 }
 0x282   : > { %1105 = vrot.lane.b32.xlu0 %v3955_v27, %s6410_s28 }
 0x283   : > { %1345 = vrot.lane.b32.xlu1 %v3944_v21, %s6408_s25 }
 0x284   : > { %v3980_v42 = vpop.permute.xlu0 %1411 }
 0x285   : > { %v3982_v43 = vpop.permute.xlu1 %1347 }
 0x286   : > { %961 = vrot.lane.b32.xlu0 %v3944_v21, %s6404_s16 }
 0x287   : > { %1281 = vrot.lane.b32.xlu1 %v3944_v21, %s6615_s23 }
 0x288   : > { %v3990_v59 = vpop.permute.xlu0 %1085 }
 0x289   : > { %6625 = vst [vmem:[#allocation67_spill] sm:$0xff] %v3990_v59  ;;  %v3992_v34 = vpop.permute.xlu1 %1149 }
 0x28a   : > { %1041 = vrot.lane.b32.xlu0 %v3955_v27, %s6608_s14 }
 0x28b   : > { %1177 = vrot.lane.b32.xlu1 %v3995_v41, %s3216_s22 }
 0x28c   : > { %v4001_v10 = vpop.permute.xlu0 %1165 }
 0x28d   : > { %v4003_v29 = vpop.permute.xlu1 %1421 }
 0x28e   : > { %6627 = vst [vmem:[#allocation69_spill] sm:$0xff] %v4003_v29  ;;  %1361 = vrot.lane.b32.xlu0 %v3955_v27, %s6408_s25 }
 0x28f   : > { %1097 = vrot.lane.b32.xlu1 %v4005_v24, %s6410_s28 }
 0x290   : > { %v4011_v56 = vpop.permute.xlu0 %1021 }
 0x291   : > { %6629 = vst [vmem:[#allocation71_spill] sm:$0xff] %v4011_v56  ;;  %v4013_v23 = vpop.permute.xlu1 %1405 }
 0x292   : > { %6630 = vst [vmem:[#allocation72_spill] sm:$0xff] %v4013_v23  ;;  %977 = vrot.lane.b32.xlu0 %v3955_v27, %s6404_s16 }
 0x293   : > { %1277 = vrot.lane.b32.xlu1 %v3793_v18, %s6615_s23 }
 0x294   : > { %v4019_v33 = vpop.permute.xlu0 %1101 }
 0x295   : > { %v4021_v20 = vpop.permute.xlu1 %1341 }
 0x296   : > { %6631 = vst [vmem:[#allocation73_spill] sm:$0xff] %v4021_v20  ;;  %1297 = vrot.lane.b32.xlu0 %v3955_v27, %s6615_s23 }
 0x297   : > { %1291 = vrot.lane.b32.xlu1 %v3737_v50, %s6615_s23 }
 0x298   : > { %v4027_v52 = vpop.permute.xlu0 %957 }
 0x299   : > { %6632 = vst [vmem:[#allocation74_spill] sm:$0xff] %v4027_v52  ;;  %v4029_v56 = vpop.permute.xlu1 %1173 }
 0x29a   : > { %1161 = vrot.lane.b32.xlu0 %v4005_v24, %s3216_s22 }
 0x29b   : > { %1275 = vrot.lane.b32.xlu1 %v3735_v0, %s6615_s23 }
 0x29c   : > { %v4035_v23 = vpop.permute.xlu0 %1037 }
 0x29d   : > { %6633 = vst [vmem:[#allocation75_spill] sm:$0xff] %v4035_v23  ;;  %v4037_v59 = vpop.permute.xlu1 %1093 }
 0x29e   : > { %1417 = vrot.lane.b32.xlu0 %v4005_v24, %s3212_s26 }
 0x29f   : > { %1233 = vrot.lane.b32.xlu1 %v3955_v27, %s6634_s17 }
 0x2a0   : > { %v4043_v20 = vpop.permute.xlu0 %1357 }
 0x2a1   : > { %6635 = vst [vmem:[#allocation76_spill] sm:$0xff] %v4043_v20  ;;  %v4045_v52 = vpop.permute.xlu1 %1029 }
 0x2a2   : > { %6636 = vst [vmem:[#allocation77_spill] sm:$0xff] %v4045_v52  ;;  %1113 = vrot.lane.b32.xlu0 %v3995_v41, %s6410_s28  ;;  %s6796_s28 = smov 15  }
 0x2a3   : > { %1217 = vrot.lane.b32.xlu1 %v3944_v21, %s6634_s17 }
 0x2a4   : > { %v4051_v29 = vpop.permute.xlu0 %973 }
 0x2a5   : > { %6637 = vst [vmem:[#allocation78_spill] sm:$0xff] %v4051_v29  ;;  %v4053_v23 = vpop.permute.xlu1 %1045 }
 0x2a6   : > { %6638 = vst [vmem:[#allocation79_spill] sm:$0xff] %v4053_v23  ;;  %1293 = vrot.lane.b32.xlu0 %v3799_v25, %s6615_s23 }
 0x2a7   : > { %1033 = vrot.lane.b32.xlu1 %v4005_v24, %s6608_s14 }
 0x2a8   : > { %v4059_v27 = vpop.permute.xlu0 %1157 }
 0x2a9   : > { %v4061_v20 = vpop.permute.xlu1 %965 }
 0x2aa   : > { %6639 = vst [vmem:[#allocation80_spill] sm:$0xff] %v4061_v20  ;;  %1283 = vrot.lane.b32.xlu0 %v3752_v54, %s6615_s23 }
 0x2ab   : > { %1049 = vrot.lane.b32.xlu1 %v3995_v41, %s6608_s14 }
 0x2ac   : > { %v4067_v21 = vpop.permute.xlu0 %1413 }
 0x2ad   : > { %6640 = vst [vmem:[#allocation81_spill] sm:$0xff] %v4067_v21  ;;  %v4069_v29 = vpop.permute.xlu1 %981 }
 0x2ae   : > { %6641 = vst [vmem:[#allocation82_spill] sm:$0xff] %v4069_v29  ;;  %1367 = vrot.lane.b32.xlu0 %v3901_v44, %s6408_s25 }
 0x2af   : > { %969 = vrot.lane.b32.xlu1 %v4005_v24, %s6404_s16 }
 0x2b0   : > { %v4075_v23 = vpop.permute.xlu0 %1109 }
 0x2b1   : > { %6642 = vst [vmem:[#allocation83_spill] sm:$0xff] %v4075_v23  ;;  %v4077_v52 = vpop.permute.xlu1 %1349 }
 0x2b2   : > { %6643 = vst [vmem:[#allocation84_spill] sm:$0xff] %v4077_v52  ;;  %1223 = vrot.lane.b32.xlu0 %v3877_v17, %s6634_s17 }
 0x2b3   : > { %985 = vrot.lane.b32.xlu1 %v3995_v41, %s6404_s16  ;;  %s6797_s16 = smov 112  }
 0x2b4   : > { %v4083_v20 = vpop.permute.xlu0 %1151 }
 0x2b5   : > { %v4085_v21 = vpop.permute.xlu1 %1285 }
 0x2b6   : > { %6644 = vst [vmem:[#allocation85_spill] sm:$0xff] %v4085_v21  ;;  %1365 = vrot.lane.b32.xlu0 %v3815_v46, %s6408_s25 }
 0x2b7   : > { %1231 = vrot.lane.b32.xlu1 %v3857_v9, %s6634_s17 }
 0x2b8   : > { %v4091_v29 = vpop.permute.xlu0 %1087 }
 0x2b9   : > { %6645 = vst [vmem:[#allocation86_spill] sm:$0xff] %v4091_v29  ;;  %v4093_v23 = vpop.permute.xlu1 %1423 }
 0x2ba   : > { %6646 = vst [vmem:[#allocation87_spill] sm:$0xff] %v4093_v23  ;;  %1221 = vrot.lane.b32.xlu0 %v3821_v49, %s6634_s17 }
 0x2bb   : > { %1353 = vrot.lane.b32.xlu1 %v4005_v24, %s6408_s25 }
 0x2bc   : > { %v4099_v17 = vpop.permute.xlu0 %1167 }
 0x2bd   : > { %6647 = vst [vmem:[#allocation88_spill] sm:$0xff] %v4099_v17  ;;  %v4101_v52 = vpop.permute.xlu1 %1407 }
 0x2be   : > { %6648 = vst [vmem:[#allocation89_spill] sm:$0xff] %v4101_v52  ;;  %1363 = vrot.lane.b32.xlu0 %v3763_v13, %s6408_s25 }
 0x2bf   : > { %1215 = vrot.lane.b32.xlu1 %v3850_v57, %s6634_s17 }
 0x2c0   : > { %v4107_v9 = vpop.permute.xlu0 %1023 }
 0x2c1   : > { %6649 = vst [vmem:[#allocation90_spill] sm:$0xff] %v4107_v9  ;;  %v4109_v21 = vpop.permute.xlu1 %1343 }
 0x2c2   : > { %6650 = vst [vmem:[#allocation91_spill] sm:$0xff] %v4109_v21  ;;  %1219 = vrot.lane.b32.xlu0 %v3752_v54, %s6634_s17 }
 0x2c3   : > { %1289 = vrot.lane.b32.xlu1 %v4005_v24, %s6615_s23 }
 0x2c4   : > { %v4115_v49 = vpop.permute.xlu0 %1103 }
 0x2c5   : > { %6651 = vst [vmem:[#allocation92_spill] sm:$0xff] %v4115_v49  ;;  %v4117_v17 = vpop.permute.xlu1 %1279 }
 0x2c6   : > { %6652 = vst [vmem:[#allocation93_spill] sm:$0xff] %v4117_v17  ;;  %1369 = vrot.lane.b32.xlu0 %v3995_v41, %s6408_s25  ;;  %s2886_s25 = sld [smem:[#allocation11 + $0x1]] }
 0x2c7   : > { %1229 = vrot.lane.b32.xlu1 %v3799_v25, %s6634_s17 }
 0x2c8   : > { %v4123_v57 = vpop.permute.xlu0 %959 }
 0x2c9   : > { %6653 = vst [vmem:[#allocation94_spill] sm:$0xff] %v4123_v57  ;;  %v4125_v9 = vpop.permute.xlu1 %1159  ;;  %v4143_v57 = vld [vmem:[#allocation8 + $0x8] sm:$0xff] }
 0x2ca   : > { %1225 = vrot.lane.b32.xlu0 %v4005_v24, %s6634_s17  ;;  %6658 = vst [vmem:[#allocation99_spill] sm:$0xff] %v4143_v57  ;;  %1568 = vmatprep.mubr.f32.mxu0 %v4143_v57 }
 0x2cb   : > { %1213 = vrot.lane.b32.xlu1 %v3793_v18, %s6634_s17 }
 0x2cc   : > { %v4131_v54 = vpop.permute.xlu0 %1039 }
 0x2cd   : > { %6654 = vst [vmem:[#allocation95_spill] sm:$0xff] %v4131_v54  ;;  %v4133_v21 = vpop.permute.xlu1 %1095 }
 0x2ce   : > { %6655 = vst [vmem:[#allocation96_spill] sm:$0xff] %v4133_v21  ;;  %1305 = vrot.lane.b32.xlu0 %v3995_v41, %s6615_s23 }
 0x2cf   : > { %1227 = vrot.lane.b32.xlu1 %v3737_v50, %s6634_s17 }
 0x2d0   : > { %v4139_v25 = vpop.permute.xlu0 %1359 }
 0x2d1   : > { %6656 = vst [vmem:[#allocation97_spill] sm:$0xff] %v4139_v25  ;;  %v4141_v17 = vpop.permute.xlu1 %1031 }
 0x2d2   : > { %6657 = vst [vmem:[#allocation98_spill] sm:$0xff] %v4141_v17  ;;  %1303 = vrot.lane.b32.xlu0 %v3901_v44, %s6615_s23 }
 0x2d3   : > { %1211 = vrot.lane.b32.xlu1 %v3735_v0, %s6634_s17 }
 0x2d4   : > { %v4150_v18 = vpop.permute.xlu0 %975 }
 0x2d5   : > { %6659 = vst [vmem:[#allocation100_spill] sm:$0xff] %v4150_v18  ;;  %v4152_v24 = vpop.permute.xlu1 %1047 }
 0x2d6   : > { %6660 = vst [vmem:[#allocation101_spill] sm:$0xff] %v4152_v24  ;;  %1299 = vrot.lane.b32.xlu0 %v3763_v13, %s6615_s23 }
 0x2d7   : > { %1301 = vrot.lane.b32.xlu1 %v3815_v46, %s6615_s23 }
 0x2d8   : > { %v4158_v50 = vpop.permute.xlu0 %1295 }
 0x2d9   : > { %6661 = vst [vmem:[#allocation102_spill] sm:$0xff] %v4158_v50  ;;  %v4160_v25 = vpop.permute.xlu1 %967 }
 0x2da   : > { %6662 = vst [vmem:[#allocation103_spill] sm:$0xff] %v4160_v25  ;;  %1239 = vrot.lane.b32.xlu0 %v3901_v44, %s6634_s17 }
 0x2db   : > { %1241 = vrot.lane.b32.xlu1 %v3995_v41, %s6634_s17 }
 0x2dc   : > { %v4166_v57 = vpop.permute.xlu0 %1175 }
 0x2dd   : > { %v4168_v0 = vpop.permute.xlu1 %983 }
 0x2de   : > { %6663 = vst [vmem:[#allocation104_spill] sm:$0xff] %v4168_v0  ;;  %1235 = vrot.lane.b32.xlu0 %v3763_v13, %s6634_s17 }
 0x2df   : > { %1237 = vrot.lane.b32.xlu1 %v3815_v46, %s6634_s17 }
 0x2e0   : > { %v4174_v18 = vpop.permute.xlu0 %1415 }
 0x2e1   : > { %v4176_v50 = vpop.permute.xlu1 %1351 }
 0x2e2   : > { %6664 = vst [vmem:[#allocation105_spill] sm:$0xff] %v4176_v50  ;;  %1431 = vrot.lane.b32.xlu0 %v3901_v44, %s3212_s26  ;;  %v1469_v50 = vld [vmem:[%s6312_s5 + $0x10] sm:$0xff]  ;;  %v1470_v44 = vld [vmem:[%s6312_s5 + $0x18] sm:$0xff] }
 0x2e3   : > { %1433 = vrot.lane.b32.xlu1 %v3995_v41, %s3212_s26 }
 0x2e4   : > { %v4182_v54 = vpop.permute.xlu0 %1111 }
 0x2e5   : > { %6665 = vst [vmem:[#allocation106_spill] sm:$0xff] %v4182_v54  ;;  %v4184_v25 = vpop.permute.xlu1 %1287 }
 0x2e6   : > { %6666 = vst [vmem:[#allocation107_spill] sm:$0xff] %v4184_v25  ;;  %1427 = vrot.lane.b32.xlu0 %v3763_v13, %s3212_s26  ;;  %v1467_v13 = vld [vmem:[%s6312_s5] sm:$0xff] }
 0x2e7   : > { %1429 = vrot.lane.b32.xlu1 %v3815_v46, %s3212_s26  ;;  %v1468_v46 = vld [vmem:[%s6312_s5 + $0x8] sm:$0xff] }
 0x2e8   : > { %v4193_v0 = vpop.permute.xlu0 %1089 }
 0x2e9   : > { %6667 = vst [vmem:[#allocation108_spill] sm:$0xff] %v4193_v0  ;;  %v4198_v41 = vpop.permute.xlu1 %1153 }
 0x2ea   : > { %1483 = vperm.xlu0 %3000, %v1469_v50  }
 0x2eb   : > { %1488 = vperm.xlu1 %3001, %v1470_v44  }
 0x2ec   : > { %v4203_v25 = vpop.permute.xlu0 %1169 }
 0x2ed   : > { %6668 = vst [vmem:[#allocation109_spill] sm:$0xff] %v4203_v25  ;;  %v4208_v49 = vpop.permute.xlu1 %1425 }
 0x2ee   : > { %6669 = vst [vmem:[#allocation110_spill] sm:$0xff] %v4208_v49  ;;  %1473 = vperm.xlu0 %3000, %v1467_v13   ;;  %v1183_v13 = vsel %vm521_vm4, %v3917_v53, %v3907_v1 }
 0x2ef   : > { %1478 = vperm.xlu1 %3001, %v1468_v46  }
 0x2f0   : > { %v4210_v24 = vpop.permute.xlu0 %1025 }
 0x2f1   : > { %6670 = vst [vmem:[#allocation111_spill] sm:$0xff] %v4210_v24  ;;  %v4212_v17 = vpop.permute.xlu1 %1409  ;;  %v1115_v24 = vsel %vm488_vm5, %v3923_v8, %v3936_v4 }
 0x2f2   : > { %6671 = vst [vmem:[#allocation112_spill] sm:$0xff] %v4212_v17 }
 0x2f4   : > { %v4214_v50 = vpop.permute.xlu0 %1105 }
 0x2f5   : > { %6672 = vst [vmem:[#allocation113_spill] sm:$0xff] %v4214_v50  ;;  %v4216_v44 = vpop.permute.xlu1 %1345 }
 0x2f6   : > { %6673 = vst [vmem:[#allocation114_spill] sm:$0xff] %v4216_v44  ;;  %v1187_v44 = vsel %vm521_vm4, %v3888_v31, %v3917_v53 }
 0x2f8   : > { %v4218_v54 = vpop.permute.xlu0 %961 }
 0x2f9   : > { %6674 = vst [vmem:[#allocation115_spill] sm:$0xff] %v4218_v54  ;;  %v4220_v29 = vpop.permute.xlu1 %1281  ;;  %v1127_v54 = vsel %vm488_vm5, %v3936_v4, %v3897_v7  ;;  %v1051_v4 = vsel %vm455_vm6, %v3942_v2, %v3957_v58 }
 0x2fa   : > { %6675 = vst [vmem:[#allocation116_spill] sm:$0xff] %v4220_v29  ;;  %v1119_v29 = vsel %vm488_vm5, %v3926_v19, %v3923_v8  ;;  %v1063_v8 = vsel %vm455_vm6, %v3957_v58, %v3915_v11  ;;  %v1191_v58 = vsel %vm521_vm4, %v3971_v22, %v3888_v31 }
 0x2fb   : > { %v4256_v53 = vmul.f32 %v1119_v29, %v3651_v6  ;;  %v4318_v31 = vmul.f32 %v1063_v8, %v3670_v35  ;;  %v1443_v8 = vsel %vm653_vm0, %v3899_v40, %v3980_v42 }
 0x2fc   : > { %v4222_v25 = vpop.permute.xlu0 %1041 }
 0x2fd   : > { %6676 = vst [vmem:[#allocation117_spill] sm:$0xff] %v4222_v25  ;;  %v4224_v21 = vpop.permute.xlu1 %1177  ;;  %v4247_v25 = vmul.f32 %v1183_v13, %v3624_v48 }
 0x2ff   : > { %6678 = vst [vmem:[#allocation119_spill] sm:$0xff] %v4247_v25  ;;  %v4269_v25 = vmul.f32 %v1187_v44, %v3609_v38  ;;  %v4287_v44 = vmul.f32 %v1127_v54, %v3644_v62  ;;  %v1179_v54 = vsel %vm521_vm4, %v3907_v1, %v3971_v22 }
 0x300   : > { %v4226_v0 = vpop.permute.xlu0 %1361 }
 0x301   : > { %6677 = vst [vmem:[#allocation118_spill] sm:$0xff] %v4226_v0  ;;  %v4232_v46 = vpop.permute.xlu1 %1097  ;;  %v1123_v0 = vsel %vm488_vm5, %v3897_v7, %v3926_v19  ;;  %v1055_v19 = vsel %vm455_vm6, %v3947_v26, %v3942_v2  ;;  %v1059_v7 = vsel %vm455_vm6, %v3915_v11, %v3947_v26  ;;  %v991_v26 = vsel %vm422_vm7, %v3965_v28, %v3963_v14 }
 0x302   : > { %v4284_v29 = vmul.f32 %v1123_v0, %v3639_v55  ;;  %v995_v2 = vsel %vm422_vm7, %v3932_v16, %v3965_v28  ;;  %v4302_v0 = vmul.f32 %v1055_v19, %v3677_v39  ;;  %v999_v11 = vsel %vm422_vm7, %v3973_v36, %v3932_v16 }
 0x303   : > { %v4315_v28 = vmul.f32 %v1115_v24, %v3648_v5  ;;  %v987_v19 = vsel %vm422_vm7, %v3963_v14, %v3973_v36  ;;  %v4327_v1 = vmul.f32 %v1059_v7, %v3665_v30  ;;  %v4330_v16 = vmul.f32 %v1051_v4, %v3674_v37 }
 0x304   : > { %v4253_v50 = vpop.permute.xlu0 %977  ;;  %6681 = vst [vmem:[#allocation122_spill] sm:$0xff] %v4302_v0  ;;  %v4333_v22 = vmul.f32 %v991_v26, %v3703_v63  ;;  %v4336_v24 = vmul.f32 %v1191_v58, %v3615_v45  ;;  %v4343_v14 = vmul.f32 %v995_v2, %v3691_v51  ;;  %v4346_v36 = vmul.f32 %v999_v11, %v3697_v60 }
 0x305   : > { %6679 = vst [vmem:[#allocation120_spill] sm:$0xff] %v4253_v50  ;;  %v4266_v13 = vpop.permute.xlu1 %1277  ;;  %6684 = vst [vmem:[#allocation125_spill] sm:$0xff] %v4330_v16  ;;  %v1439_v7 = vsel %vm653_vm0, %v3980_v42, %v3890_v32  ;;  %v1379_v4 = vsel %vm620_vm1, %v3909_v3, %v3982_v43  ;;  %v4357_v26 = vmul.f32 %v1179_v54, %v3621_v47  ;;  %v6688_v32 = vld [vmem:[#allocation22_spill] sm:$0xff] }
 0x306   : > { %6680 = vst [vmem:[#allocation121_spill] sm:$0xff] %v4266_v13  ;;  %6685 = vst [vmem:[#allocation126_spill] sm:$0xff] %v4333_v22  ;;  %v1375_v2 = vsel %vm620_vm1, %v3982_v43, %v3953_v15  ;;  %v1192_v58 = vsel %vm521_vm4, %v4029_v56, %v3992_v34  ;;  %v1194_v42 = vsel %vm521_vm4, %v4224_v21, %v4198_v41  ;;  %v6690_v15 = vld [vmem:[#allocation24_spill] sm:$0xff] }
 0x307   : > { %6686 = vst [vmem:[#allocation127_spill] sm:$0xff] %v4346_v36  ;;  %v4374_v54 = vmul.f32 %v987_v19, %v3700_v61  ;;  %v4377_v40 = vmul.f32 %v1443_v8, %v6688_v32  ;;  %v1180_v43 = vsel %vm521_vm4, %v4001_v10, %v4029_v56  ;;  %v1189_v22 = vsel %vm521_vm4, %v4083_v20, %v4125_v9 }
 0x308   : > { %v4312_v13 = vpop.permute.xlu0 %1297  ;;  %v4394_v8 = vmul.f32 %v1379_v4, %v6690_v15  ;;  %v1193_v56 = vsel %vm521_vm4, %v4166_v57, %v4083_v20  ;;  %v1199_v16 = vmul.f32 %v1192_v58, %v3615_v45  ;;  %v1207_v4 = vmul.f32 %v1194_v42, %v3615_v45  ;;  %v6695_v20 = vld [vmem:[#allocation69_spill] sm:$0xff] }
 0x309   : > { %6682 = vst [vmem:[#allocation123_spill] sm:$0xff] %v4312_v13  ;;  %v4324_v0 = vpop.permute.xlu1 %1291  ;;  %6687 = vst [vmem:[#allocation128_spill] sm:$0xff] %v4374_v54  ;;  %v6692_v13 = vld [vmem:[#allocation19_spill] sm:$0xff]  ;;  %v1204_v36 = vmul.f32 %v1189_v22, %v3609_v38  ;;  %v1441_v42 = vsel %vm653_vm0, %v4174_v18, %v4093_v23 }
 0x30a   : > { %6683 = vst [vmem:[#allocation124_spill] sm:$0xff] %v4324_v0  ;;  %6691 = vst [vmem:[#allocation24_spill] sm:$0xff] %v4394_v8  ;;  %v4402_v0 = vmul.f32 %v1439_v7, %v6692_v13  ;;  %v6693_v8 = vld [vmem:[#allocation23_spill] sm:$0xff]  ;;  %v6696_v7 = vld [vmem:[#allocation81_spill] sm:$0xff] }
 0x30b   : > { %v1440_v58 = vsel %vm653_vm0, %v6696_v7, %v6695_v20  ;;  %v6698_v23 = vld [vmem:[#allocation67_spill] sm:$0xff] }
 0x30c   : > { %v4371_v11 = vpop.permute.xlu0 %1161 }
 0x30d   : > { %v1190_v3 = vsel %vm521_vm4, %v4198_v41, %v4371_v11  ;;  %v4391_v19 = vpop.permute.xlu1 %1275  ;;  %v1188_v41 = vsel %vm521_vm4, %v3992_v34, %v4059_v27  ;;  %v4423_v34 = vmul.f32 %v1180_v43, %v3621_v47  ;;  %v1445_v43 = vsel %vm653_vm0, %v4101_v52, %v4174_v18  ;;  %v6703_v52 = vld [vmem:[#allocation96_spill] sm:$0xff] }
 0x30e   : > { %6689 = vst [vmem:[#allocation22_spill] sm:$0xff] %v4391_v19  ;;  %v1208_v54 = vmul.f32 %v1190_v3, %v3609_v38  ;;  %v4411_v19 = vmul.f32 %v1375_v2, %v6693_v8  ;;  %v1120_v3 = vsel %vm488_vm5, %v4037_v59, %v4019_v33  ;;  %v1203_v2 = vmul.f32 %v1193_v56, %v3615_v45 }
 0x30f   : > { %v1200_v45 = vmul.f32 %v1188_v41, %v3609_v38  ;;  %v1456_v38 = vmul.f32 %v1440_v58, %v6692_v13 }
 0x310   : > { %6694 = vst [vmem:[#allocation129_spill] sm:$0xff] %v4411_v19  ;;  %v1418_v50 = vpop.permute.xlu0 %1417  ;;  %1504 = vmatprep.subr.mxu0 %v1208_v54 }
 0x311   : > { %v1442_v19 = vsel %vm653_vm0, %v1418_v50, %v4208_v49  ;;  %v1446_v54 = vsel %vm653_vm0, %v4212_v17, %v1418_v50  ;;  %1505 = vmatpush1.msra.mxu0 %v1207_v4  ;;  %v4436_v22 = vpop.permute.xlu1 %1233  ;;  %v1124_v50 = vsel %vm488_vm5, %v6698_v23, %v4037_v59  ;;  %v4450_v4 = vmul.f32 %v1120_v3, %v3651_v6  ;;  %v6699_v17 = vld [vmem:[#allocation75_spill] sm:$0xff]  ;;  %v6700_v49 = vld [vmem:[#allocation77_spill] sm:$0xff] }
 0x312   : > { %6697 = vst [vmem:[#allocation81_spill] sm:$0xff] %v4436_v22  ;;  %v1463_v56 = vmul.f32 %v1446_v54, %v6688_v32  ;;  %1506 = vmatprep.subr.mxu0 %v1204_v36  ;;  %v1464_v20 = vmul.f32 %v1442_v19, %v6692_v13  ;;  %v1056_v18 = vsel %vm455_vm6, %v6700_v49, %v6699_v17  ;;  %v6701_v54 = vld [vmem:[#allocation108_spill] sm:$0xff]  ;;  %v6704_v22 = vld [vmem:[#allocation86_spill] sm:$0xff] }
 0x313   : > { %v1126_v36 = vsel %vm488_vm5, %v6701_v54, %v4232_v46  ;;  %1507 = vmatpush1.msra.mxu0 %v1203_v2  ;;  %v6702_v19 = vld [vmem:[#allocation72_spill] sm:$0xff]  ;;  %v1460_v3 = vmul.f32 %v1441_v42, %v6692_v13  ;;  %v1125_v8 = vsel %vm488_vm5, %v6704_v22, %v6703_v52  ;;  %v1459_v2 = vmul.f32 %v1445_v43, %v6688_v32 }
 0x314   : > { %v1444_v41 = vsel %vm653_vm0, %v6702_v19, %v6696_v7  ;;  %v4464_v59 = vpop.permute.xlu0 %1113  ;;  %1508 = vmatprep.subr.mxu0 %v1200_v45  ;;  %1617 = vmatprep.subr.mxu1 %v1464_v20  ;;  %v6705_v20 = vld [vmem:[#allocation106_spill] sm:$0xff]  ;;  %v1144_v43 = vmul.f32 %v1126_v36, %v3639_v55 }
 0x315   : > { %v1130_v7 = vsel %vm488_vm5, %v4464_v59, %v6701_v54  ;;  %1509 = vmatpush1.msra.mxu0 %v1199_v16  ;;  %1618 = vmatpush1.msra.mxu1 %v1463_v56  ;;  %v4477_v45 = vpop.permute.xlu1 %1217  ;;  %v1129_v58 = vsel %vm488_vm5, %v6705_v20, %v6704_v22  ;;  %v1455_v13 = vmul.f32 %v1444_v41, %v6688_v32  ;;  %v6706_v54 = vld [vmem:[#allocation109_spill] sm:$0xff]  ;;  %v6707_v22 = vld [vmem:[#allocation71_spill] sm:$0xff] }
 0x316   : > { %v1143_v42 = vmul.f32 %v1130_v7, %v3644_v62  ;;  %1510 = vmatprep.subr.mxu0 %v4269_v25  ;;  %1619 = vmatprep.subr.mxu1 %v1460_v3  ;;  %v1182_v16 = vsel %vm521_vm4, %v6706_v54, %v4224_v21  ;;  %v1136_v56 = vmul.f32 %v1124_v50, %v3639_v55  ;;  %v6708_v3 = vld [vmem:[#allocation83_spill] sm:$0xff] }
 0x317   : > { %1511 = vmatpush1.msra.mxu0 %v4336_v24  ;;  %1620 = vmatpush1.msra.mxu1 %v1459_v2  ;;  %v1060_v25 = vsel %vm455_vm6, %v6707_v22, %v6700_v49  ;;  %v1128_v36 = vsel %vm488_vm5, %v6708_v3, %v6698_v23  ;;  %v1140_v21 = vmul.f32 %v1125_v8, %v3639_v55  ;;  %v6709_v23 = vld [vmem:[#allocation88_spill] sm:$0xff]  ;;  %v6710_v7 = vld [vmem:[#allocation111_spill] sm:$0xff] }
 0x318   : > { %v4501_v41 = vpop.permute.xlu0 %1293  ;;  %1512 = vmatprep.subr.mxu0 %v1144_v43  ;;  %1621 = vmatprep.subr.mxu1 %v1456_v38  ;;  %v4505_v24 = vmul.f32 %v1056_v18, %v3677_v39  ;;  %v1139_v50 = vmul.f32 %v1129_v58, %v3644_v62  ;;  %v1186_v49 = vsel %vm521_vm4, %v4371_v11, %v6706_v54  ;;  %v4524_v11 = vld [vmem:[#allocation8 + $0x10] sm:$0xff]  ;;  %v6711_v58 = vld [vmem:[#allocation79_spill] sm:$0xff] }
 0x319   : > { %1513 = vmatpush1.msra.mxu0 %v1143_v42  ;;  %1622 = vmatpush1.msra.mxu1 %v1455_v13  ;;  %v4512_v2 = vpop.permute.xlu1 %1033  ;;  %v1185_v38 = vsel %vm521_vm4, %v4125_v9, %v6709_v23  ;;  %v1181_v8 = vsel %vm521_vm4, %v6709_v23, %v4166_v57  ;;  %v1210_v18 = vmul.f32 %v1182_v16, %v3621_v47  ;;  %v6712_v16 = vld [vmem:[#allocation98_spill] sm:$0xff] }
 0x31a   : > { %1514 = vmatprep.subr.mxu0 %v1140_v21  ;;  %1623 = vmatprep.subr.mxu1 %v4402_v0  ;;  %v1135_v13 = vmul.f32 %v1128_v36, %v3644_v62  ;;  %v1062_v9 = vsel %vm455_vm6, %v6710_v7, %v4512_v2  ;;  %v1072_v57 = vmul.f32 %v1060_v25, %v3665_v30  ;;  %v6713_v25 = vld [vmem:[#allocation90_spill] sm:$0xff] }
 0x31b   : > { %1515 = vmatpush1.msra.mxu0 %v1139_v50  ;;  %1624 = vmatpush1.msra.mxu1 %v4377_v40  ;;  %v1064_v0 = vsel %vm455_vm6, %v6711_v58, %v6707_v22  ;;  %v1184_v42 = vsel %vm521_vm4, %v4059_v27, %v4001_v10  ;;  %v1209_v43 = vmul.f32 %v1186_v49, %v3624_v48  ;;  %v6714_v10 = vld [vmem:[#allocation101_spill] sm:$0xff] }
 0x31c   : > { %v4542_v54 = vpop.permute.xlu0 %1283  ;;  %1516 = vmatprep.subr.mxu0 %v1136_v56  ;;  %1682 = vmatprep.subr.mxu1 %v1210_v18  ;;  %v1205_v40 = vmul.f32 %v1185_v38, %v3624_v48  ;;  %v1061_v36 = vsel %vm455_vm6, %v6713_v25, %v6712_v16  ;;  %v1206_v27 = vmul.f32 %v1181_v8, %v3621_v47  ;;  %v6715_v18 = vld [vmem:[#allocation113_spill] sm:$0xff] }
 0x31d   : > { %1517 = vmatpush1.msra.mxu0 %v1135_v13  ;;  %2878 = vmatmul.mubr.msk.f32.vlgmr.msra.gmra.mxu1 %vm1491_vm9, %v4524_v11  ;;  %v1050_v22 = vpop.permute.xlu1 %1049  ;;  %v1065_v56 = vsel %vm455_vm6, %v6714_v10, %v6713_v25  ;;  %v1080_v50 = vmul.f32 %v1062_v9, %v3665_v30  ;;  %v1052_v49 = vsel %vm455_vm6, %v6699_v17, %v6711_v58  ;;  %v6717_v9 = vld [vmem:[#allocation80_spill] sm:$0xff] }
 0x31e   : > { %1683 = vmatpush1.msra.mxu1 %v1209_v43  ;;  %v1066_v21 = vsel %vm455_vm6, %v1050_v22, %v6710_v7  ;;  %1518 = vmatprep.subr.mxu0 %v4284_v29  ;;  %v1071_v23 = vmul.f32 %v1064_v0, %v3670_v35  ;;  %v1201_v8 = vmul.f32 %v1184_v42, %v3624_v48  ;;  %v6716_v7 = vld [vmem:[#allocation78_spill] sm:$0xff]  ;;  %v6718_v42 = vld [vmem:[#allocation92_spill] sm:$0xff] }
 0x31f   : > { %v1079_v38 = vmul.f32 %v1066_v21, %v3670_v35  ;;  %1684 = vmatprep.subr.mxu1 %v1206_v27  ;;  %1519 = vmatpush1.msra.mxu0 %v4287_v44  ;;  %v1118_v29 = vsel %vm488_vm5, %v6715_v18, %v4464_v59  ;;  %v1076_v17 = vmul.f32 %v1061_v36, %v3665_v30  ;;  %v6720_v36 = vld [vmem:[#allocation115_spill] sm:$0xff] }
 0x320   : > { %1685 = vmatpush1.msra.mxu1 %v1205_v40  ;;  %v4573_v13 = vpop.permute.xlu0 %1367  ;;  %1520 = vmatprep.subr.mxu0 %v1080_v50  ;;  %v992_v58 = vsel %vm422_vm7, %v6717_v9, %v6716_v7  ;;  %v1075_v44 = vmul.f32 %v1065_v56, %v3670_v35  ;;  %v1122_v0 = vsel %vm488_vm5, %v4232_v46, %v6715_v18  ;;  %v6719_v46 = vld [vmem:[#allocation74_spill] sm:$0xff]  ;;  %v6721_v50 = vld [vmem:[#allocation119_spill] sm:$0xff] }
 0x321   : > { %1686 = vmatprep.subr.mxu1 %v4423_v34  ;;  %1521 = vmatpush1.msra.mxu0 %v1079_v38  ;;  %v4586_v59 = vpop.permute.xlu1 %969  ;;  %v1121_v43 = vsel %vm488_vm5, %v6703_v52, %v6718_v42  ;;  %v1117_v40 = vsel %vm488_vm5, %v6718_v42, %v6705_v20  ;;  %v4597_v25 = vmul.f32 %v1052_v49, %v3674_v37  ;;  %v6722_v38 = vld [vmem:[#allocation103_spill] sm:$0xff] }
 0x322   : > { %1687 = vmatpush1.msra.mxu1 %v1201_v8  ;;  %1522 = vmatprep.subr.mxu0 %v1076_v17  ;;  %v996_v34 = vsel %vm422_vm7, %v6719_v46, %v6717_v9  ;;  %v998_v52 = vsel %vm422_vm7, %v6720_v36, %v4586_v59  ;;  %v1146_v20 = vmul.f32 %v1118_v29, %v3648_v5  ;;  %v6723_v8 = vld [vmem:[#allocation94_spill] sm:$0xff] }
 0x323   : > { %1688 = vmatprep.subr.mxu1 %v4357_v26  ;;  %1523 = vmatpush1.msra.mxu0 %v1075_v44  ;;  %v4610_v27 = vmul.f32 %v992_v58, %v3703_v63  ;;  %v1116_v56 = vsel %vm488_vm5, %v4019_v33, %v6708_v3  ;;  %v1145_v21 = vmul.f32 %v1122_v0, %v3651_v6  ;;  %v6724_v33 = vld [vmem:[#allocation104_spill] sm:$0xff]  ;;  %v6725_v58 = vld [vmem:[#allocation82_spill] sm:$0xff] }
 0x324   : > { %1689 = vmatpush1.msra.mxu1 %v6721_v50  ;;  %v4618_v49 = vpop.permute.xlu0 %1223  ;;  %1524 = vmatprep.subr.mxu0 %v1072_v57  ;;  %v1141_v26 = vmul.f32 %v1121_v43, %v3651_v6  ;;  %v997_v18 = vsel %vm422_vm7, %v6723_v8, %v6722_v38  ;;  %v1142_v17 = vmul.f32 %v1117_v40, %v3648_v5 }
 0x325   : > { %1690 = vmatprep.subr.mxu1 %v1146_v20  ;;  %1525 = vmatpush1.msra.mxu0 %v1071_v23  ;;  %v986_v29 = vpop.permute.xlu1 %985  ;;  %v1001_v3 = vsel %vm422_vm7, %v6724_v33, %v6723_v8  ;;  %v1016_v9 = vmul.f32 %v998_v52, %v3691_v51  ;;  %v988_v23 = vsel %vm422_vm7, %v6716_v7, %v6725_v58  ;;  %v6728_v52 = vld [vmem:[#allocation73_spill] sm:$0xff] }
 0x326   : > { %1691 = vmatpush1.msra.mxu1 %v1145_v21  ;;  %v1002_v57 = vsel %vm422_vm7, %v986_v29, %v6720_v36  ;;  %1526 = vmatprep.subr.mxu0 %v4327_v1  ;;  %v1138_v0 = vmul.f32 %v1116_v56, %v3648_v5  ;;  %v1000_v42 = vsel %vm422_vm7, %v6725_v58, %v6719_v46  ;;  %v6726_v1 = vld [vmem:[#allocation117_spill] sm:$0xff]  ;;  %v6727_v36 = vld [vmem:[#allocation84_spill] sm:$0xff]  ;;  %v6729_v56 = vld [vmem:[#allocation95_spill] sm:$0xff] }
 0x327   : > { %v1015_v44 = vmul.f32 %v1002_v57, %v3697_v60  ;;  %1692 = vmatprep.subr.mxu1 %v1142_v17  ;;  %1527 = vmatpush1.msra.mxu0 %v4318_v31  ;;  %v1054_v43 = vsel %vm455_vm6, %v6726_v1, %v1050_v22  ;;  %v1012_v7 = vmul.f32 %v997_v18, %v3691_v51  ;;  %v6732_v57 = vld [vmem:[#allocation105_spill] sm:$0xff] }
 0x328   : > { %1693 = vmatpush1.msra.mxu1 %v1141_v26  ;;  %v4649_v40 = vpop.permute.xlu0 %1365  ;;  %1528 = vmatprep.subr.mxu0 %v1016_v9  ;;  %v1380_v31 = vsel %vm620_vm1, %v6728_v52, %v6727_v36  ;;  %v1011_v20 = vmul.f32 %v1001_v3, %v3697_v60  ;;  %v1058_v46 = vsel %vm455_vm6, %v4512_v2, %v6726_v1  ;;  %v6731_v3 = vld [vmem:[#allocation97_spill] sm:$0xff]  ;;  %v6735_v1 = vld [vmem:[#allocation114_spill] sm:$0xff] }
 0x329   : > { %1694 = vmatprep.subr.mxu1 %v1138_v0  ;;  %1529 = vmatpush1.msra.mxu0 %v1015_v44  ;;  %v4661_v22 = vpop.permute.xlu1 %1231  ;;  %v1057_v21 = vsel %vm455_vm6, %v6712_v16, %v6729_v56  ;;  %v1053_v50 = vsel %vm455_vm6, %v6729_v56, %v6714_v10  ;;  %v1008_v26 = vmul.f32 %v996_v34, %v3691_v51  ;;  %v6730_v16 = vld [vmem:[#allocation76_spill] sm:$0xff]  ;;  %v6734_v0 = vld [vmem:[#allocation118_spill] sm:$0xff] }
 0x32a   : > { %1695 = vmatpush1.msra.mxu1 %v4450_v4  ;;  %1530 = vmatprep.subr.mxu0 %v1012_v7  ;;  %v1007_v2 = vmul.f32 %v1000_v42, %v3697_v60  ;;  %v1082_v8 = vmul.f32 %v1054_v43, %v3674_v37  ;;  %v4677_v18 = vmul.f32 %v988_v23, %v3700_v61  ;;  %v6733_v44 = vld [vmem:[#allocation100_spill] sm:$0xff]  ;;  %v6736_v7 = vld [vmem:[#allocation91_spill] sm:$0xff]  ;;  %v6748_v60 = vld [vmem:[#allocation122_spill] sm:$0xff] }
 0x32b   : > { %1696 = vmatprep.subr.mxu1 %v4315_v28  ;;  %1531 = vmatpush1.msra.mxu0 %v1011_v20  ;;  %v1376_v10 = vsel %vm620_vm1, %v6727_v36, %v6730_v16  ;;  %v1391_v4 = vmul.f32 %v1380_v31, %v6690_v15  ;;  %v1081_v17 = vmul.f32 %v1058_v46, %v3677_v39  ;;  %v6738_v20 = vld [vmem:[#allocation23_spill] sm:$0xff] }
 0x32c   : > { %1697 = vmatpush1.msra.mxu1 %v4256_v53  ;;  %v4686_v34 = vpop.permute.xlu0 %1221  ;;  %1532 = vmatprep.subr.mxu0 %v1008_v26  ;;  %v1077_v28 = vmul.f32 %v1057_v21, %v3677_v39  ;;  %v1377_v9 = vsel %vm620_vm1, %v6732_v57, %v6731_v3  ;;  %v1078_v23 = vmul.f32 %v1053_v50, %v3674_v37  ;;  %v6739_v21 = vld [vmem:[#allocation120_spill] sm:$0xff] }
 0x32d   : > { %1698 = vmatprep.subr.mxu1 %v1082_v8  ;;  %1533 = vmatpush1.msra.mxu0 %v1007_v2  ;;  %v1354_v58 = vpop.permute.xlu1 %1353  ;;  %v993_v53 = vsel %vm422_vm7, %v6722_v38, %v6733_v44  ;;  %v1381_v36 = vsel %vm620_vm1, %v6736_v7, %v6732_v57  ;;  %v6737_v38 = vld [vmem:[#allocation127_spill] sm:$0xff]  ;;  %v989_v56 = vsel %vm422_vm7, %v6733_v44, %v6724_v33  ;;  %v6740_v2 = vmov 0.0   ;;  %v6741_v8 = vld [vmem:[#allocation102_spill] sm:$0xff]  ;;  %v6745_v44 = vld [vmem:[#allocation121_spill] sm:$0xff] }
 0x32e   : > { %1699 = vmatpush1.msra.mxu1 %v1081_v17  ;;  %v1378_v42 = vsel %vm620_vm1, %v1354_v58, %v6734_v0  ;;  %v1382_v43 = vsel %vm620_vm1, %v6735_v1, %v1354_v58  ;;  %1534 = vmatprep.subr.mxu0 %v4343_v14  ;;  %v990_v14 = vsel %vm422_vm7, %v6739_v21, %v986_v29  ;;  %v6742_v17 = vld [vmem:[#allocation107_spill] sm:$0xff]  ;;  %v6743_v58 = vld [vmem:[#allocation93_spill] sm:$0xff] }
 0x32f   : > { %v1399_v31 = vmul.f32 %v1382_v43, %v6690_v15  ;;  %1700 = vmatprep.subr.mxu1 %v1078_v23  ;;  %1535 = vmatpush1.msra.mxu0 %v6737_v38  ;;  %v1400_v46 = vmul.f32 %v1378_v42, %v6738_v20  ;;  %v1396_v26 = vmul.f32 %v1377_v9, %v6738_v20  ;;  %v6744_v23 = vld [vmem:[#allocation85_spill] sm:$0xff] }
 0x330   : > { %1701 = vmatpush1.msra.mxu1 %v1077_v28  ;;  %v4719_v50 = vpop.permute.xlu0 %1363  ;;  %1663 = vmatprep.mubr.f32.mxu1 %v6740_v2  ;;  %v1313_v57 = vsel %vm587_vm2, %v6742_v17, %v6741_v8  ;;  %v1317_v33 = vsel %vm587_vm2, %v6743_v58, %v6742_v17  ;;  %v994_v29 = vsel %vm422_vm7, %v4586_v59, %v6739_v21  ;;  %v6746_v59 = vld [vmem:[#allocation125_spill] sm:$0xff] }
 0x331   : > { %1702 = vmatprep.subr.mxu1 %v4597_v25  ;;  %1536 = vmatprep.subr.mxu0 %v1400_v46  ;;  %v4736_v28 = vpop.permute.xlu1 %1215  ;;  %v1395_v9 = vmul.f32 %v1381_v36, %v6690_v15  ;;  %v1316_v42 = vsel %vm587_vm2, %v6745_v44, %v6744_v23  ;;  %v1392_v43 = vmul.f32 %v1376_v10, %v6738_v20  ;;  %v6747_v36 = vld [vmem:[#allocation28_spill] sm:$0xff] }
 0x332   : > { %1703 = vmatpush1.msra.mxu1 %v4505_v24  ;;  %1537 = vmatpush2.msra.mxu0 %v1399_v31  ;;  %v1013_v38 = vmul.f32 %v993_v53, %v3703_v63  ;;  %v1018_v25 = vmul.f32 %v990_v14, %v3700_v61  ;;  %v1014_v46 = vmul.f32 %v989_v56, %v3700_v61  ;;  %v6749_v24 = vld [vmem:[#allocation27_spill] sm:$0xff]  ;;  %v6750_v56 = vld [vmem:[#allocation22_spill] sm:$0xff] }
 0x333   : > { %1704 = vmatprep.subr.mxu1 %v6746_v59  ;;  %1538 = vmatprep.subr.mxu0 %v1396_v26  ;;  %v1331_v21 = vmul.f32 %v1317_v33, %v6747_v36  ;;  %v1017_v17 = vmul.f32 %v994_v29, %v3703_v63  ;;  %v1332_v10 = vmul.f32 %v1313_v57, %v6749_v24  ;;  %v6751_v26 = vld [vmem:[#allocation124_spill] sm:$0xff]  ;;  %v6752_v33 = vld [vmem:[#allocation123_spill] sm:$0xff]  ;;  %v6754_v59 = vld [vmem:[#allocation129_spill] sm:$0xff] }
 0x334   : > { %1705 = vmatpush1.msra.mxu1 %v6748_v60  ;;  %v4752_v37 = vpop.permute.xlu0 %1219  ;;  %1539 = vmatpush2.msra.mxu0 %v1395_v9  ;;  %v1327_v53 = vmul.f32 %v1316_v42, %v6747_v36  ;;  %v1312_v31 = vsel %vm587_vm2, %v6744_v23, %v4501_v41  ;;  %v1315_v14 = vsel %vm587_vm2, %v6750_v56, %v4542_v54  ;;  %v6753_v9 = vld [vmem:[#allocation116_spill] sm:$0xff] }
 0x335   : > { %1706 = vmatprep.subr.mxu1 %v1018_v25  ;;  %1540 = vmatprep.subr.mxu0 %v1392_v43  ;;  %v1290_v60 = vpop.permute.xlu1 %1289  ;;  %v1311_v57 = vsel %vm587_vm2, %v4542_v54, %v6751_v26  ;;  %v1373_v42 = vsel %vm620_vm1, %v6731_v3, %v4573_v13  ;;  %v1323_v25 = vmul.f32 %v1315_v14, %v6747_v36 }
 0x336   : > { %1707 = vmatpush1.msra.mxu1 %v1017_v17  ;;  %v1314_v29 = vsel %vm587_vm2, %v1290_v60, %v6752_v33  ;;  %v1318_v23 = vsel %vm587_vm2, %v6753_v9, %v1290_v60  ;;  %1541 = vmatpush2.msra.mxu0 %v1391_v4  ;;  %v1385_v17 = vsel %vm620_vm1, %v4573_v13, %v6736_v7  ;;  %v6755_v60 = vld [vmem:[#allocation24_spill] sm:$0xff]  ;;  %v6756_v7 = vld [vmem:[#allocation26_spill] sm:$0xff] }
 0x337   : > { %v1335_v43 = vmul.f32 %v1318_v23, %v6747_v36  ;;  %1708 = vmatprep.subr.mxu1 %v1014_v46  ;;  %1542 = vmatprep.subr.mxu0 %v6754_v59  ;;  %v1336_v54 = vmul.f32 %v1314_v29, %v6749_v24  ;;  %v1328_v3 = vmul.f32 %v1312_v31, %v6749_v24  ;;  %v6757_v31 = vld [vmem:[#allocation25_spill] sm:$0xff]  ;;  %v6760_v59 = vld [vmem:[#allocation63_spill] sm:$0xff] }
 0x338   : > { %1709 = vmatpush1.msra.mxu1 %v1013_v38  ;;  %v1370_v4 = vpop.permute.xlu0 %1369  ;;  %1543 = vmatpush2.msra.mxu0 %v6755_v60  ;;  %v1324_v13 = vmul.f32 %v1311_v57, %v6749_v24  ;;  %v1397_v38 = vmul.f32 %v1373_v42, %v6756_v7  ;;  %v6758_v57 = vld [vmem:[#allocation128_spill] sm:$0xff]  ;;  %v1398_v42 = vmul.f32 %v1385_v17, %v6757_v31  ;;  %v6762_v17 = vld [vmem:[#allocation81_spill] sm:$0xff] }
 0x339   : > { %v1374_v46 = vsel %vm620_vm1, %v6734_v0, %v1370_v4  ;;  %v1386_v29 = vsel %vm620_vm1, %v1370_v4, %v6735_v1  ;;  %1710 = vmatprep.subr.mxu1 %v4677_v18  ;;  %1544 = vmatprep.subr.mxu0 %v1336_v54  ;;  %v4795_v14 = vpop.permute.xlu1 %1229  ;;  %v1372_v1 = vsel %vm620_vm1, %v6730_v16, %v4649_v40 }
 0x33a   : > { %v1401_v23 = vmul.f32 %v1374_v46, %v6756_v7  ;;  %1711 = vmatpush1.msra.mxu1 %v4610_v27  ;;  %1545 = vmatpush2.msra.mxu0 %v1335_v43  ;;  %v1402_v0 = vmul.f32 %v1386_v29, %v6757_v31  ;;  %v1384_v18 = vsel %vm620_vm1, %v4649_v40, %v6728_v52  ;;  %v6759_v43 = vld [vmem:[#allocation65_spill] sm:$0xff]  ;;  %v6761_v52 = vld [vmem:[#allocation126_spill] sm:$0xff]  ;;  %v6763_v29 = vld [vmem:[#allocation31_spill] sm:$0xff] }
 0x33b   : > { %1712 = vmatprep.subr.mxu1 %v6758_v57  ;;  %1546 = vmatprep.subr.mxu0 %v1332_v10  ;;  %v1249_v27 = vsel %vm554_vm3, %v4618_v49, %v4661_v22  ;;  %v1371_v16 = vsel %vm620_vm1, %v6759_v43, %v4719_v50  ;;  %v1383_v40 = vsel %vm620_vm1, %v4719_v50, %v6760_v59 }
 0x33c   : > { %1713 = vmatpush1.msra.mxu1 %v6761_v52  ;;  %v1226_v10 = vpop.permute.xlu0 %1225  ;;  %1547 = vmatpush2.msra.mxu0 %v1331_v21  ;;  %v1253_v54 = vsel %vm554_vm3, %v4736_v28, %v4618_v49  ;;  %v1393_v46 = vmul.f32 %v1372_v1, %v6756_v7  ;;  %v1394_v21 = vmul.f32 %v1384_v18, %v6757_v31 }
 0x33d   : > { %v1250_v4 = vsel %vm554_vm3, %v1226_v10, %v6762_v17  ;;  %v1254_v60 = vsel %vm554_vm3, %v4477_v45, %v1226_v10  ;;  %1714 = vmatprep.subr.mxu1 %v1402_v0  ;;  %1548 = vmatprep.subr.mxu0 %v1328_v3  ;;  %v4835_v50 = vpop.permute.xlu1 %1213  ;;  %v1389_v57 = vmul.f32 %v1371_v16, %v6756_v7  ;;  %v6764_v0 = vld [vmem:[#allocation32_spill] sm:$0xff]  ;;  %v4869_v10 = vld [vmem:[#allocation8 + $0x28] sm:$0xff] }
 0x33e   : > { %1715 = vmatpush2.msra.mxu1 %v1401_v23  ;;  %1549 = vmatpush2.msra.mxu0 %v1327_v53  ;;  %v1272_v49 = vmul.f32 %v1250_v4, %v6763_v29  ;;  %v1390_v43 = vmul.f32 %v1383_v40, %v6757_v31  ;;  %v1268_v59 = vmul.f32 %v1249_v27, %v6763_v29 }
 0x33f   : > { %1716 = vmatprep.subr.mxu1 %v1398_v42  ;;  %1550 = vmatprep.subr.mxu0 %v1324_v13  ;;  %v1267_v3 = vmul.f32 %v1253_v54, %v6764_v0  ;;  %v1248_v23 = vsel %vm554_vm3, %v4686_v34, %v4795_v14  ;;  %v1271_v53 = vmul.f32 %v1254_v60, %v6764_v0 }
 0x340   : > { %1717 = vmatpush2.msra.mxu1 %v1397_v38  ;;  %v1306_v1 = vpop.permute.xlu0 %1305  ;;  %1551 = vmatpush2.msra.mxu0 %v1323_v25  ;;  %v1252_v13 = vsel %vm554_vm3, %v4835_v50, %v4686_v34  ;;  %v6765_v38 = vld [vmem:[#allocation30_spill] sm:$0xff]  ;;  %v6766_v25 = vld [vmem:[#allocation29_spill] sm:$0xff] }
 0x341   : > { %v1310_v18 = vsel %vm587_vm2, %v6752_v33, %v1306_v1  ;;  %v1322_v42 = vsel %vm587_vm2, %v1306_v1, %v6753_v9  ;;  %1718 = vmatprep.subr.mxu1 %v1394_v21  ;;  %1552 = vmatprep.subr.mxu0 %v1272_v49  ;;  %v4859_v27 = vpop.permute.xlu1 %1227  ;;  %v1264_v33 = vmul.f32 %v1248_v23, %v6763_v29  ;;  %v6767_v1 = vld [vmem:[#allocation70_spill] sm:$0xff] }
 0x342   : > { %v1337_v16 = vmul.f32 %v1310_v18, %v6765_v38  ;;  %1719 = vmatpush2.msra.mxu1 %v1393_v46  ;;  %v1247_v34 = vsel %vm554_vm3, %v4752_v37, %v4859_v27  ;;  %1553 = vmatpush2.msra.mxu0 %v1271_v53  ;;  %v1338_v40 = vmul.f32 %v1322_v42, %v6766_v25  ;;  %v6768_v18 = vld [vmem:[#allocation64_spill] sm:$0xff]  ;;  %v6769_v42 = vld [vmem:[#allocation59_spill] sm:$0xff] }
 0x343   : > { %1720 = vmatprep.subr.mxu1 %v1390_v43  ;;  %1554 = vmatprep.subr.mxu0 %v1268_v59  ;;  %v1263_v9 = vmul.f32 %v1252_v13, %v6764_v0  ;;  %v1260_v46 = vmul.f32 %v1247_v34, %v6763_v29  ;;  %v4887_v43 = vld [vmem:[#allocation8 + $0x40] sm:$0xff] }
 0x344   : > { %1721 = vmatpush2.msra.mxu1 %v1389_v57  ;;  %v1304_v52 = vpop.permute.xlu0 %1303  ;;  %1555 = vmatpush2.msra.mxu0 %v1267_v3 }
 0x345   : > { %v1309_v54 = vsel %vm587_vm2, %v6741_v8, %v1304_v52  ;;  %v1321_v4 = vsel %vm587_vm2, %v1304_v52, %v6743_v58  ;;  %1722 = vmatprep.subr.mxu1 %v1338_v40  ;;  %1556 = vmatprep.subr.mxu0 %v1264_v33  ;;  %v1212_v60 = vpop.permute.xlu1 %1211 }
 0x346   : > { %v1333_v21 = vmul.f32 %v1309_v54, %v6765_v38  ;;  %1723 = vmatpush2.msra.mxu1 %v1337_v16  ;;  %v1251_v49 = vsel %vm554_vm3, %v1212_v60, %v4752_v37  ;;  %1557 = vmatpush2.msra.mxu0 %v1263_v9  ;;  %v1334_v57 = vmul.f32 %v1321_v4, %v6766_v25  ;;  %v6770_v16 = vld [vmem:[#allocation57_spill] sm:$0xff]  ;;  %v6771_v54 = vld [vmem:[#allocation56_spill] sm:$0xff] }
 0x347   : > { %v1259_v8 = vmul.f32 %v1251_v49, %v6764_v0  ;;  %1558 = vmatprep.subr.mxu0 %v1260_v46  ;;  %2879 = vmatmul.mubr.msk.f32.gmra.mxu1 %vm1491_vm9, %v4869_v10  ;;  %v6773_v46 = vld [vmem:[#allocation53_spill] sm:$0xff] }
 0x348   : > { %v1300_v58 = vpop.permute.xlu0 %1299  ;;  %1724 = vmatprep.subr.mxu1 %v1334_v57  ;;  %1669 = vmatprep.mubr.f32.mxu1 %v6740_v2  ;;  %v4928_v57 = vld [vmem:[#allocation8] sm:$0xff] }
 0x349   : > { %1559 = vmatpush2.msra.mxu0 %v1259_v8  ;;  %1725 = vmatpush2.msra.mxu1 %v1333_v21  ;;  %v1302_v59 = vpop.permute.xlu1 %1301  ;;  %v1307_v37 = vsel %vm587_vm2, %v6751_v26, %v1300_v58  ;;  %v1319_v3 = vsel %vm587_vm2, %v1300_v58, %v6750_v56  ;;  %v6774_v21 = vld [vmem:[#allocation33_spill] sm:$0xff]  ;;  %v6775_v8 = vld [vmem:[#allocation51_spill] sm:$0xff] }
 0x34a   : > { %v1308_v23 = vsel %vm587_vm2, %v4501_v41, %v1302_v59  ;;  %v1320_v53 = vsel %vm587_vm2, %v1302_v59, %v6745_v44  ;;  %1560 = vmatprep.subr.mxu0 %v6767_v1  ;;  %v1325_v41 = vmul.f32 %v1307_v37, %v6765_v38  ;;  %v1326_v40 = vmul.f32 %v1319_v3, %v6766_v25  ;;  %v6776_v58 = vld [vmem:[#allocation49_spill] sm:$0xff]  ;;  %v4945_v1 = vld [vmem:[#allocation8 + $0x58] sm:$0xff] }
 0x34b   : > { %v1329_v13 = vmul.f32 %v1308_v23, %v6765_v38  ;;  %1561 = vmatpush2.msra.mxu0 %v6768_v18  ;;  %v1330_v26 = vmul.f32 %v1320_v53, %v6766_v25  ;;  %2880 = vmatmul.mubr.msk.f32.gmra.mxu1 %vm1491_vm9, %v4887_v43 }
 0x34c   : > { %v1240_v56 = vpop.permute.xlu0 %1239  ;;  %1562 = vmatprep.subr.mxu0 %v6769_v42  ;;  %1675 = vmatprep.mubr.f32.mxu1 %v6740_v2 }
 0x34d   : > { %v1245_v44 = vsel %vm554_vm3, %v4661_v22, %v1240_v56  ;;  %1563 = vmatpush2.msra.mxu0 %v6770_v16  ;;  %1726 = vmatprep.subr.mxu1 %v1330_v26  ;;  %v1242_v34 = vpop.permute.xlu1 %1241  ;;  %v1257_v33 = vsel %vm554_vm3, %v1240_v56, %v4736_v28  ;;  %v6772_v22 = vld [vmem:[#allocation34_spill] sm:$0xff]  ;;  %v6778_v16 = vld [vmem:[#allocation112_spill] sm:$0xff] }
 0x34e   : > { %v1246_v9 = vsel %vm554_vm3, %v6762_v17, %v1242_v34  ;;  %v1258_v52 = vsel %vm554_vm3, %v1242_v34, %v4477_v45  ;;  %1564 = vmatprep.subr.mxu0 %v6771_v54  ;;  %1727 = vmatpush2.msra.mxu1 %v1329_v13  ;;  %v4931_v17 = vld [vmem:[#allocation8 + $0x20] sm:$0xff]  ;;  %v1269_v45 = vmul.f32 %v1245_v44, %v6772_v22 }
 0x34f   : > { %v1273_v4 = vmul.f32 %v1246_v9, %v6772_v22  ;;  %1565 = vmatpush2.msra.mxu0 %v6773_v46  ;;  %1728 = vmatprep.subr.mxu1 %v1326_v40  ;;  %v1274_v49 = vmul.f32 %v1258_v52, %v6774_v21  ;;  %v1270_v37 = vmul.f32 %v1257_v33, %v6774_v21  ;;  %v6779_v40 = vld [vmem:[#allocation89_spill] sm:$0xff]  ;;  %v6781_v54 = vld [vmem:[#allocation20_spill] sm:$0xff]  ;;  %v949_v46 = vld [vmem:[#allocation8 + $0x30] sm:$0xff] }
 0x350   : > { %v1236_v28 = vpop.permute.xlu0 %1235  ;;  %1566 = vmatprep.subr.mxu0 %v6775_v8  ;;  %1729 = vmatpush2.msra.mxu1 %v1325_v41  ;;  %v6777_v41 = vld [vmem:[#allocation110_spill] sm:$0xff]  ;;  %v6780_v9 = vld [vmem:[#allocation21_spill] sm:$0xff]  ;;  %v6783_v8 = vld [vmem:[#allocation99_spill] sm:$0xff] }
 0x351   : > { %1567 = vmatpush2.msra.mxu0 %v6776_v58  ;;  %1730 = vmatprep.subr.mxu1 %v1274_v49  ;;  %v1238_v59 = vpop.permute.xlu1 %1237  ;;  %v1255_v3 = vsel %vm554_vm3, %v1236_v28, %v1212_v60  ;;  %v1243_v13 = vsel %vm554_vm3, %v4859_v27, %v1236_v28  ;;  %v946_v60 = vld [vmem:[#allocation8 + $0x18] sm:$0xff]  ;;  %v6784_v58 = vld [vmem:[#allocation68_spill] sm:$0xff] }
 0x352   : > { %v1244_v23 = vsel %vm554_vm3, %v4795_v14, %v1238_v59  ;;  %v1256_v53 = vsel %vm554_vm3, %v1238_v59, %v4835_v50  ;;  %1569 = vmatmul.mubr.f32.vlgmr.msra.gmra.mxu0 %v4928_v57  ;;  %1731 = vmatpush2.msra.mxu1 %v1273_v4  ;;  %v950_v50 = vld [vmem:[#allocation8 + $0x38] sm:$0xff]  ;;  %v1262_v42 = vmul.f32 %v1255_v3, %v6774_v21 }
 0x353   : > { %v1265_v18 = vmul.f32 %v1244_v23, %v6772_v22  ;;  %1732 = vmatprep.subr.mxu1 %v1270_v37  ;;  %1574 = vmatprep.mubr.f32.mxu0 %v4931_v17  ;;  %v1266_v14 = vmul.f32 %v1256_v53, %v6774_v21  ;;  %v1261_v27 = vmul.f32 %v1243_v13, %v6772_v22  ;;  %v6782_v49 = vld [vmem:[#allocation87_spill] sm:$0xff]  ;;  %v6785_v37 = vld [vmem:[#allocation69_spill] sm:$0xff]  ;;  %v6786_v53 = vld [vmem:[#allocation66_spill] sm:$0xff] }
 0x354   : > { %v1432_v26 = vpop.permute.xlu0 %1431  ;;  %1733 = vmatpush2.msra.mxu1 %v1269_v45 }
 0x355   : > { %1734 = vmatprep.subr.mxu1 %v1266_v14  ;;  %v1434_v56 = vpop.permute.xlu1 %1433  ;;  %2881 = vmatmul.mubr.msk.f32.gmra.mxu1 %vm1491_vm9, %v4945_v1  ;;  %v1449_v33 = vsel %vm653_vm0, %v1432_v26, %v6779_v40  ;;  %v1437_v28 = vsel %vm653_vm0, %v6782_v49, %v1432_v26  ;;  %v6787_v26 = vld [vmem:[#allocation62_spill] sm:$0xff]  ;;  %v6791_v40 = vld [vmem:[#allocation55_spill] sm:$0xff]  ;;  %v6793_v49 = vld [vmem:[#allocation52_spill] sm:$0xff] }
 0x356   : > { %v1438_v44 = vsel %vm653_vm0, %v6777_v41, %v1434_v56  ;;  %v1450_v34 = vsel %vm653_vm0, %v1434_v56, %v6778_v16  ;;  %1575 = vmatmul.mubr.f32.gmra.mxu0 %v946_v60  ;;  %1735 = vmatpush2.msra.mxu1 %v1265_v18  ;;  %v1462_v13 = vmul.f32 %v1449_v33, %v6781_v54  ;;  %v953_v18 = vld [vmem:[#allocation8 + $0x50] sm:$0xff]  ;;  %v6790_v16 = vld [vmem:[#allocation60_spill] sm:$0xff] }
 0x357   : > { %v1465_v52 = vmul.f32 %v1438_v44, %v6780_v9  ;;  %1736 = vmatprep.subr.mxu1 %v1262_v42  ;;  %1580 = vmatprep.mubr.f32.mxu0 %v950_v50  ;;  %v1466_v4 = vmul.f32 %v1450_v34, %v6781_v54  ;;  %v1461_v14 = vmul.f32 %v1437_v28, %v6780_v9  ;;  %v6788_v42 = vld [vmem:[#allocation61_spill] sm:$0xff]  ;;  %v6792_v33 = vld [vmem:[#allocation54_spill] sm:$0xff] }
 0x358   : > { %1737 = vmatpush2.msra.mxu1 %v1261_v27  ;;  %1746 = vmatprep.mubr.f32.mxu1 %v6783_v8  ;;  %v1428_v45 = vpop.permute.xlu0 %1427  ;;  %v952_v44 = vld [vmem:[#allocation8 + $0x48] sm:$0xff]  ;;  %v6794_v28 = vld [vmem:[#allocation50_spill] sm:$0xff] }
 0x359   : > { %1738 = vmatprep.subr.mxu1 %v6784_v58  ;;  %1795 = vmatprep.subr.mxu0 %v1466_v4  ;;  %v1430_v59 = vpop.permute.xlu1 %1429  ;;  %v1447_v27 = vsel %vm653_vm0, %v1428_v45, %v6788_v42  ;;  %v1435_v34 = vsel %vm653_vm0, %v6790_v16, %v1428_v45 }
 0x35a   : > { %v1436_v3 = vsel %vm653_vm0, %v6785_v37, %v1430_v59  ;;  %v1448_v23 = vsel %vm653_vm0, %v1430_v59, %v6702_v19  ;;  %1581 = vmatmul.mubr.f32.gmra.mxu0 %v949_v46  ;;  %1739 = vmatpush2.msra.mxu1 %v6786_v53  ;;  %v6789_v19 = vld [vmem:[#allocation58_spill] sm:$0xff]  ;;  %v1453_v4 = vmul.f32 %v1435_v34, %v6780_v9 }
 0x35b   : > { %1796 = vmatpush1.msra.mxu0 %v1465_v52  ;;  %1740 = vmatprep.subr.mxu1 %v6787_v26  ;;  %v1458_v56 = vmul.f32 %v1448_v23, %v6781_v54  ;;  %v1457_v41 = vmul.f32 %v1436_v3, %v6780_v9  ;;  %v1454_v52 = vmul.f32 %v1447_v27, %v6781_v54 }
 0x35c   : > { %1797 = vmatprep.subr.mxu0 %v1462_v13  ;;  %1741 = vmatpush2.msra.mxu1 %v6789_v19 }
 0x35d   : > { %1798 = vmatpush1.msra.mxu0 %v1461_v14  ;;  %1586 = vmatprep.mubr.f32.mxu0 %v953_v18 }
 0x35e   : > { %1742 = vmatprep.subr.mxu1 %v6791_v40  ;;  %1799 = vmatprep.subr.mxu0 %v1458_v56 }
 0x35f   : > { %1587 = vmatmul.mubr.f32.gmra.mxu0 %v952_v44  ;;  %1743 = vmatpush2.msra.mxu1 %v6792_v33 }
 0x360   : > { %1800 = vmatpush1.msra.mxu0 %v1457_v41  ;;  %1744 = vmatprep.subr.mxu1 %v6793_v49 }
 0x361   : > { %1801 = vmatprep.subr.mxu0 %v1454_v52  ;;  %1745 = vmatpush2.msra.mxu1 %v6794_v28 }
 0x362   : > { %1802 = vmatpush1.msra.mxu0 %v1453_v4  ;;  %1747 = vmatmul.mubr.f32.vlgmr.msra.gmra.mxu1 %v4928_v57 }
 0x363   : > { %1835 = vmatprep.mubr.f32.mxu0 %v6740_v2  ;;  %1752 = vmatprep.mubr.f32.mxu1 %v4931_v17 }
 0x364   : > { %2882 = vmatmul.mubr.msk.f32.vlgmr.msra.gmra.mxu0 %vm1491_vm9, %v4524_v11 }
 0x365   : > { %1841 = vmatprep.mubr.f32.mxu0 %v6740_v2  ;;  %v5013_v11 = vpop.permute.xlu0 %1483 }
 0x366   : > { %1753 = vmatmul.mubr.f32.gmra.mxu1 %v946_v60  ;;  %v5029_v3 = vpop.permute.xlu1 %1488 }
 0x367   : > { %1758 = vmatprep.mubr.f32.mxu1 %v950_v50  ;;  %v5018_v50 = vstv %s2886_s25  ;;  %s2739_s25 = scalar_lea.hbm %s6316_s9, %s2895_s21 }
 0x368   : > { %2883 = vmatmul.mubr.msk.f32.gmra.mxu0 %vm1491_vm9, %v4869_v10 }
 0x369   : > { %1847 = vmatprep.mubr.f32.mxu0 %v6740_v2  ;;  %v5015_v57 = vpop.permute.xlu0 %1473 }
 0x36a   : > { %1759 = vmatmul.mubr.f32.gmra.mxu1 %v949_v46  ;;  %v5041_v13 = vpop.permute.xlu1 %1478 }
 0x36b   : > { %1764 = vmatprep.mubr.f32.mxu1 %v953_v18 }
 0x36c   : > { %2884 = vmatmul.mubr.msk.f32.gmra.mxu0 %vm1491_vm9, %v4887_v43 }
 0x36d   : > { %1853 = vmatprep.mubr.f32.mxu0 %v6740_v2 }
 0x36e   : > { %1765 = vmatmul.mubr.f32.gmra.mxu1 %v952_v44 }
 0x36f   : > { %2569 = vmatprep.mubr.f32.mxu1 %v6740_v2 }
 0x370   : > { %2885 = vmatmul.mubr.msk.f32.gmra.mxu0 %vm1491_vm9, %v4945_v1 }
 0x3dd   : > { %v1659_v60 = vpop.f32.mrf.mxu1 }
 0x3df   : > { %v1661_v58 = vpop.f32.mrf.mxu1 }
 0x407   : > { %v1665_v14 = vpop.f32.mrf.mxu1 }
 0x409   : > { %v1667_v41 = vpop.f32.mrf.mxu1 }
 0x40b   : > { %v1671_v52 = vpop.f32.mrf.mxu1 }
 0x412   : > { %v1570_v10 = vpop.f32.mrf.mxu0 }
 0x413   : > { %v1571_v17 = vadd.f32 %v1570_v10, %v5015_v57 }
 0x414   : > { %v1572_v43 = vpop.f32.mrf.mxu0 }
 0x415   : > { %v1660_v46 = vadd.f32 %v1659_v60, %v1571_v17  ;;  %v1573_v8 = vadd.f32 %v1572_v43, %v5015_v57  ;;  %v1673_v60 = vpop.f32.mrf.mxu1 }
 0x416   : > { %v1576_v53 = vpop.f32.mrf.mxu0 }
 0x417   : > { %vm1861_vm10 = vcmp.ge.f32.partialorder %v1660_v46, 0.0  ;;  %v1878_v45 = vmul.f32 %v5018_v50, %v1660_v46  ;;  %v1662_v59 = vadd.f32 %v1661_v58, %v1573_v8  ;;  %v1577_v18 = vadd.f32 %v1576_v53, %v5041_v13  ;;  %v1677_v58 = vpop.f32.mrf.mxu1 }
 0x418   : > { %v1578_v56 = vpop.f32.mrf.mxu0 }
 0x419   : > { %v5022_v1 = vsel %vm1861_vm10, %v1660_v46, %v1878_v45  ;;  %v1879_v37 = vmul.f32 %v5018_v50, %v1662_v59  ;;  %vm1862_vm11 = vcmp.ge.f32.partialorder %v1662_v59, 0.0  ;;  %v1666_v26 = vadd.f32 %v1665_v14, %v1577_v18  ;;  %v1679_v18 = vpop.f32.mrf.mxu1 }
 0x41a   : > { %6795 = vst [vmem:[#allocation67_spill] sm:$0xff] %v5022_v1  ;;  %2105 = vrot.lane.b32.xlu0 %v5022_v1, %s3216_s22  ;;  %2361 = vrot.lane.b32.xlu1 %v5022_v1, %s3212_s26  ;;  %v1579_v27 = vadd.f32 %v1578_v56, %v5041_v13  ;;  %v1582_v34 = vpop.f32.mrf.mxu0 }
 0x41b   : > { %v5035_v23 = vsel %vm1862_vm11, %v1662_v59, %v1879_v37  ;;  %v1882_v42 = vmul.f32 %v5018_v50, %v1666_v26  ;;  %vm1865_vm12 = vcmp.ge.f32.partialorder %v1666_v26, 0.0  ;;  %v1583_v33 = vadd.f32 %v1582_v34, %v5013_v11 }
 0x41c   : > { %6798 = vst [vmem:[#allocation75_spill] sm:$0xff] %v5035_v23  ;;  %v1668_v44 = vadd.f32 %v1667_v41, %v1579_v27  ;;  %v1584_v10 = vpop.f32.mrf.mxu0 }
 0x41d   : > { %v5058_v19 = vsel %vm1865_vm12, %v1666_v26, %v1882_v42  ;;  %v1672_v4 = vadd.f32 %v1671_v52, %v1583_v33  ;;  %v1585_v17 = vadd.f32 %v1584_v10, %v5013_v11 }
 0x41e   : > { %2041 = vrot.lane.b32.xlu0 %v5022_v1, %s6796_s28  ;;  %2297 = vrot.lane.b32.xlu1 %v5022_v1, %s6797_s16  ;;  %6800 = vst [vmem:[#allocation77_spill] sm:$0xff] %v5058_v19  ;;  %v1883_v16 = vmul.f32 %v5018_v50, %v1668_v44  ;;  %vm1866_vm13 = vcmp.ge.f32.partialorder %v1668_v44, 0.0 }
 0x41f   : > { %v1886_v49 = vmul.f32 %v5018_v50, %v1672_v4  ;;  %vm1869_vm14 = vcmp.ge.f32.partialorder %v1672_v4, 0.0  ;;  %v1674_v43 = vadd.f32 %v1673_v60, %v1585_v17  ;;  %v1588_v46 = vpop.f32.mrf.mxu0 }
 0x420   : > { %v5069_v40 = vsel %vm1866_vm13, %v1668_v44, %v1883_v16  ;;  %v1589_v45 = vadd.f32 %v1588_v46, %v5029_v3 }
 0x421   : > { %6801 = vst [vmem:[#allocation108_spill] sm:$0xff] %v5069_v40  ;;  %v5085_v28 = vsel %vm1869_vm14, %v1672_v4, %v1886_v49  ;;  %v1887_v8 = vmul.f32 %v5018_v50, %v1674_v43  ;;  %vm1870_vm15 = vcmp.ge.f32.partialorder %v1674_v43, 0.0  ;;  %v1590_v26 = vpop.f32.mrf.mxu0 }
 0x422   : > { %1977 = vrot.lane.b32.xlu0 %v5022_v1, %s6608_s14  ;;  %2113 = vrot.lane.b32.xlu1 %v5035_v23, %s3216_s22  ;;  %6802 = vst [vmem:[#allocation72_spill] sm:$0xff] %v5085_v28  ;;  %v1678_v37 = vadd.f32 %v1677_v58, %v1589_v45  ;;  %v1748_v56 = vpop.f32.mrf.mxu1  ;;  %v1591_v16 = vadd.f32 %v1590_v26, %v5029_v3 }
 0x423   : > { %v5106_v59 = vsel %vm1870_vm15, %v1674_v43, %v1887_v8  ;;  %v1749_v42 = vadd.f32 %v1748_v56, %v5015_v57 }
 0x424   : > { %6803 = vst [vmem:[#allocation96_spill] sm:$0xff] %v5106_v59  ;;  %v1890_v53 = vmul.f32 %v5018_v50, %v1678_v37  ;;  %vm1873_vm8 = vcmp.ge.f32.partialorder %v1678_v37, 0.0  ;;  %v1837_v27 = vpop.f32.mrf.mxu0  ;;  %v1750_v33 = vpop.f32.mrf.mxu1  ;;  %v1680_v52 = vadd.f32 %v1679_v18, %v1591_v16 }
 0x425   : > { %v1838_v41 = vadd.f32 %v1837_v27, %v1749_v42  ;;  %v1751_v56 = vadd.f32 %v1750_v33, %v5015_v57 }
 0x426   : > { %1913 = vrot.lane.b32.xlu0 %v5022_v1, %s6799_s1  ;;  %2049 = vrot.lane.b32.xlu1 %v5035_v23, %s6796_s28  ;;  %v5117_v14 = vsel %vm1873_vm8, %v1678_v37, %v1890_v53  ;;  %v1754_v4 = vpop.f32.mrf.mxu1  ;;  %v1839_v49 = vpop.f32.mrf.mxu0  ;;  %v1891_v10 = vmul.f32 %v5018_v50, %v1680_v52  ;;  %vm1874_vm11 = vcmp.ge.f32.partialorder %v1680_v52, 0.0 }
 0x427   : > { %6804 = vst [vmem:[#allocation86_spill] sm:$0xff] %v5117_v14  ;;  %v1880_v44 = vmul.f32 %v5018_v50, %v1838_v41  ;;  %vm1863_vm10 = vcmp.ge.f32.partialorder %v1838_v41, 0.0  ;;  %v1755_v17 = vadd.f32 %v1754_v4, %v5041_v13 }
 0x428   : > { %v1843_v60 = vpop.f32.mrf.mxu0  ;;  %v5154_v43 = vsel %vm1874_vm11, %v1680_v52, %v1891_v10  ;;  %v1756_v58 = vpop.f32.mrf.mxu1 }
 0x429   : > { %v5138_v34 = vsel %vm1863_vm10, %v1838_v41, %v1880_v44  ;;  %6806 = vst [vmem:[#allocation109_spill] sm:$0xff] %v5154_v43  ;;  %v1844_v46 = vadd.f32 %v1843_v60, %v1755_v17  ;;  %v1757_v37 = vadd.f32 %v1756_v58, %v5041_v13  ;;  %v1840_v44 = vadd.f32 %v1839_v49, %v1751_v56 }
 0x42a   : > { %2369 = vrot.lane.b32.xlu0 %v5035_v23, %s3212_s26  ;;  %1985 = vrot.lane.b32.xlu1 %v5035_v23, %s6608_s14  ;;  %6805 = vst [vmem:[#allocation106_spill] sm:$0xff] %v5138_v34  ;;  %v1845_v53 = vpop.f32.mrf.mxu0  ;;  %v1760_v27 = vpop.f32.mrf.mxu1 }
 0x42b   : > { %v1884_v8 = vmul.f32 %v5018_v50, %v1844_v46  ;;  %vm1867_vm12 = vcmp.ge.f32.partialorder %v1844_v46, 0.0  ;;  %v1846_v42 = vadd.f32 %v1845_v53, %v1757_v37  ;;  %v1761_v16 = vadd.f32 %v1760_v27, %v5013_v11 }
 0x42c   : > { %v1849_v4 = vpop.f32.mrf.mxu0  ;;  %v1881_v10 = vmul.f32 %v5018_v50, %v1840_v44  ;;  %vm1864_vm14 = vcmp.ge.f32.partialorder %v1840_v44, 0.0 }
 0x42d   : > { %v5165_v45 = vsel %vm1867_vm12, %v1844_v46, %v1884_v8  ;;  %v1885_v52 = vmul.f32 %v5018_v50, %v1846_v42  ;;  %vm1868_vm13 = vcmp.ge.f32.partialorder %v1846_v42, 0.0  ;;  %v1850_v49 = vadd.f32 %v1849_v4, %v1761_v16 }
 0x42e   : > { %2305 = vrot.lane.b32.xlu0 %v5035_v23, %s6797_s16  ;;  %1921 = vrot.lane.b32.xlu1 %v5035_v23, %s6799_s1  ;;  %6807 = vst [vmem:[#allocation71_spill] sm:$0xff] %v5165_v45  ;;  %v5214_v8 = vsel %vm1864_vm14, %v1840_v44, %v1881_v10  ;;  %v1762_v44 = vpop.f32.mrf.mxu1  ;;  %v1851_v10 = vpop.f32.mrf.mxu0 }
 0x42f   : > { %v5204_v17 = vsel %vm1868_vm13, %v1846_v42, %v1885_v52  ;;  %6812 = vst [vmem:[#allocation98_spill] sm:$0xff] %v5214_v8  ;;  %v1888_v58 = vmul.f32 %v5018_v50, %v1850_v49  ;;  %vm1871_vm15 = vcmp.ge.f32.partialorder %v1850_v49, 0.0  ;;  %v1763_v4 = vadd.f32 %v1762_v44, %v5013_v11 }
 0x430   : > { %6810 = vst [vmem:[#allocation111_spill] sm:$0xff] %v5204_v17  ;;  %v1766_v9 = vpop.f32.mrf.mxu1  ;;  %v1855_v22 = vpop.f32.mrf.mxu0 }
 0x431   : > { %v5225_v56 = vsel %vm1871_vm15, %v1850_v49, %v1888_v58  ;;  %v1852_v2 = vadd.f32 %v1851_v10, %v1763_v4  ;;  %v1767_v54 = vadd.f32 %v1766_v9, %v5029_v3  ;;  %v6992_v12 = vld [vmem:[#allocation106_spill] sm:$0xff] }
 0x432   : > { %2107 = vrot.lane.b32.xlu0 %v5058_v19, %s3216_s22  ;;  %2363 = vrot.lane.b32.xlu1 %v5058_v19, %s3212_s26  ;;  %6813 = vst [vmem:[#allocation90_spill] sm:$0xff] %v5225_v56  ;;  %v1857_v61 = vpop.f32.mrf.mxu0 }
 0x433   : > { %v1889_v21 = vmul.f32 %v5018_v50, %v1852_v2  ;;  %vm1872_vm8 = vcmp.ge.f32.partialorder %v1852_v2, 0.0  ;;  %v1856_v29 = vadd.f32 %v1855_v22, %v1767_v54 }
 0x435   : > { %v5270_v0 = vsel %vm1872_vm8, %v1852_v2, %v1889_v21  ;;  %v1892_v38 = vmul.f32 %v5018_v50, %v1856_v29  ;;  %vm1875_vm10 = vcmp.ge.f32.partialorder %v1856_v29, 0.0 }
 0x436   : > { %2043 = vrot.lane.b32.xlu0 %v5058_v19, %s6796_s28  ;;  %2299 = vrot.lane.b32.xlu1 %v5058_v19, %s6797_s16  ;;  %6818 = vst [vmem:[#allocation92_spill] sm:$0xff] %v5270_v0 }
 0x437   : > { %v5289_v21 = vsel %vm1875_vm10, %v1856_v29, %v1892_v38  ;;  %v1768_v38 = vpop.f32.mrf.mxu1 }
 0x438   : > { %6820 = vst [vmem:[#allocation115_spill] sm:$0xff] %v5289_v21  ;;  %v1769_v63 = vadd.f32 %v1768_v38, %v5029_v3 }
 0x43a   : > { %1979 = vrot.lane.b32.xlu0 %v5058_v19, %s6608_s14  ;;  %2115 = vrot.lane.b32.xlu1 %v5069_v40, %s3216_s22  ;;  %v1858_v5 = vadd.f32 %v1857_v61, %v1769_v63 }
 0x43c   : > { %v1893_v38 = vmul.f32 %v5018_v50, %v1858_v5  ;;  %vm1876_vm11 = vcmp.ge.f32.partialorder %v1858_v5, 0.0 }
 0x43e   : > { %1915 = vrot.lane.b32.xlu0 %v5058_v19, %s6799_s1  ;;  %2051 = vrot.lane.b32.xlu1 %v5069_v40, %s6796_s28  ;;  %v5341_v6 = vsel %vm1876_vm11, %v1858_v5, %v1893_v38 }
 0x43f   : > { %6828 = vst [vmem:[#allocation73_spill] sm:$0xff] %v5341_v6 }
 0x442   : > { %2371 = vrot.lane.b32.xlu0 %v5069_v40, %s3212_s26  ;;  %1987 = vrot.lane.b32.xlu1 %v5069_v40, %s6608_s14 }
 0x446   : > { %2109 = vrot.lane.b32.xlu0 %v5085_v28, %s3216_s22  ;;  %1923 = vrot.lane.b32.xlu1 %v5069_v40, %s6799_s1 }
 0x44a   : > { %2045 = vrot.lane.b32.xlu0 %v5085_v28, %s6796_s28  ;;  %2307 = vrot.lane.b32.xlu1 %v5069_v40, %s6797_s16 }
 0x44e   : > { %1981 = vrot.lane.b32.xlu0 %v5085_v28, %s6608_s14  ;;  %2365 = vrot.lane.b32.xlu1 %v5085_v28, %s3212_s26 }
 0x452   : > { %1917 = vrot.lane.b32.xlu0 %v5085_v28, %s6799_s1  ;;  %2301 = vrot.lane.b32.xlu1 %v5085_v28, %s6797_s16 }
 0x456   : > { %2373 = vrot.lane.b32.xlu0 %v5106_v59, %s3212_s26  ;;  %2237 = vrot.lane.b32.xlu1 %v5085_v28, %s6615_s23 }
 0x45a   : > { %2245 = vrot.lane.b32.xlu0 %v5106_v59, %s6615_s23  ;;  %2117 = vrot.lane.b32.xlu1 %v5106_v59, %s3216_s22 }
 0x45e   : > { %2111 = vrot.lane.b32.xlu0 %v5117_v14, %s3216_s22  ;;  %2053 = vrot.lane.b32.xlu1 %v5106_v59, %s6796_s28 }
 0x462   : > { %2047 = vrot.lane.b32.xlu0 %v5117_v14, %s6796_s28  ;;  %1989 = vrot.lane.b32.xlu1 %v5106_v59, %s6608_s14 }
 0x466   : > { %1983 = vrot.lane.b32.xlu0 %v5117_v14, %s6608_s14  ;;  %1925 = vrot.lane.b32.xlu1 %v5106_v59, %s6799_s1 }
 0x46a   : > { %1919 = vrot.lane.b32.xlu0 %v5117_v14, %s6799_s1  ;;  %2309 = vrot.lane.b32.xlu1 %v5106_v59, %s6797_s16 }
 0x46e   : > { %2121 = vrot.lane.b32.xlu0 %v5138_v34, %s3216_s22  ;;  %2367 = vrot.lane.b32.xlu1 %v5117_v14, %s3212_s26 }
 0x472   : > { %2057 = vrot.lane.b32.xlu0 %v5138_v34, %s6796_s28  ;;  %2303 = vrot.lane.b32.xlu1 %v5117_v14, %s6797_s16 }
 0x476   : > { %1993 = vrot.lane.b32.xlu0 %v5138_v34, %s6608_s14  ;;  %2239 = vrot.lane.b32.xlu1 %v5117_v14, %s6615_s23 }
 0x47a   : > { %1929 = vrot.lane.b32.xlu0 %v5138_v34, %s6799_s1  ;;  %2375 = vrot.lane.b32.xlu1 %v5154_v43, %s3212_s26 }
 0x47e   : > { %2247 = vrot.lane.b32.xlu0 %v5154_v43, %s6615_s23  ;;  %2119 = vrot.lane.b32.xlu1 %v5154_v43, %s3216_s22 }
 0x482   : > { %2123 = vrot.lane.b32.xlu0 %v5165_v45, %s3216_s22  ;;  %2377 = vrot.lane.b32.xlu1 %v5138_v34, %s3212_s26 }
 0x486   : > { %2059 = vrot.lane.b32.xlu0 %v5165_v45, %s6796_s28  ;;  %2055 = vrot.lane.b32.xlu1 %v5154_v43, %s6796_s28 }
 0x48a   : > { %1995 = vrot.lane.b32.xlu0 %v5165_v45, %s6608_s14  ;;  %1991 = vrot.lane.b32.xlu1 %v5154_v43, %s6608_s14 }
 0x48c   : > { %v5180_v18 = vpop.permute.xlu0 %2105  ;;  %v5182_v26 = vpop.permute.xlu1 %2361 }
 0x48d   : > { %6808 = vst [vmem:[#allocation83_spill] sm:$0xff] %v5182_v26 }
 0x48e   : > { %1931 = vrot.lane.b32.xlu0 %v5165_v45, %s6799_s1  ;;  %1927 = vrot.lane.b32.xlu1 %v5154_v43, %s6799_s1 }
 0x490   : > { %v5189_v13 = vpop.permute.xlu0 %2041  ;;  %v5191_v41 = vpop.permute.xlu1 %2297 }
 0x491   : > { %6809 = vst [vmem:[#allocation88_spill] sm:$0xff] %v5191_v41 }
 0x492   : > { %2315 = vrot.lane.b32.xlu0 %v5165_v45, %s6797_s16  ;;  %2311 = vrot.lane.b32.xlu1 %v5154_v43, %s6797_s16 }
 0x494   : > { %v5199_v57 = vpop.permute.xlu0 %1977  ;;  %v5201_v33 = vpop.permute.xlu1 %2113 }
 0x496   : > { %2131 = vrot.lane.b32.xlu0 %v5204_v17, %s3216_s22  ;;  %2313 = vrot.lane.b32.xlu1 %v5138_v34, %s6797_s16 }
 0x498   : > { %v5210_v60 = vpop.permute.xlu0 %1913  ;;  %v5212_v46 = vpop.permute.xlu1 %2049 }
 0x499   : > { %6811 = vst [vmem:[#allocation79_spill] sm:$0xff] %v5210_v60 }
 0x49a   : > { %2323 = vrot.lane.b32.xlu0 %v5204_v17, %s6797_s16  ;;  %2129 = vrot.lane.b32.xlu1 %v5214_v8, %s3216_s22 }
 0x49c   : > { %v5221_v37 = vpop.permute.xlu0 %2369  ;;  %v5223_v53 = vpop.permute.xlu1 %1985 }
 0x49e   : > { %2125 = vrot.lane.b32.xlu0 %v5225_v56, %s3216_s22  ;;  %2065 = vrot.lane.b32.xlu1 %v5214_v8, %s6796_s28 }
 0x4a0   : > { %v5231_v42 = vpop.permute.xlu0 %2305  ;;  %v5233_v27 = vpop.permute.xlu1 %1921 }
 0x4a1   : > { %6814 = vst [vmem:[#allocation101_spill] sm:$0xff] %v5231_v42 }
 0x4a2   : > { %2061 = vrot.lane.b32.xlu0 %v5225_v56, %s6796_s28  ;;  %2001 = vrot.lane.b32.xlu1 %v5214_v8, %s6608_s14 }
 0x4a4   : > { %v5239_v16 = vpop.permute.xlu0 %2107  ;;  %v5241_v52 = vpop.permute.xlu1 %2363 }
 0x4a5   : > { %6815 = vst [vmem:[#allocation113_spill] sm:$0xff] %v5241_v52 }
 0x4a6   : > { %1997 = vrot.lane.b32.xlu0 %v5225_v56, %s6608_s14  ;;  %1937 = vrot.lane.b32.xlu1 %v5214_v8, %s6799_s1 }
 0x4a8   : > { %v5248_v49 = vpop.permute.xlu0 %2043  ;;  %v5250_v58 = vpop.permute.xlu1 %2299 }
 0x4a9   : > { %6816 = vst [vmem:[#allocation78_spill] sm:$0xff] %v5250_v58 }
 0x4aa   : > { %1933 = vrot.lane.b32.xlu0 %v5225_v56, %s6799_s1  ;;  %2379 = vrot.lane.b32.xlu1 %v5165_v45, %s3212_s26 }
 0x4ac   : > { %v5256_v11 = vpop.permute.xlu0 %1979  ;;  %v5258_v44 = vpop.permute.xlu1 %2115 }
 0x4ae   : > { %2317 = vrot.lane.b32.xlu0 %v5225_v56, %s6797_s16  ;;  %2067 = vrot.lane.b32.xlu1 %v5204_v17, %s6796_s28 }
 0x4b0   : > { %v5266_v4 = vpop.permute.xlu0 %1915  ;;  %v5268_v10 = vpop.permute.xlu1 %2051 }
 0x4b1   : > { %6817 = vst [vmem:[#allocation80_spill] sm:$0xff] %v5266_v4 }
 0x4b2   : > { %2133 = vrot.lane.b32.xlu0 %v5270_v0, %s3216_s22  ;;  %2003 = vrot.lane.b32.xlu1 %v5204_v17, %s6608_s14 }
 0x4b4   : > { %v5276_v9 = vpop.permute.xlu0 %2371  ;;  %v5278_v25 = vpop.permute.xlu1 %1987 }
 0x4b6   : > { %2325 = vrot.lane.b32.xlu0 %v5270_v0, %s6797_s16  ;;  %1939 = vrot.lane.b32.xlu1 %v5204_v17, %s6799_s1 }
 0x4b8   : > { %v5285_v2 = vpop.permute.xlu0 %2109  ;;  %v5287_v22 = vpop.permute.xlu1 %1923 }
 0x4b9   : > { %6819 = vst [vmem:[#allocation74_spill] sm:$0xff] %v5287_v22 }
 0x4ba   : > { %2383 = vrot.lane.b32.xlu0 %v5289_v21, %s3212_s26  ;;  %2381 = vrot.lane.b32.xlu1 %v5225_v56, %s3212_s26 }
 0x4bc   : > { %v5295_v54 = vpop.permute.xlu0 %2045  ;;  %v5297_v24 = vpop.permute.xlu1 %2307 }
 0x4bd   : > { %6821 = vst [vmem:[#allocation119_spill] sm:$0xff] %v5297_v24 }
 0x4be   : > { %2127 = vrot.lane.b32.xlu0 %v5289_v21, %s3216_s22  ;;  %2253 = vrot.lane.b32.xlu1 %v5225_v56, %s6615_s23 }
 0x4c0   : > { %v5303_v31 = vpop.permute.xlu0 %1981  ;;  %v5305_v29 = vpop.permute.xlu1 %2365 }
 0x4c1   : > { %6822 = vst [vmem:[#allocation103_spill] sm:$0xff] %v5303_v31  ;;  %6823 = vst [vmem:[#allocation94_spill] sm:$0xff] %v5305_v29 }
 0x4c2   : > { %2063 = vrot.lane.b32.xlu0 %v5289_v21, %s6796_s28  ;;  %2069 = vrot.lane.b32.xlu1 %v5270_v0, %s6796_s28 }
 0x4c4   : > { %v5311_v7 = vpop.permute.xlu0 %1917  ;;  %v5313_v20 = vpop.permute.xlu1 %2301 }
 0x4c5   : > { %6824 = vst [vmem:[#allocation104_spill] sm:$0xff] %v5311_v7  ;;  %6825 = vst [vmem:[#allocation82_spill] sm:$0xff] %v5313_v20 }
 0x4c6   : > { %1999 = vrot.lane.b32.xlu0 %v5289_v21, %s6608_s14  ;;  %2005 = vrot.lane.b32.xlu1 %v5270_v0, %s6608_s14 }
 0x4c8   : > { %v5320_v35 = vpop.permute.xlu0 %2373  ;;  %v5322_v39 = vpop.permute.xlu1 %2237 }
 0x4c9   : > { %6826 = vst [vmem:[#allocation117_spill] sm:$0xff] %v5322_v39 }
 0x4ca   : > { %1935 = vrot.lane.b32.xlu0 %v5289_v21, %s6799_s1  ;;  %1941 = vrot.lane.b32.xlu1 %v5270_v0, %s6799_s1 }
 0x4cc   : > { %v5328_v62 = vpop.permute.xlu0 %2245  ;;  %v5330_v3 = vpop.permute.xlu1 %2117 }
 0x4cd   : > { %6827 = vst [vmem:[#allocation84_spill] sm:$0xff] %v5328_v62 }
 0x4ce   : > { %2319 = vrot.lane.b32.xlu0 %v5289_v21, %s6797_s16  ;;  %2255 = vrot.lane.b32.xlu1 %v5289_v21, %s6615_s23 }
 0x4d0   : > { %v5337_v61 = vpop.permute.xlu0 %2111  ;;  %v5339_v63 = vpop.permute.xlu1 %2053 }
 0x4d2   : > { %2135 = vrot.lane.b32.xlu0 %v5341_v6, %s3216_s22  ;;  %2251 = vrot.lane.b32.xlu1 %v5165_v45, %s6615_s23 }
 0x4d4   : > { %v5347_v50 = vpop.permute.xlu0 %2047  ;;  %v5349_v48 = vpop.permute.xlu1 %1989 }
 0x4d5   : > { %6829 = vst [vmem:[#allocation95_spill] sm:$0xff] %v5347_v50 }
 0x4d6   : > { %2243 = vrot.lane.b32.xlu0 %v5069_v40, %s6615_s23  ;;  %2235 = vrot.lane.b32.xlu1 %v5058_v19, %s6615_s23 }
 0x4d8   : > { %v5355_v47 = vpop.permute.xlu0 %1983  ;;  %v5357_v5 = vpop.permute.xlu1 %1925 }
 0x4d9   : > { %6830 = vst [vmem:[#allocation76_spill] sm:$0xff] %v5355_v47  ;;  %6831 = vst [vmem:[#allocation97_spill] sm:$0xff] %v5357_v5 }
 0x4da   : > { %2321 = vrot.lane.b32.xlu0 %v5214_v8, %s6797_s16  ;;  %2071 = vrot.lane.b32.xlu1 %v5341_v6, %s6796_s28 }
 0x4dc   : > { %v5363_v38 = vpop.permute.xlu0 %1919  ;;  %v5365_v50 = vpop.permute.xlu1 %2309 }
 0x4dd   : > { %6832 = vst [vmem:[#allocation105_spill] sm:$0xff] %v5363_v38  ;;  %6833 = vst [vmem:[#allocation100_spill] sm:$0xff] %v5365_v50 }
 0x4de   : > { %2241 = vrot.lane.b32.xlu0 %v5035_v23, %s6615_s23  ;;  %2249 = vrot.lane.b32.xlu1 %v5138_v34, %s6615_s23 }
 0x4e0   : > { %v5371_v20 = vpop.permute.xlu0 %2121  ;;  %v5373_v47 = vpop.permute.xlu1 %2367 }
 0x4e1   : > { %6834 = vst [vmem:[#allocation118_spill] sm:$0xff] %v5371_v20  ;;  %6835 = vst [vmem:[#allocation114_spill] sm:$0xff] %v5373_v47 }
 0x4e2   : > { %2183 = vrot.lane.b32.xlu0 %v5154_v43, %s6634_s17  ;;  %2007 = vrot.lane.b32.xlu1 %v5341_v6, %s6608_s14 }
 0x4e4   : > { %v5379_v36 = vpop.permute.xlu0 %2057  ;;  %v5381_v38 = vpop.permute.xlu1 %2303 }
 0x4e5   : > { %6836 = vst [vmem:[#allocation91_spill] sm:$0xff] %v5381_v38 }
 0x4e6   : > { %2261 = vrot.lane.b32.xlu0 %v5270_v0, %s6615_s23  ;;  %2233 = vrot.lane.b32.xlu1 %v5022_v1, %s6615_s23 }
 0x4e8   : > { %v5387_v50 = vpop.permute.xlu0 %1993  ;;  %v5389_v20 = vpop.permute.xlu1 %2239 }
 0x4e9   : > { %6837 = vst [vmem:[#allocation127_spill] sm:$0xff] %v5387_v50  ;;  %6838 = vst [vmem:[#allocation120_spill] sm:$0xff] %v5389_v20  ;;  %v6841_v20 = vld [vmem:[#allocation35_spill] sm:$0xff] }
 0x4ea   : > { %2181 = vrot.lane.b32.xlu0 %v5106_v59, %s6634_s17  ;;  %1943 = vrot.lane.b32.xlu1 %v5341_v6, %s6799_s1  ;;  %s3129_s1 = sshll.u32 %s3222_s13, 4  ;;  %s3130_s1 = int_to_ptr.vmem [resolvable:$false] %s3129_s1 }
 0x4eb   : > { %s3131_s22 = scalar_lea.vmem %s3130_s1, 1024 }
 0x4ec   : > { %v5395_v43 = vpop.permute.xlu0 %1929  ;;  %v5397_v51 = vpop.permute.xlu1 %2375 }
 0x4ed   : > { %6839 = vst [vmem:[#allocation102_spill] sm:$0xff] %v5395_v43 }
 0x4ee   : > { %2259 = vrot.lane.b32.xlu0 %v5204_v17, %s6615_s23  ;;  %2191 = vrot.lane.b32.xlu1 %v5289_v21, %s6634_s17 }
 0x4f0   : > { %v5403_v38 = vpop.permute.xlu0 %2247  ;;  %v5405_v7 = vpop.permute.xlu1 %2119 }
 0x4f1   : > { %6840 = vst [vmem:[#allocation107_spill] sm:$0xff] %v5403_v38  ;;  %v2148_v59 = vsel %vm521_vm4, %v5337_v61, %v5405_v7 }
 0x4f2   : > { %v2166_v5 = vmul.f32 %v2148_v59, %v6841_v20  ;;  %2179 = vrot.lane.b32.xlu0 %v5069_v40, %s6634_s17  ;;  %2175 = vrot.lane.b32.xlu1 %v5117_v14, %s6634_s17 }
 0x4f4   : > { %v5416_v31 = vpop.permute.xlu0 %2123  ;;  %2434 = vmatprep.subr.mxu0 %v2166_v5  ;;  %v5418_v21 = vpop.permute.xlu1 %2377 }
 0x4f5   : > { %6842 = vst [vmem:[#allocation93_spill] sm:$0xff] %v5418_v21 }
 0x4f6   : > { %2327 = vrot.lane.b32.xlu0 %v5341_v6, %s6797_s16  ;;  %2189 = vrot.lane.b32.xlu1 %v5225_v56, %s6634_s17 }
 0x4f8   : > { %v5424_v38 = vpop.permute.xlu0 %2059  ;;  %v5426_v59 = vpop.permute.xlu1 %2055 }
 0x4f9   : > { %6843 = vst [vmem:[#allocation85_spill] sm:$0xff] %v5424_v38 }
 0x4fa   : > { %2257 = vrot.lane.b32.xlu0 %v5214_v8, %s6615_s23  ;;  %2173 = vrot.lane.b32.xlu1 %v5085_v28, %s6634_s17 }
 0x4fc   : > { %v5432_v40 = vpop.permute.xlu0 %1995  ;;  %v5434_v5 = vpop.permute.xlu1 %1991 }
 0x4fd   : > { %6844 = vst [vmem:[#allocation121_spill] sm:$0xff] %v5432_v40  ;;  %6845 = vst [vmem:[#allocation125_spill] sm:$0xff] %v5434_v5 }
 0x4fe   : > { %2263 = vrot.lane.b32.xlu0 %v5341_v6, %s6615_s23  ;;  %2187 = vrot.lane.b32.xlu1 %v5165_v45, %s6634_s17 }
 0x500   : > { %v5440_v56 = vpop.permute.xlu0 %1931  ;;  %v5442_v14 = vpop.permute.xlu1 %1927 }
 0x501   : > { %6846 = vst [vmem:[#allocation122_spill] sm:$0xff] %v5440_v56  ;;  %6847 = vst [vmem:[#allocation22_spill] sm:$0xff] %v5442_v14  ;;  %v5460_v14 = vld [vmem:[#allocation9 + $0x8] sm:$0xff] }
 0x502   : > { %2177 = vrot.lane.b32.xlu0 %v5035_v23, %s6634_s17  ;;  %2171 = vrot.lane.b32.xlu1 %v5058_v19, %s6634_s17 }
 0x503   : > { %2498 = vmatprep.mubr.f32.mxu0 %v5460_v14 }
 0x504   : > { %v5448_v28 = vpop.permute.xlu0 %2315  ;;  %v5450_v40 = vpop.permute.xlu1 %2311 }
 0x505   : > { %6848 = vst [vmem:[#allocation124_spill] sm:$0xff] %v5448_v28  ;;  %6849 = vst [vmem:[#allocation123_spill] sm:$0xff] %v5450_v40 }
 0x506   : > { %2199 = vrot.lane.b32.xlu0 %v5341_v6, %s6634_s17  ;;  %2185 = vrot.lane.b32.xlu1 %v5138_v34, %s6634_s17 }
 0x508   : > { %v5456_v45 = vpop.permute.xlu0 %2131  ;;  %v5458_v56 = vpop.permute.xlu1 %2313 }
 0x509   : > { %6850 = vst [vmem:[#allocation116_spill] sm:$0xff] %v5458_v56  ;;  %v5466_v23 = vsel %vm521_vm4, %v5416_v31, %v5456_v45 }
 0x50a   : > { %2197 = vrot.lane.b32.xlu0 %v5270_v0, %s6634_s17  ;;  %2169 = vrot.lane.b32.xlu1 %v5022_v1, %s6634_s17 }
 0x50c   : > { %v5473_v34 = vpop.permute.xlu0 %2323  ;;  %v5475_v19 = vpop.permute.xlu1 %2129 }
 0x50d   : > { %6851 = vst [vmem:[#allocation129_spill] sm:$0xff] %v5473_v34  ;;  %v5481_v56 = vsel %vm620_vm1, %v5448_v28, %v5473_v34 }
 0x50e   : > { %6852 = vst [vmem:[#allocation24_spill] sm:$0xff] %v5481_v56  ;;  %2193 = vrot.lane.b32.xlu0 %v5214_v8, %s6634_s17  ;;  %2195 = vrot.lane.b32.xlu1 %v5204_v17, %s6634_s17 }
 0x510   : > { %v5487_v40 = vpop.permute.xlu0 %2125  ;;  %v5489_v5 = vpop.permute.xlu1 %2065 }
 0x511   : > { %6853 = vst [vmem:[#allocation128_spill] sm:$0xff] %v5489_v5  ;;  %v5495_v1 = vsel %vm488_vm5, %v5379_v36, %v5489_v5 }
 0x512   : > { %6854 = vst [vmem:[#allocation65_spill] sm:$0xff] %v5495_v1  ;;  %2389 = vrot.lane.b32.xlu0 %v5270_v0, %s3212_s26  ;;  %2391 = vrot.lane.b32.xlu1 %v5341_v6, %s3212_s26  ;;  %v2425_v6 = vld [vmem:[%s6314_s7] sm:$0xff] }
 0x514   : > { %v5501_v56 = vpop.permute.xlu0 %2061  ;;  %v5503_v34 = vpop.permute.xlu1 %2001 }
 0x515   : > { %6855 = vst [vmem:[#allocation63_spill] sm:$0xff] %v5501_v56  ;;  %6856 = vst [vmem:[#allocation126_spill] sm:$0xff] %v5503_v34  ;;  %v5509_v28 = vsel %vm455_vm6, %v5387_v50, %v5503_v34 }
 0x516   : > { %6857 = vst [vmem:[#allocation81_spill] sm:$0xff] %v5509_v28  ;;  %2385 = vrot.lane.b32.xlu0 %v5214_v8, %s3212_s26  ;;  %2387 = vrot.lane.b32.xlu1 %v5204_v17, %s3212_s26  ;;  %s392_s26 = sand.u32 1, %s3193_s10  }
 0x517   : > { %s2867_s23 = sshll.u32 %s392_s26, 5  ;;  %s2727_s28 = scalar_lea.sflag [#allocation4], %s392_s26 }
 0x518   : > { %v5515_v0 = vpop.permute.xlu0 %1997  ;;  %v5517_v1 = vpop.permute.xlu1 %1937  ;;  %s394_s17 = scalar_lea.vmem [#allocation12], %s2867_s23 }
 0x519   : > { %6858 = vst [vmem:[#allocation70_spill] sm:$0xff] %v5515_v0  ;;  %6859 = vst [vmem:[#allocation64_spill] sm:$0xff] %v5517_v1  ;;  %v5526_v34 = vsel %vm422_vm7, %v5395_v43, %v5517_v1  ;;  %s2741_s24 = sshll.u32 %s394_s17, 4  ;;  %s2742_s24 = int_to_ptr.vmem [resolvable:$true] %s2741_s24 }
 0x51a   : > { %6860 = vst [vmem:[#allocation59_spill] sm:$0xff] %v5526_v34  ;;  %2428 = vperm.xlu1 %3001, %v2425_v6   ;;  %v2404_v34 = vsel %vm653_vm0, %v5373_v47, %v5397_v51  ;;  %v6870_v47 = vld [vmem:[#allocation19_spill] sm:$0xff]  ;;  %s3125_s16 = scalar_lea.vmem %s2742_s24, 512  ;;  %p3132_p10 = scmp.lt.s32.totalorder %s2742_s24, %s3130_s1 }
 0x51b   : > { %v2421_v43 = vmul.f32 %v2404_v34, %v6688_v32  ;;  %v2397_v34 = vsel %vm653_vm0, %v5221_v37, %v5418_v21  ;;  %v5602_v21 = vld [vmem:[#allocation9 + $0x10] sm:$0xff]  ;;  %p3126_p9 = scmp.ne.s32.totalorder %s2742_s24, %s3125_s16  ;;  %p3133_p0 = scmp.lt.s32.totalorder %s3131_s22, %s3125_s16 }
 0x51c   : > { %v5528_v28 = vpop.permute.xlu0 %1933  ;;  %v5530_v8 = vpop.permute.xlu1 %2379  ;;  %6872 = vst [vmem:[#allocation68_spill] sm:$0xff] %v5602_v21 }
 0x51d   : > { %6861 = vst [vmem:[#allocation57_spill] sm:$0xff] %v5528_v28  ;;  %6862 = vst [vmem:[#allocation56_spill] sm:$0xff] %v5530_v8  ;;  %p3127_p5 = pnand %p3126_p9, %p6995_p11  ;;  %p3134_p1 = por %p3133_p0, %p3132_p10 }
 0x51f   : > { %p3128_p6 = pneg %p3127_p5 }
 0x520   : > { %v5532_v17 = vpop.permute.xlu0 %2317  ;;  %v5534_v0 = vpop.permute.xlu1 %2067 }
 0x521   : > { %6863 = vst [vmem:[#allocation53_spill] sm:$0xff] %v5532_v17  ;;  %p3135_p13 = pnand %p3134_p1, %p3128_p6 }
 0x524   : > { %v5536_v5 = vpop.permute.xlu0 %2133  ;;  %v5538_v38 = vpop.permute.xlu1 %2003 }
 0x525   : > { %6864 = vst [vmem:[#allocation51_spill] sm:$0xff] %v5538_v38  ;;  %v2398_v38 = vsel %vm653_vm0, %v5276_v9, %v5530_v8  ;;  %v2410_v8 = vmul.f32 %v2397_v34, %v6870_v47 }
 0x528   : > { %v5540_v56 = vpop.permute.xlu0 %2325  ;;  %v5542_v50 = vpop.permute.xlu1 %1939 }
 0x529   : > { %6865 = vst [vmem:[#allocation49_spill] sm:$0xff] %v5540_v56  ;;  %6866 = vst [vmem:[#allocation110_spill] sm:$0xff] %v5542_v50  ;;  %v5548_v6 = vsel %vm620_vm1, %v5532_v17, %v5540_v56 }
 0x52a   : > { %6867 = vst [vmem:[#allocation112_spill] sm:$0xff] %v5548_v6  ;;  %v2403_v6 = vsel %vm653_vm0, %v5305_v29, %v5320_v35 }
 0x52c   : > { %v5554_v1 = vpop.permute.xlu0 %2383  ;;  %v5556_v28 = vpop.permute.xlu1 %2381 }
 0x52d   : > { %6868 = vst [vmem:[#allocation89_spill] sm:$0xff] %v5554_v1  ;;  %6869 = vst [vmem:[#allocation87_spill] sm:$0xff] %v5556_v28  ;;  %v2400_v50 = vsel %vm653_vm0, %v5397_v51, %v5554_v1  ;;  %v2399_v56 = vsel %vm653_vm0, %v5320_v35, %v5556_v28  ;;  %v2402_v51 = vsel %vm653_vm0, %v5241_v52, %v5276_v9 }
 0x52e   : > { %v2422_v17 = vmul.f32 %v2400_v50, %v6870_v47  ;;  %v2418_v28 = vmul.f32 %v2399_v56, %v6870_v47  ;;  %v2417_v50 = vmul.f32 %v2403_v6, %v6688_v32  ;;  %v2401_v9 = vsel %vm653_vm0, %v5182_v26, %v5221_v37 }
 0x52f   : > { %v2414_v56 = vmul.f32 %v2398_v38, %v6870_v47  ;;  %v2145_v47 = vsel %vm521_vm4, %v5180_v18, %v5201_v33  ;;  %v2147_v26 = vsel %vm521_vm4, %v5285_v2, %v5330_v3 }
 0x530   : > { %v5581_v1 = vpop.permute.xlu0 %2127  ;;  %2529 = vmatprep.subr.mxu1 %v2422_v17  ;;  %v5583_v35 = vpop.permute.xlu1 %2253  ;;  %v2413_v17 = vmul.f32 %v2402_v51, %v6688_v32 }
 0x531   : > { %6871 = vst [vmem:[#allocation99_spill] sm:$0xff] %v5583_v35  ;;  %2530 = vmatpush1.msra.mxu1 %v2421_v43  ;;  %v2409_v43 = vmul.f32 %v2401_v9, %v6688_v32  ;;  %v2081_v32 = vsel %vm488_vm5, %v5189_v13, %v5212_v46 }
 0x532   : > { %2531 = vmatprep.subr.mxu1 %v2418_v28  ;;  %v5635_v34 = vmul.f32 %v2081_v32, %v3639_v55  ;;  %v1954_v32 = vsel %vm422_vm7, %v5266_v4, %v5287_v22 }
 0x533   : > { %2532 = vmatpush1.msra.mxu1 %v2417_v50  ;;  %v5632_v50 = vmul.f32 %v2145_v47, %v6841_v20  ;;  %v2018_v47 = vsel %vm455_vm6, %v5256_v11, %v5278_v25 }
 0x534   : > { %v5597_v6 = vpop.permute.xlu0 %2063  ;;  %2533 = vmatprep.subr.mxu1 %v2414_v56  ;;  %v5599_v52 = vpop.permute.xlu1 %2069  ;;  %v1953_v56 = vsel %vm422_vm7, %v5210_v60, %v5233_v27  ;;  %v6882_v60 = vld [vmem:[#allocation45_spill] sm:$0xff] }
 0x535   : > { %2534 = vmatpush1.msra.mxu1 %v2413_v17  ;;  %v2146_v17 = vsel %vm521_vm4, %v5239_v16, %v5258_v44  ;;  %v5699_v22 = vmul.f32 %v1953_v56, %v6882_v60 }
 0x536   : > { %2535 = vmatprep.subr.mxu1 %v2410_v8  ;;  %v2017_v8 = vsel %vm455_vm6, %v5199_v57, %v5223_v53 }
 0x537   : > { %2536 = vmatpush1.msra.mxu1 %v2409_v43  ;;  %v5638_v9 = vmul.f32 %v2017_v8, %v3665_v30  ;;  %v2082_v43 = vsel %vm488_vm5, %v5248_v49, %v5268_v10  ;;  %v2338_v8 = vsel %vm620_vm1, %v5250_v58, %v5297_v24  ;;  %v2083_v58 = vsel %vm488_vm5, %v5295_v54, %v5339_v63  ;;  %v6881_v24 = vld [vmem:[#allocation104_spill] sm:$0xff] }
 0x538   : > { %v5604_v37 = vpop.permute.xlu0 %1999  ;;  %v5606_v28 = vpop.permute.xlu1 %2005  ;;  %2887 = vmatmul.mubr.msk.f32.vlgmr.msra.gmra.mxu1 %vm1491_vm9, %v5602_v21  ;;  %v2275_v21 = vsel %vm587_vm2, %v5322_v39, %v5328_v62  ;;  %v6880_v62 = vld [vmem:[#allocation97_spill] sm:$0xff]  ;;  %6883 = vst [vmem:[#allocation55_spill] sm:$0xff] %v5699_v22  ;;  %v5702_v4 = vmul.f32 %v2338_v8, %v6690_v15 }
 0x539   : > { %2640 = vmatprep.mubr.f32.mxu1 %v5460_v14  ;;  %v2337_v14 = vsel %vm620_vm1, %v5191_v41, %v5231_v42  ;;  %6875 = vst [vmem:[#allocation62_spill] sm:$0xff] %v5638_v9  ;;  %v6879_v42 = vld [vmem:[#allocation103_spill] sm:$0xff]  ;;  %v6885_v9 = vld [vmem:[#allocation28_spill] sm:$0xff] }
 0x53a   : > { %v5677_v35 = vmul.f32 %v2337_v14, %v6690_v15  ;;  %v2019_v39 = vsel %vm455_vm6, %v6879_v42, %v5349_v48  ;;  %v5693_v14 = vmul.f32 %v2082_v43, %v3639_v55  ;;  %6884 = vst [vmem:[#allocation54_spill] sm:$0xff] %v5702_v4  ;;  %v6891_v4 = vld [vmem:[#allocation37_spill] sm:$0xff] }
 0x53b   : > { %v5715_v43 = vmul.f32 %v2019_v39, %v3665_v30  ;;  %v2151_v39 = vsel %vm521_vm4, %v5536_v5, %v5285_v2  ;;  %v6890_v2 = vld [vmem:[#allocation36_spill] sm:$0xff] }
 0x53c   : > { %v5623_v38 = vpop.permute.xlu0 %1935  ;;  %v5625_v51 = vpop.permute.xlu1 %1941  ;;  %6878 = vst [vmem:[#allocation60_spill] sm:$0xff] %v5677_v35  ;;  %v5696_v35 = vmul.f32 %v2018_v47, %v3665_v30 }
 0x53d   : > { %6873 = vst [vmem:[#allocation69_spill] sm:$0xff] %v5623_v38  ;;  %6874 = vst [vmem:[#allocation66_spill] sm:$0xff] %v5625_v51  ;;  %v5705_v51 = vmul.f32 %v2275_v21, %v6885_v9  ;;  %v2162_v38 = vmul.f32 %v2147_v26, %v6841_v20  ;;  %v2144_v21 = vsel %vm521_vm4, %v5405_v7, %v5581_v1 }
 0x53f   : > { %6886 = vst [vmem:[#allocation52_spill] sm:$0xff] %v5705_v51  ;;  %v2143_v51 = vsel %vm521_vm4, %v5330_v3, %v5487_v40 }
 0x540   : > { %v5672_v29 = vpop.permute.xlu0 %2319  ;;  %v5674_v41 = vpop.permute.xlu1 %2255 }
 0x541   : > { %6876 = vst [vmem:[#allocation61_spill] sm:$0xff] %v5672_v29  ;;  %6877 = vst [vmem:[#allocation58_spill] sm:$0xff] %v5674_v41  ;;  %v1955_v29 = vsel %vm422_vm7, %v6881_v24, %v6880_v62  ;;  %v2158_v41 = vmul.f32 %v2146_v17, %v6841_v20  ;;  %v5709_v62 = vmul.f32 %v1954_v32, %v6882_v60 }
 0x542   : > { %v5712_v17 = vmul.f32 %v2083_v58, %v3639_v55  ;;  %v5718_v56 = vmul.f32 %v1955_v29, %v6882_v60  ;;  %v2139_v20 = vsel %vm521_vm4, %v5487_v40, %v5536_v5  ;;  %v6888_v58 = vld [vmem:[#allocation100_spill] sm:$0xff]  ;;  %v6889_v29 = vld [vmem:[#allocation82_spill] sm:$0xff] }
 0x543   : > { %v5744_v32 = vsel %vm620_vm1, %v6889_v29, %v6888_v58  ;;  %v2150_v29 = vsel %vm521_vm4, %v5456_v45, %v5239_v16  ;;  %v6893_v40 = vld [vmem:[#allocation38_spill] sm:$0xff] }
 0x544   : > { %v2136_v47 = vpop.permute.xlu0 %2135  ;;  %v5724_v8 = vpop.permute.xlu1 %2251  ;;  %v2167_v3 = vmul.f32 %v2144_v21, %v6893_v40  ;;  %v2163_v16 = vmul.f32 %v2143_v51, %v6893_v40  ;;  %v2160_v21 = vmul.f32 %v5466_v23, %v6891_v4  ;;  %v6896_v51 = vld [vmem:[#allocation127_spill] sm:$0xff] }
 0x545   : > { %6887 = vst [vmem:[#allocation50_spill] sm:$0xff] %v5724_v8  ;;  %v2140_v26 = vsel %vm521_vm4, %v5581_v1, %v2136_v47  ;;  %v2152_v7 = vsel %vm521_vm4, %v2136_v47, %v5337_v61  ;;  %v6892_v1 = vld [vmem:[#allocation118_spill] sm:$0xff]  ;;  %v2077_v47 = vsel %vm488_vm5, %v5212_v46, %v5379_v36  ;;  %v6894_v46 = vld [vmem:[#allocation95_spill] sm:$0xff] }
 0x546   : > { %v2165_v5 = vmul.f32 %v2152_v7, %v6890_v2  ;;  %v2168_v8 = vmul.f32 %v2140_v26, %v6891_v4  ;;  %v2141_v61 = vsel %vm521_vm4, %v5201_v33, %v6892_v1  ;;  %v2142_v26 = vsel %vm521_vm4, %v5258_v44, %v5416_v31 }
 0x547   : > { %v2161_v7 = vmul.f32 %v2151_v39, %v6890_v2  ;;  %v2164_v33 = vmul.f32 %v2139_v20, %v6891_v4  ;;  %v2084_v45 = vsel %vm488_vm5, %v6894_v46, %v5426_v59  ;;  %v2149_v31 = vsel %vm521_vm4, %v5475_v19, %v5180_v18  ;;  %v6895_v39 = vld [vmem:[#allocation41_spill] sm:$0xff] }
 0x548   : > { %v5771_v22 = vpop.permute.xlu0 %2243  ;;  %2435 = vmatpush1.msra.mxu0 %v2165_v5  ;;  %2576 = vmatprep.subr.mxu1 %v2168_v8  ;;  %v5773_v36 = vpop.permute.xlu1 %2235  ;;  %v2157_v44 = vmul.f32 %v2150_v29, %v6890_v2  ;;  %v2137_v8 = vsel %vm521_vm4, %v6892_v1, %v5475_v19  ;;  %v2155_v20 = vmul.f32 %v2141_v61, %v6893_v40 }
 0x549   : > { %2436 = vmatprep.subr.mxu0 %v2162_v38  ;;  %2577 = vmatpush1.msra.mxu1 %v2167_v3  ;;  %v5793_v18 = vmul.f32 %v2077_v47, %v6895_v39  ;;  %v2013_v38 = vsel %vm455_vm6, %v5223_v53, %v6896_v51  ;;  %v2159_v23 = vmul.f32 %v2142_v26, %v6893_v40  ;;  %v6898_v47 = vld [vmem:[#allocation39_spill] sm:$0xff]  ;;  %v6899_v3 = vld [vmem:[#allocation40_spill] sm:$0xff]  ;;  %v6900_v26 = vld [vmem:[#allocation85_spill] sm:$0xff] }
 0x54a   : > { %2437 = vmatpush1.msra.mxu0 %v2161_v7  ;;  %2578 = vmatprep.subr.mxu1 %v2164_v33  ;;  %v2102_v29 = vmul.f32 %v2084_v45, %v3639_v55  ;;  %v2153_v19 = vmul.f32 %v2149_v31, %v6890_v2  ;;  %v2156_v61 = vmul.f32 %v2137_v8, %v6891_v4  ;;  %v6897_v2 = vld [vmem:[#allocation63_spill] sm:$0xff]  ;;  %v6901_v7 = vld [vmem:[#allocation125_spill] sm:$0xff]  ;;  %v6902_v33 = vld [vmem:[#allocation76_spill] sm:$0xff] }
 0x54b   : > { %2438 = vmatprep.subr.mxu0 %v2158_v41  ;;  %2579 = vmatpush1.msra.mxu1 %v2163_v16  ;;  %v2080_v53 = vsel %vm488_vm5, %v5426_v59, %v5597_v6  ;;  %v2075_v4 = vsel %vm488_vm5, %v6897_v2, %v5599_v52  ;;  %v2087_v59 = vsel %vm488_vm5, %v5599_v52, %v5295_v54 }
 0x54c   : > { %v5802_v5 = vpop.permute.xlu0 %2321  ;;  %2439 = vmatpush1.msra.mxu0 %v2157_v44  ;;  %2580 = vmatprep.subr.mxu1 %v2160_v21  ;;  %v2072_v1 = vpop.permute.xlu1 %2071  ;;  %v2079_v52 = vsel %vm488_vm5, %v5339_v63, %v6897_v2  ;;  %v2074_v54 = vsel %vm488_vm5, %v6900_v26, %v5534_v0  ;;  %v2103_v45 = vmul.f32 %v2080_v53, %v6895_v39  ;;  %v6903_v63 = vld [vmem:[#allocation128_spill] sm:$0xff]  ;;  %v6907_v2 = vld [vmem:[#allocation42_spill] sm:$0xff] }
 0x54d   : > { %v2076_v41 = vsel %vm488_vm5, %v5597_v6, %v2072_v1  ;;  %v2088_v55 = vsel %vm488_vm5, %v2072_v1, %v6894_v46  ;;  %2440 = vmatprep.subr.mxu0 %v5632_v50  ;;  %2581 = vmatpush1.msra.mxu1 %v2159_v23  ;;  %v2078_v50 = vsel %vm488_vm5, %v5268_v10, %v6900_v26 }
 0x54e   : > { %v2101_v40 = vmul.f32 %v2088_v55, %v6898_v47  ;;  %v2104_v6 = vmul.f32 %v2076_v41, %v6899_v3  ;;  %v2020_v46 = vsel %vm455_vm6, %v6902_v33, %v6901_v7  ;;  %2441 = vmatpush1.msra.mxu0 %v2153_v19  ;;  %2582 = vmatprep.subr.mxu1 %v2156_v61  ;;  %v6906_v61 = vld [vmem:[#allocation70_spill] sm:$0xff] }
 0x54f   : > { %v2086_v10 = vsel %vm488_vm5, %v5534_v0, %v5248_v49  ;;  %2442 = vmatprep.subr.mxu0 %v2102_v29  ;;  %2583 = vmatpush1.msra.mxu1 %v2155_v20  ;;  %v2085_v44 = vsel %vm488_vm5, %v6903_v63, %v5189_v13  ;;  %v2097_v21 = vmul.f32 %v2087_v59, %v6898_v47  ;;  %v6904_v0 = vld [vmem:[#allocation44_spill] sm:$0xff]  ;;  %v6908_v59 = vld [vmem:[#allocation43_spill] sm:$0xff] }
 0x550   : > { %v5847_v31 = vpop.permute.xlu0 %2241  ;;  %v5849_v16 = vpop.permute.xlu1 %2249  ;;  %v2100_v8 = vmul.f32 %v2075_v4, %v6899_v3  ;;  %2443 = vmatpush1.msra.mxu0 %v2101_v40  ;;  %2584 = vmatprep.subr.mxu1 %v2104_v6  ;;  %v5858_v49 = vmul.f32 %v2013_v38, %v6904_v0  ;;  %v2095_v20 = vmul.f32 %v2078_v50, %v6895_v39  ;;  %v6905_v38 = vld [vmem:[#allocation65_spill] sm:$0xff] }
 0x551   : > { %v2099_v51 = vmul.f32 %v2079_v52, %v6895_v39  ;;  %2444 = vmatprep.subr.mxu0 %v5712_v17  ;;  %2585 = vmatpush1.msra.mxu1 %v2103_v45  ;;  %v2038_v23 = vmul.f32 %v2020_v46, %v3665_v30  ;;  %v2093_v13 = vmul.f32 %v2086_v10, %v6898_v47  ;;  %v6909_v40 = vld [vmem:[#allocation121_spill] sm:$0xff] }
 0x552   : > { %v2096_v29 = vmul.f32 %v2074_v54, %v6899_v3  ;;  %2445 = vmatpush1.msra.mxu0 %v2097_v21  ;;  %2586 = vmatprep.subr.mxu1 %v2100_v8  ;;  %v2089_v19 = vmul.f32 %v2085_v44, %v6898_v47  ;;  %v2092_v1 = vmul.f32 %v6905_v38, %v6899_v3  ;;  %v6910_v3 = vld [vmem:[#allocation22_spill] sm:$0xff]  ;;  %v6911_v6 = vld [vmem:[#allocation105_spill] sm:$0xff] }
 0x553   : > { %v2016_v39 = vsel %vm455_vm6, %v6901_v7, %v5604_v37  ;;  %2446 = vmatprep.subr.mxu0 %v5693_v14  ;;  %2587 = vmatpush1.msra.mxu1 %v2099_v51  ;;  %v2011_v53 = vsel %vm455_vm6, %v6906_v61, %v5606_v28  ;;  %v2023_v14 = vsel %vm455_vm6, %v5606_v28, %v6879_v42  ;;  %v6912_v28 = vld [vmem:[#allocation51_spill] sm:$0xff]  ;;  %v6915_v8 = vld [vmem:[#allocation81_spill] sm:$0xff]  ;;  %v6917_v51 = vld [vmem:[#allocation66_spill] sm:$0xff] }
 0x554   : > { %v5874_v30 = vpop.permute.xlu0 %2183  ;;  %v2008_v17 = vpop.permute.xlu1 %2007  ;;  %2447 = vmatpush1.msra.mxu0 %v2093_v13  ;;  %2588 = vmatprep.subr.mxu1 %v2096_v29  ;;  %v1956_v26 = vsel %vm422_vm7, %v6911_v6, %v6910_v3  ;;  %v2015_v42 = vsel %vm455_vm6, %v5349_v48, %v6906_v61  ;;  %v2039_v50 = vmul.f32 %v2016_v39, %v6904_v0  ;;  %v6919_v38 = vld [vmem:[#allocation46_spill] sm:$0xff]  ;;  %v6920_v39 = vld [vmem:[#allocation47_spill] sm:$0xff] }
 0x555   : > { %v2012_v41 = vsel %vm455_vm6, %v5604_v37, %v2008_v17  ;;  %v2024_v55 = vsel %vm455_vm6, %v2008_v17, %v6902_v33  ;;  %2448 = vmatprep.subr.mxu0 %v5635_v34  ;;  %2589 = vmatpush1.msra.mxu1 %v2095_v20  ;;  %v2014_v37 = vsel %vm455_vm6, %v5278_v25, %v6909_v40  ;;  %v6913_v33 = vld [vmem:[#allocation126_spill] sm:$0xff]  ;;  %v6916_v20 = vld [vmem:[#allocation69_spill] sm:$0xff] }
 0x556   : > { %v2037_v4 = vmul.f32 %v2024_v55, %v6907_v2  ;;  %v2040_v47 = vmul.f32 %v2012_v41, %v6908_v59  ;;  %2449 = vmatpush1.msra.mxu0 %v2089_v19  ;;  %2590 = vmatprep.subr.mxu1 %v2092_v1  ;;  %v2010_v34 = vsel %vm455_vm6, %v6909_v40, %v6912_v28  ;;  %v6921_v61 = vld [vmem:[#allocation62_spill] sm:$0xff]  ;;  %v6922_v41 = vld [vmem:[#allocation48_spill] sm:$0xff] }
 0x557   : > { %v2022_v25 = vsel %vm455_vm6, %v6912_v28, %v5256_v11  ;;  %2450 = vmatprep.subr.mxu0 %v2038_v23  ;;  %2591 = vmatpush1.msra.mxu1 %v5793_v18  ;;  %v2021_v46 = vsel %vm455_vm6, %v6913_v33, %v5199_v57  ;;  %v2033_v52 = vmul.f32 %v2023_v14, %v6907_v2  ;;  %v6914_v11 = vld [vmem:[#allocation102_spill] sm:$0xff]  ;;  %v6918_v23 = vld [vmem:[#allocation57_spill] sm:$0xff]  ;;  %v6931_v33 = vld [vmem:[#allocation64_spill] sm:$0xff] }
 0x558   : > { %v5915_v7 = vpop.permute.xlu0 %2261  ;;  %v5917_v48 = vpop.permute.xlu1 %2233  ;;  %v2036_v54 = vmul.f32 %v2011_v53, %v6908_v59  ;;  %2451 = vmatpush1.msra.mxu0 %v2037_v4  ;;  %2592 = vmatprep.subr.mxu1 %v2040_v47  ;;  %v1949_v18 = vsel %vm422_vm7, %v5233_v27, %v6914_v11  ;;  %v2031_v10 = vmul.f32 %v2014_v37, %v6904_v0  ;;  %v6923_v14 = vld [vmem:[#allocation97_spill] sm:$0xff]  ;;  %v6925_v4 = vld [vmem:[#allocation122_spill] sm:$0xff]  ;;  %v6926_v47 = vld [vmem:[#allocation80_spill] sm:$0xff] }
 0x559   : > { %v2035_v45 = vmul.f32 %v2015_v42, %v6904_v0  ;;  %2452 = vmatprep.subr.mxu0 %v5715_v43  ;;  %2593 = vmatpush1.msra.mxu1 %v2039_v50  ;;  %v1974_v57 = vmul.f32 %v1956_v26, %v6882_v60  ;;  %v2029_v63 = vmul.f32 %v2022_v25, %v6907_v2  ;;  %v6929_v25 = vld [vmem:[#allocation120_spill] sm:$0xff]  ;;  %v6930_v50 = vld [vmem:[#allocation79_spill] sm:$0xff] }
 0x55a   : > { %v2032_v44 = vmul.f32 %v2010_v34, %v6908_v59  ;;  %2453 = vmatpush1.msra.mxu0 %v2033_v52  ;;  %2594 = vmatprep.subr.mxu1 %v2036_v54  ;;  %v2025_v21 = vmul.f32 %v2021_v46, %v6907_v2  ;;  %v2028_v27 = vmul.f32 %v6915_v8, %v6908_v59  ;;  %v6928_v34 = vld [vmem:[#allocation107_spill] sm:$0xff] }
 0x55b   : > { %v1952_v0 = vsel %vm422_vm7, %v6910_v3, %v6916_v20  ;;  %2454 = vmatprep.subr.mxu0 %v5696_v35  ;;  %2595 = vmatpush1.msra.mxu1 %v2035_v45  ;;  %v1947_v13 = vsel %vm422_vm7, %v6918_v23, %v6917_v51  ;;  %v1959_v35 = vsel %vm422_vm7, %v6917_v51, %v6881_v24  ;;  %v6924_v24 = vld [vmem:[#allocation110_spill] sm:$0xff] }
 0x55c   : > { %v5943_v60 = vpop.permute.xlu0 %2181  ;;  %v1944_v43 = vpop.permute.xlu1 %1943  ;;  %2455 = vmatpush1.msra.mxu0 %v2029_v63  ;;  %2596 = vmatprep.subr.mxu1 %v2032_v44  ;;  %v5964_v53 = vmul.f32 %v5744_v32, %v6690_v15  ;;  %v1963_v55 = vmul.f32 %v1949_v18, %v6922_v41  ;;  %v1951_v2 = vsel %vm422_vm7, %v6923_v14, %v6918_v23  ;;  %v6932_v18 = vld [vmem:[#allocation61_spill] sm:$0xff]  ;;  %v6934_v63 = vld [vmem:[#allocation124_spill] sm:$0xff]  ;;  %v6935_v44 = vld [vmem:[#allocation119_spill] sm:$0xff] }
 0x55d   : > { %v1948_v29 = vsel %vm422_vm7, %v6916_v20, %v1944_v43  ;;  %v1960_v19 = vsel %vm422_vm7, %v1944_v43, %v6911_v6  ;;  %2456 = vmatprep.subr.mxu0 %v6921_v61  ;;  %2597 = vmatpush1.msra.mxu1 %v2031_v10  ;;  %v1946_v59 = vsel %vm422_vm7, %v6925_v4, %v6924_v24  ;;  %v6927_v6 = vld [vmem:[#allocation74_spill] sm:$0xff]  ;;  %v6933_v10 = vld [vmem:[#allocation123_spill] sm:$0xff]  ;;  %v6938_v23 = vld [vmem:[#allocation53_spill] sm:$0xff] }
 0x55e   : > { %v1973_v1 = vmul.f32 %v1960_v19, %v6919_v38  ;;  %v1976_v17 = vmul.f32 %v1948_v29, %v6920_v39  ;;  %2457 = vmatpush1.msra.mxu0 %v2025_v21  ;;  %2598 = vmatprep.subr.mxu1 %v2028_v27  ;;  %v1958_v32 = vsel %vm422_vm7, %v6924_v24, %v6926_v47  ;;  %v6937_v43 = vld [vmem:[#allocation59_spill] sm:$0xff]  ;;  %v6940_v19 = vld [vmem:[#allocation101_spill] sm:$0xff]  ;;  %v6945_v24 = vld [vmem:[#allocation82_spill] sm:$0xff] }
 0x55f   : > { %v1975_v40 = vmul.f32 %v1952_v0, %v6922_v41  ;;  %2458 = vmatprep.subr.mxu0 %v1974_v57  ;;  %2599 = vmatpush1.msra.mxu1 %v5858_v49  ;;  %v1950_v26 = vsel %vm422_vm7, %v6927_v6, %v6925_v4  ;;  %v1969_v42 = vmul.f32 %v1959_v35, %v6919_v38  ;;  %v6946_v4 = vld [vmem:[#allocation49_spill] sm:$0xff]  ;;  %v6947_v47 = vld [vmem:[#allocation99_spill] sm:$0xff] }
 0x560   : > { %v5981_v37 = vpop.permute.xlu0 %2259  ;;  %v5983_v3 = vpop.permute.xlu1 %2191  ;;  %v1972_v28 = vmul.f32 %v1947_v13, %v6920_v39  ;;  %2459 = vmatpush1.msra.mxu0 %v1973_v1  ;;  %2600 = vmatprep.subr.mxu1 %v1976_v17  ;;  %v2276_v49 = vsel %vm587_vm2, %v6929_v25, %v6928_v34  ;;  %v1957_v46 = vsel %vm422_vm7, %v6931_v33, %v6930_v50  ;;  %v6941_v1 = vld [vmem:[#allocation23_spill] sm:$0xff] }
 0x561   : > { %v1971_v52 = vmul.f32 %v1951_v2, %v6922_v41  ;;  %2460 = vmatprep.subr.mxu0 %v5718_v56  ;;  %2601 = vmatpush1.msra.mxu1 %v1975_v40  ;;  %v1965_v54 = vmul.f32 %v1958_v32, %v6919_v38  ;;  %v1968_v11 = vmul.f32 %v1946_v59, %v6920_v39  ;;  %v6936_v56 = vld [vmem:[#allocation91_spill] sm:$0xff]  ;;  %v6948_v32 = vld [vmem:[#allocation84_spill] sm:$0xff] }
 0x562   : > { %v2336_v45 = vsel %vm620_vm1, %v6933_v10, %v6932_v18  ;;  %2461 = vmatpush1.msra.mxu0 %v1969_v42  ;;  %2602 = vmatprep.subr.mxu1 %v1972_v28  ;;  %v1967_v57 = vmul.f32 %v1950_v26, %v6922_v41  ;;  %v2334_v21 = vsel %vm620_vm1, %v6935_v44, %v6934_v63  ;;  %v6942_v17 = vld [vmem:[#allocation55_spill] sm:$0xff]  ;;  %v6944_v41 = vld [vmem:[#allocation129_spill] sm:$0xff]  ;;  %v6949_v42 = vld [vmem:[#allocation26_spill] sm:$0xff] }
 0x563   : > { %v2340_v8 = vsel %vm620_vm1, %v6936_v56, %v6933_v10  ;;  %2462 = vmatprep.subr.mxu0 %v5709_v62  ;;  %2603 = vmatpush1.msra.mxu1 %v1971_v52  ;;  %v1961_v0 = vmul.f32 %v1957_v46, %v6919_v38  ;;  %v1964_v51 = vmul.f32 %v6937_v43, %v6920_v39  ;;  %v6939_v62 = vld [vmem:[#allocation116_spill] sm:$0xff]  ;;  %v6951_v46 = vld [vmem:[#allocation25_spill] sm:$0xff] }
 0x564   : > { %v6017_v27 = vpop.permute.xlu0 %2179  ;;  %v6019_v20 = vpop.permute.xlu1 %2175  ;;  %v2335_v13 = vsel %vm620_vm1, %v6888_v58, %v6938_v23  ;;  %2463 = vmatpush1.msra.mxu0 %v1965_v54  ;;  %2604 = vmatprep.subr.mxu1 %v1968_v11  ;;  %v6029_v29 = vmul.f32 %v2276_v49, %v6885_v9  ;;  %v2333_v35 = vsel %vm620_vm1, %v6940_v19, %v6939_v62  ;;  %v6943_v58 = vld [vmem:[#allocation78_spill] sm:$0xff]  ;;  %v6950_v28 = vld [vmem:[#allocation24_spill] sm:$0xff] }
 0x565   : > { %v2358_v38 = vmul.f32 %v2336_v45, %v6941_v1  ;;  %2464 = vmatprep.subr.mxu0 %v6942_v17  ;;  %2605 = vmatpush1.msra.mxu1 %v1967_v57  ;;  %v2350_v39 = vmul.f32 %v2334_v21, %v6941_v1  ;;  %v2357_v61 = vmul.f32 %v2340_v8, %v6690_v15  ;;  %v6953_v57 = vld [vmem:[#allocation27_spill] sm:$0xff]  ;;  %v6955_v21 = vld [vmem:[#allocation50_spill] sm:$0xff]  ;;  %v6956_v43 = vld [vmem:[#allocation88_spill] sm:$0xff] }
 0x566   : > { %v2342_v14 = vsel %vm620_vm1, %v6944_v41, %v6943_v58  ;;  %2465 = vmatpush1.msra.mxu0 %v1961_v0  ;;  %2606 = vmatprep.subr.mxu1 %v1964_v51  ;;  %v2354_v2 = vmul.f32 %v2335_v13, %v6941_v1  ;;  %v2343_v59 = vsel %vm620_vm1, %v6946_v4, %v6945_v24  ;;  %v6957_v13 = vld [vmem:[#allocation117_spill] sm:$0xff]  ;;  %v6960_v58 = vld [vmem:[#allocation30_spill] sm:$0xff] }
 0x567   : > { %v2271_v40 = vsel %vm587_vm2, %v6948_v32, %v6947_v47  ;;  %2466 = vmatprep.subr.mxu0 %v2358_v38  ;;  %2607 = vmatpush1.msra.mxu1 %v1963_v55  ;;  %v2346_v26 = vmul.f32 %v2333_v35, %v6941_v1  ;;  %v2351_v49 = vmul.f32 %v6950_v28, %v6949_v42  ;;  %v6952_v55 = vld [vmem:[#allocation112_spill] sm:$0xff] }
 0x568   : > { %v2328_v15 = vpop.permute.xlu0 %2327  ;;  %v6052_v6 = vpop.permute.xlu1 %2189  ;;  %2467 = vmatpush2.msra.mxu0 %v2357_v61  ;;  %v2352_v52 = vmul.f32 %v2342_v14, %v6951_v46  ;;  %v2355_v54 = vmul.f32 %v6952_v55, %v6949_v42  ;;  %v2356_v45 = vmul.f32 %v2343_v59, %v6951_v46  ;;  %v2290_v63 = vmul.f32 %v2271_v40, %v6953_v57  ;;  %v6961_v14 = vld [vmem:[#allocation29_spill] sm:$0xff] }
 0x569   : > { %v2332_v50 = vsel %vm620_vm1, %v6932_v18, %v2328_v15  ;;  %v2344_v33 = vsel %vm620_vm1, %v2328_v15, %v6936_v56  ;;  %2468 = vmatprep.subr.mxu0 %v2354_v2  ;;  %v6954_v18 = vld [vmem:[#allocation58_spill] sm:$0xff]  ;;  %v2270_v56 = vsel %vm587_vm2, %v5771_v22, %v6955_v21  ;;  %v2274_v8 = vsel %vm587_vm2, %v5773_v36, %v5771_v22 }
 0x56a   : > { %v2359_v11 = vmul.f32 %v2332_v50, %v6949_v42  ;;  %v2360_v10 = vmul.f32 %v2344_v33, %v6951_v46  ;;  %v2272_v44 = vsel %vm587_vm2, %v6928_v34, %v6954_v18  ;;  %2469 = vmatpush2.msra.mxu0 %v5964_v53  ;;  %v2329_v0 = vsel %vm620_vm1, %v6939_v62, %v5802_v5  ;;  %v6958_v62 = vld [vmem:[#allocation54_spill] sm:$0xff]  ;;  %v6963_v33 = vld [vmem:[#allocation31_spill] sm:$0xff] }
 0x56b   : > { %v2341_v34 = vsel %vm620_vm1, %v5802_v5, %v6956_v43  ;;  %2470 = vmatprep.subr.mxu0 %v2350_v39  ;;  %v2269_v22 = vsel %vm587_vm2, %v5847_v31, %v5849_v16  ;;  %v2267_v53 = vsel %vm587_vm2, %v6947_v47, %v5915_v7  ;;  %v2279_v5 = vsel %vm587_vm2, %v5915_v7, %v6957_v13  ;;  %v6959_v39 = vld [vmem:[#allocation60_spill] sm:$0xff] }
 0x56c   : > { %v2258_v51 = vpop.permute.xlu0 %2257  ;;  %2608 = vmatprep.subr.mxu1 %v2360_v10  ;;  %v6091_v23 = vpop.permute.xlu1 %2173  ;;  %2471 = vmatpush2.msra.mxu0 %v6958_v62  ;;  %v2294_v19 = vmul.f32 %v2272_v44, %v6953_v57  ;;  %v2286_v35 = vmul.f32 %v2270_v56, %v6953_v57  ;;  %v2273_v1 = vsel %vm587_vm2, %v5917_v48, %v5847_v31 }
 0x56d   : > { %2609 = vmatpush2.msra.mxu1 %v2359_v11  ;;  %2472 = vmatprep.subr.mxu0 %v2346_v26  ;;  %v2285_v38 = vmul.f32 %v2274_v8, %v6885_v9  ;;  %v2347_v17 = vmul.f32 %v2329_v0, %v6949_v42  ;;  %v2348_v7 = vmul.f32 %v2341_v34, %v6951_v46  ;;  %v6962_v26 = vld [vmem:[#allocation52_spill] sm:$0xff]  ;;  %v6965_v8 = vld [vmem:[#allocation34_spill] sm:$0xff] }
 0x56e   : > { %2610 = vmatprep.subr.mxu1 %v2356_v45  ;;  %2473 = vmatpush2.msra.mxu0 %v6959_v39  ;;  %v2282_v61 = vmul.f32 %v2269_v22, %v6953_v57  ;;  %v2291_v41 = vmul.f32 %v2267_v53, %v6960_v58  ;;  %v2292_v2 = vmul.f32 %v2279_v5, %v6961_v14 }
 0x56f   : > { %2611 = vmatpush2.msra.mxu1 %v2355_v54  ;;  %2474 = vmatprep.subr.mxu0 %v2294_v19  ;;  %v2281_v4 = vmul.f32 %v2273_v1, %v6885_v9  ;;  %v2266_v32 = vsel %vm587_vm2, %v6955_v21, %v5981_v37  ;;  %v2278_v15 = vsel %vm587_vm2, %v5981_v37, %v5773_v36  ;;  %v6967_v1 = vld [vmem:[#allocation109_spill] sm:$0xff] }
 0x570   : > { %v2264_v24 = vpop.permute.xlu0 %2263  ;;  %2612 = vmatprep.subr.mxu1 %v2352_v52  ;;  %v6119_v31 = vpop.permute.xlu1 %2187  ;;  %2475 = vmatpush2.msra.mxu0 %v6029_v29  ;;  %v2212_v29 = vsel %vm554_vm3, %v6019_v20, %v5874_v30  ;;  %v2207_v42 = vsel %vm554_vm3, %v5943_v60, %v6052_v6  ;;  %v2265_v36 = vsel %vm587_vm2, %v5849_v16, %v2258_v51  ;;  %v6964_v52 = vld [vmem:[#allocation32_spill] sm:$0xff] }
 0x571   : > { %v2268_v59 = vsel %vm587_vm2, %v6954_v18, %v2264_v24  ;;  %v2280_v47 = vsel %vm587_vm2, %v2264_v24, %v6929_v25  ;;  %2613 = vmatpush2.msra.mxu1 %v2351_v49  ;;  %2476 = vmatprep.subr.mxu0 %v2290_v63  ;;  %v2208_v25 = vsel %vm554_vm3, %v5874_v30, %v5983_v3 }
 0x572   : > { %v2295_v40 = vmul.f32 %v2268_v59, %v6960_v58  ;;  %v2296_v9 = vmul.f32 %v2280_v47, %v6961_v14  ;;  %2614 = vmatprep.subr.mxu1 %v2348_v7  ;;  %2477 = vmatpush2.msra.mxu0 %v6962_v26  ;;  %v2277_v37 = vsel %vm587_vm2, %v2258_v51, %v5917_v48  ;;  %v6968_v7 = vld [vmem:[#allocation86_spill] sm:$0xff]  ;;  %v1910_v26 = vld [vmem:[#allocation9] sm:$0xff] }
 0x573   : > { %2615 = vmatpush2.msra.mxu1 %v2347_v17  ;;  %2478 = vmatprep.subr.mxu0 %v2286_v35  ;;  %v2287_v49 = vmul.f32 %v2266_v32, %v6960_v58  ;;  %v2211_v50 = vsel %vm554_vm3, %v6091_v23, %v5943_v60  ;;  %v2206_v16 = vsel %vm554_vm3, %v6017_v27, %v6119_v31  ;;  %v6972_v47 = vld [vmem:[#allocation114_spill] sm:$0xff] }
 0x574   : > { %v2178_v28 = vpop.permute.xlu0 %2177  ;;  %2616 = vmatprep.subr.mxu1 %v2296_v9  ;;  %v2172_v30 = vpop.permute.xlu1 %2171  ;;  %2479 = vmatpush2.msra.mxu0 %v2285_v38  ;;  %v2288_v48 = vmul.f32 %v2278_v15, %v6961_v14  ;;  %v2230_v46 = vmul.f32 %v2208_v25, %v6963_v33  ;;  %v2229_v55 = vmul.f32 %v2212_v29, %v6964_v52  ;;  %v6974_v15 = vld [vmem:[#allocation20_spill] sm:$0xff]  ;;  %v6975_v29 = vld [vmem:[#allocation77_spill] sm:$0xff] }
 0x575   : > { %2617 = vmatpush2.msra.mxu1 %v2295_v40  ;;  %2480 = vmatprep.subr.mxu0 %v2282_v61  ;;  %v2226_v54 = vmul.f32 %v2207_v42, %v6963_v33  ;;  %v2283_v11 = vmul.f32 %v2265_v36, %v6960_v58  ;;  %v2284_v60 = vmul.f32 %v2277_v37, %v6961_v14  ;;  %v6973_v40 = vld [vmem:[#allocation89_spill] sm:$0xff]  ;;  %v6976_v42 = vld [vmem:[#allocation94_spill] sm:$0xff]  ;;  %v6977_v37 = vld [vmem:[#allocation75_spill] sm:$0xff] }
 0x576   : > { %2618 = vmatprep.subr.mxu1 %v2292_v2  ;;  %2481 = vmatpush2.msra.mxu0 %v2281_v4  ;;  %v2225_v10 = vmul.f32 %v2211_v50, %v6964_v52  ;;  %v2222_v45 = vmul.f32 %v2206_v16, %v6963_v33  ;;  %v2210_v57 = vsel %vm554_vm3, %v2172_v30, %v6017_v27  ;;  %v6966_v27 = vld [vmem:[#allocation33_spill] sm:$0xff]  ;;  %v6970_v2 = vld [vmem:[#allocation72_spill] sm:$0xff]  ;;  %v6979_v50 = vld [vmem:[#allocation67_spill] sm:$0xff] }
 0x577   : > { %2619 = vmatpush2.msra.mxu1 %v2291_v41  ;;  %2482 = vmatprep.subr.mxu0 %v2230_v46  ;;  %v2221_v51 = vmul.f32 %v2210_v57, %v6964_v52  ;;  %v6969_v41 = vld [vmem:[#allocation96_spill] sm:$0xff]  ;;  %v6980_v16 = vld [vmem:[#allocation73_spill] sm:$0xff] }
 0x578   : > { %v2200_v63 = vpop.permute.xlu0 %2199  ;;  %2620 = vmatprep.subr.mxu1 %v2288_v48  ;;  %v2186_v18 = vpop.permute.xlu1 %2185  ;;  %2483 = vmatpush2.msra.mxu0 %v2229_v55  ;;  %v6971_v4 = vld [vmem:[#allocation108_spill] sm:$0xff] }
 0x579   : > { %v2204_v44 = vsel %vm554_vm3, %v5983_v3, %v2200_v63  ;;  %v2216_v21 = vsel %vm554_vm3, %v2200_v63, %v6019_v20  ;;  %v2205_v56 = vsel %vm554_vm3, %v2178_v28, %v2186_v18  ;;  %2621 = vmatpush2.msra.mxu1 %v2287_v49  ;;  %2484 = vmatprep.subr.mxu0 %v2226_v54  ;;  %v6985_v63 = vld [vmem:[#allocation83_spill] sm:$0xff] }
 0x57a   : > { %v2231_v0 = vmul.f32 %v2204_v44, %v6965_v8  ;;  %v2232_v43 = vmul.f32 %v2216_v21, %v6966_v27  ;;  %v2218_v34 = vmul.f32 %v2205_v56, %v6963_v33  ;;  %2622 = vmatprep.subr.mxu1 %v2284_v60  ;;  %2485 = vmatpush2.msra.mxu0 %v2225_v10  ;;  %v6981_v33 = vld [vmem:[#allocation21_spill] sm:$0xff]  ;;  %v6986_v44 = vld [vmem:[#allocation92_spill] sm:$0xff] }
 0x57b   : > { %2623 = vmatpush2.msra.mxu1 %v2283_v11  ;;  %2486 = vmatprep.subr.mxu0 %v2222_v45  ;;  %v6983_v11 = vld [vmem:[#allocation56_spill] sm:$0xff]  ;;  %v6984_v45 = vld [vmem:[#allocation115_spill] sm:$0xff]  ;;  %v6987_v21 = vld [vmem:[#allocation93_spill] sm:$0xff] }
 0x57c   : > { %v2198_v3 = vpop.permute.xlu0 %2197  ;;  %2624 = vmatprep.subr.mxu1 %v2232_v43  ;;  %v2170_v20 = vpop.permute.xlu1 %2169  ;;  %2487 = vmatpush2.msra.mxu0 %v2221_v51 }
 0x57d   : > { %v2203_v22 = vsel %vm554_vm3, %v6052_v6, %v2198_v3  ;;  %v2215_v53 = vsel %vm554_vm3, %v2198_v3, %v6091_v23  ;;  %v2209_v13 = vsel %vm554_vm3, %v2170_v20, %v2178_v28  ;;  %2625 = vmatpush2.msra.mxu1 %v2231_v0  ;;  %2488 = vmatprep.subr.mxu0 %v2218_v34  ;;  %v6978_v28 = vld [vmem:[#allocation87_spill] sm:$0xff]  ;;  %v6991_v3 = vld [vmem:[#allocation98_spill] sm:$0xff] }
 0x57e   : > { %v2227_v5 = vmul.f32 %v2203_v22, %v6965_v8  ;;  %v2228_v62 = vmul.f32 %v2215_v53, %v6966_v27  ;;  %v2217_v19 = vmul.f32 %v2209_v13, %v6964_v52  ;;  %v6982_v52 = vld [vmem:[#allocation113_spill] sm:$0xff]  ;;  %v6990_v34 = vld [vmem:[#allocation71_spill] sm:$0xff]  ;;  %v6994_v22 = vld [vmem:[#allocation68_spill] sm:$0xff] }
 0x580   : > { %v2194_v35 = vpop.permute.xlu0 %2193  ;;  %2489 = vmatpush2.msra.mxu0 %v2217_v19  ;;  %2626 = vmatprep.subr.mxu1 %v2228_v62  ;;  %v2196_v6 = vpop.permute.xlu1 %2195 }
 0x581   : > { %2490 = vmatprep.subr.mxu0 %v6967_v1  ;;  %2627 = vmatpush2.msra.mxu1 %v2227_v5  ;;  %v2213_v23 = vsel %vm554_vm3, %v2194_v35, %v2170_v20  ;;  %v2202_v38 = vsel %vm554_vm3, %v6119_v31, %v2196_v6  ;;  %v2214_v17 = vsel %vm554_vm3, %v2196_v6, %v2172_v30  ;;  %v6993_v20 = vmov 0.0  }
 0x582   : > { %2491 = vmatpush2.msra.mxu0 %v6968_v7  ;;  %v2201_v39 = vsel %vm554_vm3, %v2186_v18, %v2194_v35  ;;  %v2223_v61 = vmul.f32 %v2202_v38, %v6965_v8  ;;  %v2224_v58 = vmul.f32 %v2214_v17, %v6966_v27  ;;  %v2220_v24 = vmul.f32 %v2213_v23, %v6966_v27  ;;  %v6989_v27 = vld [vmem:[#allocation111_spill] sm:$0xff]  ;;  %v3002_v23 = vld [vmem:[%s3398_s18] sm:$0xff]  ;;  %v3003_v7 = vld [vmem:[%s3398_s18 + $0x8] sm:$0xff] }
 0x583   : > { %2492 = vmatprep.subr.mxu0 %v6969_v41  ;;  %v2219_v59 = vmul.f32 %v2201_v39, %v6965_v8  ;;  %v6988_v8 = vld [vmem:[#allocation90_spill] sm:$0xff] }
 0x584   : > { %v2390_v14 = vpop.permute.xlu0 %2389  ;;  %2493 = vmatpush2.msra.mxu0 %v6970_v2  ;;  %2628 = vmatprep.subr.mxu1 %v2224_v58  ;;  %v2392_v31 = vpop.permute.xlu1 %2391 }
 0x585   : > { %2494 = vmatprep.subr.mxu0 %v6971_v4  ;;  %v2408_v32 = vsel %vm653_vm0, %v2392_v31, %v6972_v47  ;;  %2629 = vmatpush2.msra.mxu1 %v2223_v61  ;;  %v2396_v9 = vsel %vm653_vm0, %v6973_v40, %v2392_v31  ;;  %v2407_v36 = vsel %vm653_vm0, %v2390_v14, %v6976_v42  ;;  %v3004_v4 = vld [vmem:[%s3398_s18 + $0x10] sm:$0xff] }
 0x586   : > { %v2424_v25 = vmul.f32 %v2408_v32, %v6974_v15  ;;  %2495 = vmatpush2.msra.mxu0 %v6975_v29  ;;  %2630 = vmatprep.subr.mxu1 %v2220_v24  ;;  %v2395_v30 = vsel %vm653_vm0, %v6978_v28, %v2390_v14  ;;  %v2423_v46 = vmul.f32 %v2396_v9, %v6981_v33  ;;  %v3005_v32 = vld [vmem:[%s3398_s18 + $0x18] sm:$0xff] }
 0x587   : > { %2496 = vmatprep.subr.mxu0 %v6977_v37  ;;  %2631 = vmatpush2.msra.mxu1 %v2219_v59  ;;  %v2420_v54 = vmul.f32 %v2407_v36, %v6974_v15  ;;  %v2419_v57 = vmul.f32 %v2395_v30, %v6981_v33 }
 0x588   : > { %v2386_v49 = vpop.permute.xlu0 %2385  ;;  %2497 = vmatpush2.msra.mxu0 %v6979_v50  ;;  %2632 = vmatprep.subr.mxu1 %v6980_v16  ;;  %v2388_v48 = vpop.permute.xlu1 %2387 }
 0x589   : > { %v2406_v55 = vsel %vm653_vm0, %v2388_v48, %v6982_v52  ;;  %2499 = vmatmul.mubr.f32.vlgmr.msra.gmra.mxu0 %v1910_v26  ;;  %v2394_v60 = vsel %vm653_vm0, %v6983_v11, %v2388_v48  ;;  %2633 = vmatpush2.msra.mxu1 %v6984_v45  ;;  %v2405_v18 = vsel %vm653_vm0, %v2386_v49, %v6985_v63 }
 0x58a   : > { %v2416_v10 = vmul.f32 %v2406_v55, %v6974_v15  ;;  %2671 = vmatprep.subr.mxu0 %v2424_v25  ;;  %2634 = vmatprep.subr.mxu1 %v6986_v44  ;;  %v2393_v56 = vsel %vm653_vm0, %v6987_v21, %v2386_v49  ;;  %v2415_v0 = vmul.f32 %v2394_v60, %v6981_v33 }
 0x58b   : > { %2672 = vmatpush1.msra.mxu0 %v2423_v46  ;;  %2635 = vmatpush2.msra.mxu1 %v6988_v8  ;;  %v2412_v43 = vmul.f32 %v2405_v18, %v6974_v15  ;;  %v2411_v51 = vmul.f32 %v2393_v56, %v6981_v33 }
 0x58c   : > { %2673 = vmatprep.subr.mxu0 %v2420_v54  ;;  %2636 = vmatprep.subr.mxu1 %v6989_v27 }
 0x58d   : > { %2674 = vmatpush1.msra.mxu0 %v2419_v57  ;;  %2637 = vmatpush2.msra.mxu1 %v6990_v34 }
 0x58e   : > { %2675 = vmatprep.subr.mxu0 %v2416_v10  ;;  %2638 = vmatprep.subr.mxu1 %v6991_v3 }
 0x58f   : > { %2676 = vmatpush1.msra.mxu0 %v2415_v0  ;;  %2639 = vmatpush2.msra.mxu1 %v6992_v12 }
 0x590   : > { %2677 = vmatprep.subr.mxu0 %v2412_v43  ;;  %2641 = vmatmul.mubr.f32.vlgmr.msra.gmra.mxu1 %v1910_v26 }
 0x591   : > { %2678 = vmatpush1.msra.mxu0 %v2411_v51  ;;  %2711 = vmatprep.mubr.f32.mxu0 %v6993_v20 }
 0x592   : > { %2888 = vmatmul.mubr.msk.f32.vlgmr.msra.gmra.mxu0 %vm1491_vm9, %v6994_v22 }
 0x595   : > { %v2429_v53 = vpop.permute.xlu1 %2428 }
 0x5f8   : > { %v2571_v13 = vpop.f32.mrf.mxu1 }
 0x5fa   : > { %v2573_v1 = vpop.f32.mrf.mxu1 }
 0x649   : > { %v2500_v5 = vpop.f32.mrf.mxu0 }
 0x64a   : > { %v2501_v62 = vadd.f32 %v2500_v5, %v2429_v53 }
 0x64b   : > { %v2502_v19 = vpop.f32.mrf.mxu0 }
 0x64c   : > { %v2572_v35 = vadd.f32 %v2571_v13, %v2501_v62  ;;  %v2503_v6 = vadd.f32 %v2502_v19, %v2429_v53 }
 0x64e   : > { %v2718_v38 = vadd.f32 %v3002_v23, %v2572_v35  ;;  %v2574_v17 = vadd.f32 %v2573_v1, %v2503_v6 }
 0x650   : > { %2722 = vst [vmem:[%s394_s17] sm:$0xff] %v2718_v38  ;;  %v2719_v39 = vadd.f32 %v3003_v7, %v2574_v17  ;;  %v2642_v61 = vpop.f32.mrf.mxu1 }
 0x651   : > { %v2643_v58 = vadd.f32 %v2642_v61, %v2429_v53 }
 0x652   : > { %2723 = vst [vmem:[%s394_s17 + $0x8] sm:$0xff] %v2719_v39  ;;  %v2713_v41 = vpop.f32.mrf.mxu0  ;;  %v2644_v14 = vpop.f32.mrf.mxu1 }
 0x653   : > { %v2714_v2 = vadd.f32 %v2713_v41, %v2643_v58  ;;  %v2645_v24 = vadd.f32 %v2644_v14, %v2429_v53 }
 0x654   : > { %v2715_v31 = vpop.f32.mrf.mxu0 }
 0x655   : > { %v2720_v59 = vadd.f32 %v3004_v4, %v2714_v2  ;;  %v2716_v47 = vadd.f32 %v2715_v31, %v2645_v24 }
 0x657   : > { %2724 = vst [vmem:[%s394_s17 + $0x10] sm:$0xff] %v2720_v59  ;;  %v2721_v40 = vadd.f32 %v3005_v32, %v2716_v47 }
 0x659   : > { %2725 = vst [vmem:[%s394_s17 + $0x18] sm:$0xff] %v2721_v40 }
 0x65a   : > { %3138 = shalt.err (!%p3135_p13)
}
 0x65b   : > { %s3139_s18 = scalar_lea.hbm %s2739_s25, 512  ;;  %s3143_s23 = scalar_lea.hbm %s6316_s9, 1024 }
 0x65c   : > { %p3140_p3 = scmp.ne.s32.totalorder %s2739_s25, %s3139_s18  ;;  %p3144_p4 = scmp.lt.s32.totalorder %s2739_s25, %s6316_s9 }
 0x65d   : > { %p3145_p7 = scmp.lt.s32.totalorder %s3143_s23, %s3139_s18 }
 0x65e   : > { %p3141_p2 = pnand %p3140_p3, %p6995_p11 }
 0x65f   : > { %p3146_p8 = por %p3145_p7, %p3144_p4 }
 0x660   : > { %p3142_p12 = pneg %p3141_p2 }
 0x662   : > { %p3147_p9 = pnand %p3146_p8, %p3142_p12 }
 0x664   : > { %3150 = shalt.err (!%p3147_p9)
}
 0x665   : > { %2916 = dma.vmem_to_hbm [thread:$0]  (%p6995_p11), %s2742_s24, 512, %s2739_s25, %s2727_s28  }
 0x666 PF: > { %p2948_p5 = scmp.ge.s32.totalorder %s3201_s12, 2  ;;  %s2753_s29 = sand.u32 1, %s3189_s30  }
 0x667   : > { %p6996_p6 = scmp.ne.s32.totalorder %s6561_s20, 0  ;;  %s2754_s27 = scalar_lea.sflag [#allocation4], %s2753_s29 }
 0x669   : > { %p2935_p10 = pnand %p2948_p5, %p6996_p6 }
 0x66b   : > { %p2936_p0 = pneg %p2935_p10 }
 0x66d   : > { %3184 = dma.done.wait (%p2936_p0), %s2754_s27, 512  }
 0x66e   : > { %3186 = vsyncadd (%p2936_p0), %s2754_s27, 4294966784  ;;  %s6997_s16 = sld [smem:[#allocation18_spill]]  ;;  %p23_p1 = scmp.ge.s32.totalorder %s3298_s15, 4  }
 0x66f   : > { %s6998_s30 = smov %s3193_s10  ;;  %s6999_s10 = smov %s3197_s11 }
 0x670   : > { %s7001_s12 = smov %s3298_s15  ;;  %25 = sbr.rel (!%p23_p1) target bundleno = 9 (0x9), region = 113 }
 0x674   : > { %s7000_s11 = smov %s6997_s16 }
 0x675   :  { %2759 = vsyncpa [#allocation3], 1 }
 0x676   :  { %2761 = vsyncpa [#allocation3 + $0x1], 1 }
 0x677   :  { %2762 = vsyncpa [#allocation7], 1 }
 0x678   :  { %2763 = vsyncpa [#allocation10], 1 }
 0x679   :  { %2764 = vsyncpa [#allocation4], 1 }
 0x67a   :  { %2766 = vsyncpa [#allocation4 + $0x1], 1 }
 0x67b   :  { %2767 = vsyncpa [#allocation5], 1 }
 0x67c   :  { %2769 = vsyncpa [#allocation5 + $0x1], 1 }

</bundles_post_ra>
